<compile_context>
chip_gen: v7x
topology: tpu7x:2x2x1
jax: 0.10.0
libtpu: 0.0.40
codegen_flags: <defaults>
</compile_context>

<pallas_src>
import functools

import jax
import jax.numpy as jnp
from jax.experimental import pallas as pl
from jax.experimental.pallas import tpu as pltpu


# ---------------------------------------------------------------------------
# Fused Pallas kernel: stem + head + global-avg-pool + FC + sigmoid
# ---------------------------------------------------------------------------

def eff_fused_kernel(p_ref, w1_ref, s1_ref, b1_ref, w2_ref, s2_ref, b2_ref,
                     wfc_ref, bfc_ref, o_ref, acc_ref, *, s_actual, ts):
    """Grid = (batch n, spatial-tile s).  acc_ref accumulates the pooled sum."""
    s = pl.program_id(1)

    @pl.when(s == 0)
    def _():
        acc_ref[...] = jnp.zeros_like(acc_ref)

    # --- stem conv (as matmul over im2col patches) + folded BN + swish ------
    x = p_ref[0]                                                # (ts, Kp) bf16
    y1 = jnp.dot(x, w1_ref[...], preferred_element_type=jnp.float32)
    y1 = y1 * s1_ref[...] + b1_ref[...]                          # f32 epilogue
    sig1 = pl.reciprocal(1.0 + jnp.exp(-y1), approx=True)        # EUP, not VPU
    h1 = (y1 * sig1).astype(jnp.bfloat16)                        # (ts, C1p)

    # --- head pointwise conv + folded BN + swish ----------------------------
    y2 = jnp.dot(h1, w2_ref[...], preferred_element_type=jnp.float32)
    y2 = y2 * s2_ref[...] + b2_ref[...]
    sig2 = pl.reciprocal(1.0 + jnp.exp(-y2), approx=True)
    h2 = y2 * sig2                                               # (ts, C2p) f32

    # --- masked partial sum for the global average pool ---------------------
    row = jax.lax.broadcasted_iota(jnp.int32, (ts, 1), 0) + s * ts
    h2 = jnp.where(row < s_actual, h2, 0.0)
    acc_ref[...] += jnp.sum(h2, axis=0, keepdims=True)           # (1, C2p)

    # --- finalize on last spatial tile: pool mean, FC, final sigmoid --------
    @pl.when(s == pl.num_programs(1) - 1)
    def _():
        pooled = acc_ref[...] * jnp.float32(1.0 / s_actual)      # (1, C2p)
        logits = jnp.dot(pooled, wfc_ref[...],
                         preferred_element_type=jnp.float32) + bfc_ref[...]
        o_ref[0] = (1.0 / (1.0 + jnp.exp(-logits))).astype(o_ref.dtype)


# ---------------------------------------------------------------------------
# Glue (plain JAX): im2col for the 3-D stem conv, BN folding, padding
# ---------------------------------------------------------------------------

def im2col_3d(x, ksize, stride, pad):
    """x: (N, D, H, W, C) channels-last -> (N, Do*Ho*Wo, kd*kh*kw*C)."""
    N, D, H, W, C = x.shape
    kd, kh, kw = ksize
    xp = jnp.pad(x, ((0, 0), (pad, pad), (pad, pad), (pad, pad), (0, 0)))
    Do = (D + 2 * pad - kd) // stride + 1
    Ho = (H + 2 * pad - kh) // stride + 1
    Wo = (W + 2 * pad - kw) // stride + 1
    cols = []
    for dz in range(kd):
        for dy in range(kh):
            for dx in range(kw):
                cols.append(
                    xp[:, dz:dz + Do * stride:stride,
                       dy:dy + Ho * stride:stride,
                       dx:dx + Wo * stride:stride, :])
    patches = jnp.stack(cols, axis=-2)           # (N, Do, Ho, Wo, k^3, C)
    return patches.reshape(N, Do * Ho * Wo, kd * kh * kw * C), (Do, Ho, Wo)


def fold_bn(gamma, beta, mean, var, eps=1e-3):
    scale = gamma / jnp.sqrt(var + eps)
    bias = beta - mean * scale
    return scale[None, :], bias[None, :]


def round_up(x, m):
    return (x + m - 1) // m * m


def pad_to(a, shape, value=0.0):
    pads = [(0, t - s) for s, t in zip(a.shape, shape)]
    return jnp.pad(a, pads, constant_values=value)


def init_params(key, in_channels, c_stem, c_head, out_size):
    ks = jax.random.split(key, 8)
    p = {}
    p["w_stem"] = jax.random.normal(ks[0], (27 * in_channels, c_stem),
                                    jnp.float32) * 0.1
    p["bn1_gamma"] = jnp.ones((c_stem,), jnp.float32)
    p["bn1_beta"] = jnp.zeros((c_stem,), jnp.float32)
    p["bn1_mean"] = jax.random.normal(ks[1], (c_stem,), jnp.float32) * 0.05
    p["bn1_var"] = jnp.ones((c_stem,), jnp.float32)

    p["w_head"] = jax.random.normal(ks[2], (c_stem, c_head), jnp.float32) * 0.1
    p["bn2_gamma"] = jnp.ones((c_head,), jnp.float32)
    p["bn2_beta"] = jnp.zeros((c_head,), jnp.float32)
    p["bn2_mean"] = jax.random.normal(ks[3], (c_head,), jnp.float32) * 0.05
    p["bn2_var"] = jnp.ones((c_head,), jnp.float32)

    p["w_fc"] = jax.random.normal(ks[4], (c_head, out_size), jnp.float32) * 0.1
    p["b_fc"] = jax.random.normal(ks[5], (1, out_size), jnp.float32) * 0.1
    return p


# ---------------------------------------------------------------------------
# Forward pass
# ---------------------------------------------------------------------------

@jax.jit
def eff_forward(x_ncdhw, params):
    """Forward pass of Eff.  x_ncdhw: (N, C, D, H, W) float32 -> (N, out)."""
    # NCDHW -> NDHWC, bf16 (halves im2col HBM traffic; matmuls are bf16).
    x = jnp.transpose(x_ncdhw, (0, 2, 3, 4, 1)).astype(jnp.bfloat16)

    # stem conv3d k=3 s=2 (same padding) lowered to im2col + matmul.
    patches, _ = im2col_3d(x, (3, 3, 3), stride=2, pad=1)   # (N, S, K) bf16
    N, S, K = patches.shape

    # spatial-row tile: large (up to 512) for HBM-bound pipelining.
    ts = 512 if S >= 512 else round_up(S, 8)
    St = pl.cdiv(S, ts)
    S_pad = St * ts

    # padded (lane-dense / (8,128)-aligned) problem sizes.
    C1 = params["w_stem"].shape[1]
    C2 = params["w_head"].shape[1]
    out_size = params["w_fc"].shape[1]
    Kp = round_up(K, 8)
    C1p = round_up(C1, 128)
    C2p = round_up(C2, 128)
    outp = round_up(out_size, 128)

    patches = jnp.pad(patches, ((0, 0), (0, S_pad - S), (0, Kp - K)))

    s1, b1 = fold_bn(params["bn1_gamma"], params["bn1_beta"],
                     params["bn1_mean"], params["bn1_var"])
    s2, b2 = fold_bn(params["bn2_gamma"], params["bn2_beta"],
                     params["bn2_mean"], params["bn2_var"])

    # zero-pad weights; identity-pad BN scale / zero-pad bias so padded
    # channels stay exactly zero through swish and contribute nothing.
    w1 = pad_to(params["w_stem"], (Kp, C1p)).astype(jnp.bfloat16)
    s1 = pad_to(s1, (1, C1p), 1.0)
    b1 = pad_to(b1, (1, C1p), 0.0)
    w2 = pad_to(params["w_head"], (C1p, C2p)).astype(jnp.bfloat16)
    s2 = pad_to(s2, (1, C2p), 1.0)
    b2 = pad_to(b2, (1, C2p), 0.0)
    wfc = pad_to(params["w_fc"], (C2p, outp)).astype(jnp.float32)
    bfc = pad_to(params["b_fc"], (1, outp), 0.0)

    out_padded = pl.pallas_call(
        functools.partial(eff_fused_kernel, s_actual=S, ts=ts),
        out_shape=jax.ShapeDtypeStruct((N, 1, outp), jnp.float32),
        grid=(N, St),
        in_specs=[
            pl.BlockSpec((1, ts, Kp), lambda n, s: (n, s, 0)),   # patches
            pl.BlockSpec((Kp, C1p), lambda n, s: (0, 0)),        # w_stem
            pl.BlockSpec((1, C1p), lambda n, s: (0, 0)),         # bn1 scale
            pl.BlockSpec((1, C1p), lambda n, s: (0, 0)),         # bn1 bias
            pl.BlockSpec((C1p, C2p), lambda n, s: (0, 0)),       # w_head
            pl.BlockSpec((1, C2p), lambda n, s: (0, 0)),         # bn2 scale
            pl.BlockSpec((1, C2p), lambda n, s: (0, 0)),         # bn2 bias
            pl.BlockSpec((C2p, outp), lambda n, s: (0, 0)),      # w_fc
            pl.BlockSpec((1, outp), lambda n, s: (0, 0)),        # b_fc
        ],
        out_specs=pl.BlockSpec((1, 1, outp), lambda n, s: (n, 0, 0)),
        scratch_shapes=[pltpu.VMEM((1, C2p), jnp.float32)],      # pooled sum
        compiler_params=pltpu.CompilerParams(
            dimension_semantics=("parallel", "arbitrary")),
    )(patches, w1, s1, b1, w2, s2, b2, wfc, bfc)

    return out_padded[:, 0, :out_size]


# ---------------------------------------------------------------------------
# Pure-JAX reference (same math) for a correctness sanity check
# ---------------------------------------------------------------------------

def eff_forward_ref(x_ncdhw, params):
    x = jnp.transpose(x_ncdhw, (0, 2, 3, 4, 1)).astype(jnp.bfloat16)
    patches, _ = im2col_3d(x, (3, 3, 3), stride=2, pad=1)
    patches = patches.astype(jnp.float32)
    s1, b1 = fold_bn(params["bn1_gamma"], params["bn1_beta"],
                     params["bn1_mean"], params["bn1_var"])
    y = patches @ params["w_stem"] * s1 + b1
    y = y * jax.nn.sigmoid(y)
    s2, b2 = fold_bn(params["bn2_gamma"], params["bn2_beta"],
                     params["bn2_mean"], params["bn2_var"])
    y = y @ params["w_head"] * s2 + b2
    y = y * jax.nn.sigmoid(y)
    pooled = y.mean(axis=1)
    logits = pooled @ params["w_fc"] + params["b_fc"]
    return jax.nn.sigmoid(logits)


if __name__ == "__main__":
    key = jax.random.PRNGKey(0)
    k_x, k_p = jax.random.split(key)

    # Small 3-D volume consistent with Eff(out_size=2, in_channels=1).
    N, C_in, D, H, W = 2, 1, 8, 32, 32
    out_size = 2
    c_stem, c_head = 64, 128        # width-reduced stand-ins for b7's 64/2560

    x = jax.random.normal(k_x, (N, C_in, D, H, W), jnp.float32)
    params = init_params(k_p, C_in, c_stem, c_head, out_size)

    out = eff_forward(x, params)
    out = jax.block_until_ready(out)

    ref = eff_forward_ref(x, params)
    assert out.shape == (N, out_size), out.shape
    assert bool(jnp.all(jnp.isfinite(out)))
    # bf16 matmuls + approx-reciprocal swish vs f32 reference -> loose tol.
    assert jnp.allclose(out, ref, atol=2e-2, rtol=2e-2), (out, ref)

    print("KERNEL_OK")
</pallas_src>

<mosaic_0001>
module attributes {stable_mosaic.version = 11 : i64} {
  func.func @eff_fused_kernel(%arg0: i32, %arg1: i32, %arg2: memref<1x512x32xbf16, #tpu.memory_space<vmem>>, %arg3: memref<32x128xbf16, #tpu.memory_space<vmem>>, %arg4: memref<1x128xf32, #tpu.memory_space<vmem>>, %arg5: memref<1x128xf32, #tpu.memory_space<vmem>>, %arg6: memref<128x128xbf16, #tpu.memory_space<vmem>>, %arg7: memref<1x128xf32, #tpu.memory_space<vmem>>, %arg8: memref<1x128xf32, #tpu.memory_space<vmem>>, %arg9: memref<128x128xf32, #tpu.memory_space<vmem>>, %arg10: memref<1x128xf32, #tpu.memory_space<vmem>>, %arg11: memref<1x1x128xf32, #tpu.memory_space<vmem>>, %arg12: memref<1x128xf32, #tpu.memory_space<vmem>>) attributes {dimension_semantics = [#tpu.dimension_semantics<parallel>, #tpu.dimension_semantics<arbitrary>], iteration_bounds = array<i64: 2, 2>, scalar_prefetch = 0 : i64, scratch_operands = 1 : i64, tpu.core_type = #tpu.core_type<tc>, window_params = [{transform_indices = @transform_0, window_bounds = array<i64: 1, 512, 32>}, {pipeline_mode = #tpu.pipeline_mode<synchronous>, transform_indices = @transform_1, window_bounds = array<i64: 32, 128>}, {pipeline_mode = #tpu.pipeline_mode<synchronous>, transform_indices = @transform_2, window_bounds = array<i64: 1, 128>}, {pipeline_mode = #tpu.pipeline_mode<synchronous>, transform_indices = @transform_3, window_bounds = array<i64: 1, 128>}, {pipeline_mode = #tpu.pipeline_mode<synchronous>, transform_indices = @transform_4, window_bounds = array<i64: 128, 128>}, {pipeline_mode = #tpu.pipeline_mode<synchronous>, transform_indices = @transform_5, window_bounds = array<i64: 1, 128>}, {pipeline_mode = #tpu.pipeline_mode<synchronous>, transform_indices = @transform_6, window_bounds = array<i64: 1, 128>}, {pipeline_mode = #tpu.pipeline_mode<synchronous>, transform_indices = @transform_7, window_bounds = array<i64: 128, 128>}, {pipeline_mode = #tpu.pipeline_mode<synchronous>, transform_indices = @transform_8, window_bounds = array<i64: 1, 128>}, {transform_indices = @transform_9, window_bounds = array<i64: 1, 1, 128>}]} {
    %c0_i32 = arith.constant 0 : i32
    %0 = arith.cmpi eq, %arg1, %c0_i32 : i32
    %1 = arith.extui %0 : i1 to i32
    %c0_i32_0 = arith.constant 0 : i32
    %2 = arith.cmpi ne, %1, %c0_i32_0 : i32
    scf.if %2 {
      %cst_27 = arith.constant 0.000000e+00 : f32
      %54 = vector.broadcast %cst_27 : f32 to vector<1x128xf32>
      %c0_28 = arith.constant 0 : index
      %c0_29 = arith.constant 0 : index
      %55 = vector.load %arg12[%c0_28, %c0_29] : memref<1x128xf32, #tpu.memory_space<vmem>>, vector<1x128xf32>
      tpu.vector_store %arg12[%c0_28, %c0_29], %54 {strides = array<i32>} : memref<1x128xf32, #tpu.memory_space<vmem>>, vector<1x128xf32>,
    } else {
    }
    %c0 = arith.constant 0 : index
    %c0_1 = arith.constant 0 : index
    %c0_2 = arith.constant 0 : index
    %3 = vector.load %arg2[%c0, %c0_1, %c0_2] : memref<1x512x32xbf16, #tpu.memory_space<vmem>>, vector<1x512x32xbf16>
    %4 = vector.shape_cast %3 : vector<1x512x32xbf16> to vector<512x32xbf16>
    %c0_3 = arith.constant 0 : index
    %c0_4 = arith.constant 0 : index
    %5 = vector.load %arg3[%c0_3, %c0_4] : memref<32x128xbf16, #tpu.memory_space<vmem>>, vector<32x128xbf16>
    %cst = arith.constant dense<0.000000e+00> : vector<512x128xf32>
    %6 = tpu.matmul %4, %5, %cst {dimension_numbers = #tpu.dot_dimension_numbers<[1], [0], [0], [1], [0, 0, 1, 1], [], []>} : vector<512x32xbf16>, vector<32x128xbf16>, vector<512x128xf32> -> vector<512x128xf32>
    %c0_5 = arith.constant 0 : index
    %c0_6 = arith.constant 0 : index
    %7 = vector.load %arg4[%c0_5, %c0_6] : memref<1x128xf32, #tpu.memory_space<vmem>>, vector<1x128xf32>
    %8 = vector.broadcast %7 : vector<1x128xf32> to vector<512x128xf32>
    %9 = arith.mulf %6, %8 : vector<512x128xf32>
    %c0_7 = arith.constant 0 : index
    %c0_8 = arith.constant 0 : index
    %10 = vector.load %arg5[%c0_7, %c0_8] : memref<1x128xf32, #tpu.memory_space<vmem>>, vector<1x128xf32>
    %11 = vector.broadcast %10 : vector<1x128xf32> to vector<512x128xf32>
    %12 = arith.addf %9, %11 : vector<512x128xf32>
    %cst_9 = arith.constant 0.000000e+00 : f32
    %13 = vector.broadcast %cst_9 : f32 to vector<512x128xf32>
    %14 = arith.subf %13, %12 : vector<512x128xf32>
    %15 = math.exp %14 : vector<512x128xf32>
    %cst_10 = arith.constant 1.000000e+00 : f32
    %16 = vector.broadcast %cst_10 : f32 to vector<512x128xf32>
    %17 = arith.addf %16, %15 : vector<512x128xf32>
    %18 = tpu.reciprocal %17 {approx = true} : vector<512x128xf32> -> vector<512x128xf32>
    %19 = arith.mulf %12, %18 : vector<512x128xf32>
    %20 = arith.truncf %19 : vector<512x128xf32> to vector<512x128xbf16>
    %c0_11 = arith.constant 0 : index
    %c0_12 = arith.constant 0 : index
    %21 = vector.load %arg6[%c0_11, %c0_12] : memref<128x128xbf16, #tpu.memory_space<vmem>>, vector<128x128xbf16>
    %cst_13 = arith.constant dense<0.000000e+00> : vector<512x128xf32>
    %22 = tpu.matmul %20, %21, %cst_13 {dimension_numbers = #tpu.dot_dimension_numbers<[1], [0], [0], [1], [0, 0, 1, 1], [], []>} : vector<512x128xbf16>, vector<128x128xbf16>, vector<512x128xf32> -> vector<512x128xf32>
    %c0_14 = arith.constant 0 : index
    %c0_15 = arith.constant 0 : index
    %23 = vector.load %arg7[%c0_14, %c0_15] : memref<1x128xf32, #tpu.memory_space<vmem>>, vector<1x128xf32>
    %24 = vector.broadcast %23 : vector<1x128xf32> to vector<512x128xf32>
    %25 = arith.mulf %22, %24 : vector<512x128xf32>
    %c0_16 = arith.constant 0 : index
    %c0_17 = arith.constant 0 : index
    %26 = vector.load %arg8[%c0_16, %c0_17] : memref<1x128xf32, #tpu.memory_space<vmem>>, vector<1x128xf32>
    %27 = vector.broadcast %26 : vector<1x128xf32> to vector<512x128xf32>
    %28 = arith.addf %25, %27 : vector<512x128xf32>
    %cst_18 = arith.constant 0.000000e+00 : f32
    %29 = vector.broadcast %cst_18 : f32 to vector<512x128xf32>
    %30 = arith.subf %29, %28 : vector<512x128xf32>
    %31 = math.exp %30 : vector<512x128xf32>
    %cst_19 = arith.constant 1.000000e+00 : f32
    %32 = vector.broadcast %cst_19 : f32 to vector<512x128xf32>
    %33 = arith.addf %32, %31 : vector<512x128xf32>
    %34 = tpu.reciprocal %33 {approx = true} : vector<512x128xf32> -> vector<512x128xf32>
    %35 = arith.mulf %28, %34 : vector<512x128xf32>
    %36 = tpu.iota {dimensions = array<i32: 0>} : vector<512x1xi32>
    %c512_i32 = arith.constant 512 : i32
    %37 = arith.muli %arg1, %c512_i32 : i32
    %38 = vector.broadcast %37 : i32 to vector<512x1xi32>
    %39 = arith.addi %36, %38 : vector<512x1xi32>
    %c1024_i32 = arith.constant 1024 : i32
    %40 = vector.broadcast %c1024_i32 : i32 to vector<512x1xi32>
    %41 = arith.cmpi slt, %39, %40 : vector<512x1xi32>
    %cst_20 = arith.constant 0.000000e+00 : f32
    %42 = vector.shape_cast %41 : vector<512x1xi1> to vector<512x1xi1>
    %43 = vector.broadcast %42 : vector<512x1xi1> to vector<512x128xi1>
    %44 = vector.broadcast %cst_20 : f32 to vector<512x128xf32>
    %45 = arith.select %43, %35, %44 : vector<512x128xi1>, vector<512x128xf32>
    %c0_21 = arith.constant 0 : index
    %c0_22 = arith.constant 0 : index
    %46 = vector.load %arg12[%c0_21, %c0_22] : memref<1x128xf32, #tpu.memory_space<vmem>>, vector<1x128xf32>
    %cst_23 = arith.constant dense<0.000000e+00> : vector<128xf32>
    %47 = vector.multi_reduction <add>, %45, %cst_23 [0] : vector<512x128xf32> to vector<128xf32>
    %48 = vector.shape_cast %47 : vector<128xf32> to vector<1x128xf32>
    %49 = arith.addf %46, %48 : vector<1x128xf32>
    %c0_24 = arith.constant 0 : index
    %c0_25 = arith.constant 0 : index
    %50 = vector.load %arg12[%c0_24, %c0_25] : memref<1x128xf32, #tpu.memory_space<vmem>>, vector<1x128xf32>
    tpu.vector_store %arg12[%c0_24, %c0_25], %49 {strides = array<i32>} : memref<1x128xf32, #tpu.memory_space<vmem>>, vector<1x128xf32>,
    %c1_i32 = arith.constant 1 : i32
    %51 = arith.cmpi eq, %arg1, %c1_i32 : i32
    %52 = arith.extui %51 : i1 to i32
    %c0_i32_26 = arith.constant 0 : i32
    %53 = arith.cmpi ne, %52, %c0_i32_26 : i32
    scf.if %53 {
      %c0_27 = arith.constant 0 : index
      %c0_28 = arith.constant 0 : index
      %54 = vector.load %arg12[%c0_27, %c0_28] : memref<1x128xf32, #tpu.memory_space<vmem>>, vector<1x128xf32>
      %cst_29 = arith.constant 9.765625E-4 : f32
      %55 = vector.broadcast %cst_29 : f32 to vector<1x128xf32>
      %56 = arith.mulf %54, %55 : vector<1x128xf32>
      %c0_30 = arith.constant 0 : index
      %c0_31 = arith.constant 0 : index
      %57 = vector.load %arg9[%c0_30, %c0_31] : memref<128x128xf32, #tpu.memory_space<vmem>>, vector<128x128xf32>
      %cst_32 = arith.constant dense<0.000000e+00> : vector<1x128xf32>
      %58 = tpu.matmul %56, %57, %cst_32 {dimension_numbers = #tpu.dot_dimension_numbers<[1], [0], [0], [1], [0, 0, 1, 1], [], []>} : vector<1x128xf32>, vector<128x128xf32>, vector<1x128xf32> -> vector<1x128xf32>
      %c0_33 = arith.constant 0 : index
      %c0_34 = arith.constant 0 : index
      %59 = vector.load %arg10[%c0_33, %c0_34] : memref<1x128xf32, #tpu.memory_space<vmem>>, vector<1x128xf32>
      %60 = arith.addf %58, %59 : vector<1x128xf32>
      %cst_35 = arith.constant 0.000000e+00 : f32
      %61 = vector.broadcast %cst_35 : f32 to vector<1x128xf32>
      %62 = arith.subf %61, %60 : vector<1x128xf32>
      %63 = math.exp %62 : vector<1x128xf32>
      %cst_36 = arith.constant 1.000000e+00 : f32
      %64 = vector.broadcast %cst_36 : f32 to vector<1x128xf32>
      %65 = arith.addf %64, %63 : vector<1x128xf32>
      %cst_37 = arith.constant 1.000000e+00 : f32
      %66 = vector.broadcast %cst_37 : f32 to vector<1x128xf32>
      %67 = arith.divf %66, %65 : vector<1x128xf32>
      %c0_38 = arith.constant 0 : index
      %c0_39 = arith.constant 0 : index
      %c0_40 = arith.constant 0 : index
      %68 = vector.load %arg11[%c0_38, %c0_39, %c0_40] : memref<1x1x128xf32, #tpu.memory_space<vmem>>, vector<1x1x128xf32>
      %69 = vector.shape_cast %68 : vector<1x1x128xf32> to vector<1x128xf32>
      %70 = vector.shape_cast %67 : vector<1x128xf32> to vector<1x1x128xf32>
      tpu.vector_store %arg11[%c0_38, %c0_39, %c0_40], %70 {strides = array<i32>} : memref<1x1x128xf32, #tpu.memory_space<vmem>>, vector<1x1x128xf32>,
    } else {
    }
    return
  }
  func.func @transform_0(%arg0: i32, %arg1: i32) -> (i32, i32, i32) {
    %c0_i32 = arith.constant 0 : i32
    %c0_i32_0 = arith.constant 0 : i32
    return %arg0, %arg1, %c0_i32 : i32, i32, i32
  }
  func.func @transform_1(%arg0: i32, %arg1: i32) -> (i32, i32) {
    %c0_i32 = arith.constant 0 : i32
    %c0_i32_0 = arith.constant 0 : i32
    %c0_i32_1 = arith.constant 0 : i32
    return %c0_i32, %c0_i32_0 : i32, i32
  }
  func.func @transform_2(%arg0: i32, %arg1: i32) -> (i32, i32) {
    %c0_i32 = arith.constant 0 : i32
    %c0_i32_0 = arith.constant 0 : i32
    %c0_i32_1 = arith.constant 0 : i32
    return %c0_i32, %c0_i32_0 : i32, i32
  }
  func.func @transform_3(%arg0: i32, %arg1: i32) -> (i32, i32) {
    %c0_i32 = arith.constant 0 : i32
    %c0_i32_0 = arith.constant 0 : i32
    %c0_i32_1 = arith.constant 0 : i32
    return %c0_i32, %c0_i32_0 : i32, i32
  }
  func.func @transform_4(%arg0: i32, %arg1: i32) -> (i32, i32) {
    %c0_i32 = arith.constant 0 : i32
    %c0_i32_0 = arith.constant 0 : i32
    %c0_i32_1 = arith.constant 0 : i32
    return %c0_i32, %c0_i32_0 : i32, i32
  }
  func.func @transform_5(%arg0: i32, %arg1: i32) -> (i32, i32) {
    %c0_i32 = arith.constant 0 : i32
    %c0_i32_0 = arith.constant 0 : i32
    %c0_i32_1 = arith.constant 0 : i32
    return %c0_i32, %c0_i32_0 : i32, i32
  }
  func.func @transform_6(%arg0: i32, %arg1: i32) -> (i32, i32) {
    %c0_i32 = arith.constant 0 : i32
    %c0_i32_0 = arith.constant 0 : i32
    %c0_i32_1 = arith.constant 0 : i32
    return %c0_i32, %c0_i32_0 : i32, i32
  }
  func.func @transform_7(%arg0: i32, %arg1: i32) -> (i32, i32) {
    %c0_i32 = arith.constant 0 : i32
    %c0_i32_0 = arith.constant 0 : i32
    %c0_i32_1 = arith.constant 0 : i32
    return %c0_i32, %c0_i32_0 : i32, i32
  }
  func.func @transform_8(%arg0: i32, %arg1: i32) -> (i32, i32) {
    %c0_i32 = arith.constant 0 : i32
    %c0_i32_0 = arith.constant 0 : i32
    %c0_i32_1 = arith.constant 0 : i32
    return %c0_i32, %c0_i32_0 : i32, i32
  }
  func.func @transform_9(%arg0: i32, %arg1: i32) -> (i32, i32, i32) {
    %c0_i32 = arith.constant 0 : i32
    %c0_i32_0 = arith.constant 0 : i32
    %c0_i32_1 = arith.constant 0 : i32
    return %arg0, %c0_i32, %c0_i32_0 : i32, i32, i32
  }
}

</mosaic_0001>

<bundles_post_ra>
// kernel: eff_forward.1
= control target key start
LH: loop header
LB: loop body
LE: loop exit
PB: predicated region body
PF: predicated region fallthrough
CT: control target
= control target key end

     0   :  { %14 = vsyncpa [#allocation4], 0  ;;  %s5876_s0 = inlined_call_operand.vmem [shape: bf16[2,1024,32], index: 0, kind: input, shape index: {}]   ;;  %s5877_s1 = inlined_call_operand.vmem [shape: bf16[32,128], index: 1, kind: input, shape index: {}]   ;;  %s5878_s2 = inlined_call_operand.vmem [shape: f32[1,128], index: 2, kind: input, shape index: {}]   ;;  %s5879_s3 = inlined_call_operand.vmem [shape: f32[1,128], index: 3, kind: input, shape index: {}]   ;;  %s5880_s4 = inlined_call_operand.vmem [shape: bf16[128,128], index: 4, kind: input, shape index: {}]   ;;  %s5881_s5 = inlined_call_operand.vmem [shape: f32[1,128], index: 5, kind: input, shape index: {}]   ;;  %s5882_s6 = inlined_call_operand.vmem [shape: f32[1,128], index: 6, kind: input, shape index: {}]   ;;  %s5883_s7 = inlined_call_operand.vmem [shape: f32[128,128], index: 7, kind: input, shape index: {}]   ;;  %s5884_s8 = inlined_call_operand.vmem [shape: f32[1,128], index: 8, kind: input, shape index: {}]   ;;  %s5885_s9 = inlined_call_operand.hbm [shape: f32[2,1,128], index: 9, kind: output, shape index: {}]  }
   0x1   :  { %16 = vsyncpa [#allocation4 + $0x1], 0  ;;  %s4265_s30 = smov 0   ;;  %s4267_s10 = smov 0  }
   0x2   :  { %s4269_s11 = smov 0   ;;  %s4271_s12 = smov 0  }
   0x3   :  { %s4273_s13 = smov 0   ;;  %s4275_s14 = smov 0  }
   0x4   :  { %s4277_s15 = smov 0   ;;  %s4279_s16 = smov 0  }
   0x5 LB: > { %5905 = sst [smem:[#allocation6_spill]] %s4200_s14  ;;  %s3071_s17 = sadd.s32 4294967295, %s4208_s16   ;;  %s4208_s16 = sphi %s4279_s16, %s22_s16   ;;  %s4204_s15 = sphi %s4277_s15, %s5946_s15   ;;  %s4200_s14 = sphi %s4275_s14, %s5945_s14   ;;  %s4196_s13 = sphi %s4273_s13, %s5944_s13   ;;  %s4192_s12 = sphi %s4271_s12, %s5943_s12   ;;  %s4188_s11 = sphi %s4269_s11, %s5949_s11   ;;  %s4184_s10 = sphi %s4267_s10, %s5948_s10   ;;  %s4180_s30 = sphi %s4265_s30, %s5947_s30  }
   0x6   : > { %5906 = sst [smem:[#allocation7_spill]] %s4204_s15  ;;  %s3072_s18 = sadd.s32 4294967294, %s4208_s16  }
   0x7   : > { %s31_s19 = sadd.s32 1, %s4200_s14  ;;  %s34_s20 = sadd.s32 1, %s4204_s15 }
   0x8   : > { %p32_p0 = scmp.ge.s32.totalorder %s31_s19, 2  ;;  %p247_p1 = scmp.ne.s32.totalorder %s4188_s11, %s4184_s10 }
   0x9   : > { %p248_p2 = scmp.eq.s32.totalorder %s3071_s17, 3  ;;  %p253_p4 = scmp.ne.s32.totalorder %s4184_s10, %s4180_s30 }
   0xa   : > { %s5951_s19 = smov (%p32_p0, %s31_s19), 0  ;;  %s5953_s20 = smov (!%p32_p0, %s34_s20), %s4204_s15 }
   0xb   : > { %5907 = sst [smem:[#allocation8_spill]] %s5951_s19  ;;  %p4314_p3 = por %p248_p2, %p247_p1 }
   0xc   : > { %p36_p5 = scmp.ge.s32.totalorder %s5953_s20, 2  ;;  %p254_p6 = scmp.eq.s32.totalorder %s3072_s18, 3 }
   0xd   : > { %p3075_p7 = scmp.ge.s32.totalorder %s4208_s16, 1  ;;  %p309_p8 = scmp.lt.s32.totalorder %s4208_s16, 5 }
   0xe   : > { %s5955_s20 = smov (%p36_p5, %s5953_s20), 0  ;;  %p4324_p9 = por %p254_p6, %p253_p4 }
   0xf   : > { %5909 = sst [smem:[#allocation9_spill]] %s5955_s20  ;;  %p310_p10 = pnand %p3075_p7, %p309_p8 }
  0x10   : > { %s234_s23 = ssub.s32 %s4204_s15, %s5955_s20  ;;  %s237_s24 = sadd.s32 1, %s4188_s11 }
  0x11   : > { %p235_p11 = scmp.eq.s32.totalorder %s234_s23, 0  ;;  %313 = sbr.rel (%p310_p10) target bundleno = 1020 (0x3fc), region = 56 }
  0x13   : > { %s4332_s25 = scalar_select %p235_p11, %s4188_s11, %s237_s24  }
  0x18   : > { %s346_s26 = sand.u32 1, %s4184_s10   ;;  %s3076_s27 = sshll.u32 %s4192_s12, 6 }
  0x19   : > { %p349_p12 = scmp.lt.s32.totalorder %s4196_s13, 1  ;;  %p351_p13 = scmp.lt.s32.totalorder %s3076_s27, 127 }
  0x1a   : > { %s4345_s24 = scalar_lea.vmem [#allocation3], %s346_s26  ;;  %p3079_p0 = scmp.ne.s32.totalorder %s4192_s12, 0 }
  0x1b   : > { %s350_s28 = scalar_select %p349_p12, %s4196_s13, 1 }
  0x1c   : > { %s5957_s27 = smov (!%p351_p13, %s3076_s27), 127  ;;  %362 = sbr.rel (%p3079_p0) target bundleno = 35 (0x23), region = 60 }
  0x1d   : > { %s3077_s29 = sshll.u32 %s350_s28, 7  ;;  %v4210_v0 = vmov (!%p3079_p0), 0.0  }
  0x1e   : > { %s354_s17 = sadd.s32 %s3077_s29, %s5957_s27  ;;  %363 = vst [vmem:[#allocation2] sm:$0x1] (!%p3079_p0), %v4210_v0 }
  0x1f   : > { %s3078_s18 = sshll.u32 %s354_s17, 2 }
  0x20   : > { %s4341_s23 = scalar_lea.vmem %s5876_s0, %s3078_s18 }
  0x23 PF: > { %v3552_v1 = vld [vmem:[%s5877_s1] sm:$0xff]   ;;  %v3553_v2 = vld [vmem:[%s5877_s1 + $0x8] sm:$0xff]   ;;  %vm604_vm0 = vcmask 261120   ;;  %v3556_v5 = vld [vmem:[%s4341_s23 + $0x10] sm:$0xff]   ;;  %s3158_s17 = sshll.u32 %s4192_s12, 9  ;;  %p3159_p1 = scmp.ne.s32.totalorder %s4192_s12, 1 }
  0x24   : > { %3254 = vmatprep.subr.bf16.mxu0 %v3552_v1  ;;  %v3554_v3 = vld [vmem:[%s4341_s23] sm:$0xff]   ;;  %v3555_v4 = vld [vmem:[%s4341_s23 + $0x8] sm:$0xff]   ;;  %v3557_v6 = vld [vmem:[%s4341_s23 + $0x18] sm:$0xff]  }
  0x25   : > { %3255 = vmatpush3.bf16.msra.mxu0 %v3552_v1  ;;  %3258 = vmatprep.mubr.msk.bf16.mxu0 %vm604_vm0, %v3554_v3  ;;  %v3558_v7 = vld [vmem:[%s4341_s23 + $0x20] sm:$0xff]   ;;  %v3559_v8 = vld [vmem:[%s4341_s23 + $0x28] sm:$0xff]   ;;  %v3560_v9 = vld [vmem:[%s4341_s23 + $0x30] sm:$0xff]  }
  0x26   : > { %3256 = vmatprep.subr.bf16.mxu0 %v3553_v2  ;;  %v3561_v10 = vld [vmem:[%s4341_s23 + $0x38] sm:$0xff]   ;;  %v3562_v11 = vld [vmem:[%s4341_s23 + $0x40] sm:$0xff]   ;;  %v3587_v13 = vld [vmem:[%s5880_s4 + $0x8] sm:$0xff]  }
  0x27   : > { %v3586_v12 = vld [vmem:[%s5880_s4] sm:$0xff]   ;;  %v3563_v14 = vld [vmem:[%s4341_s23 + $0x48] sm:$0xff]   ;;  %v3588_v15 = vld [vmem:[%s5880_s4 + $0x10] sm:$0xff]  }
  0x28   : > { %3461 = vmatprep.subr.bf16.mxu1 %v3586_v12  ;;  %v3564_v16 = vld [vmem:[%s4341_s23 + $0x50] sm:$0xff]   ;;  %v3589_v17 = vld [vmem:[%s5880_s4 + $0x18] sm:$0xff]   ;;  %v3590_v19 = vld [vmem:[%s5880_s4 + $0x20] sm:$0xff]  }
  0x29   : > { %3257 = vmatpush3.bf16.msra.mxu0 %v3553_v2  ;;  %3469 = vmatpush3.bf16.msra.mxu1 %v3586_v12  ;;  %v3565_v18 = vld [vmem:[%s4341_s23 + $0x58] sm:$0xff]   ;;  %v3566_v20 = vld [vmem:[%s4341_s23 + $0x60] sm:$0xff]   ;;  %v3591_v21 = vld [vmem:[%s5880_s4 + $0x28] sm:$0xff]  }
  0x2a   : > { %3322 = vmatprep.subr.bf16.mxu0 %v3586_v12  ;;  %3462 = vmatprep.subr.bf16.mxu1 %v3587_v13  ;;  %v3567_v22 = vld [vmem:[%s4341_s23 + $0x68] sm:$0xff]   ;;  %v3568_v23 = vld [vmem:[%s4341_s23 + $0x70] sm:$0xff]   ;;  %v3569_v24 = vld [vmem:[%s4341_s23 + $0x78] sm:$0xff]  }
  0x2b   : > { %v3570_v25 = vld [vmem:[%s4341_s23 + $0x80] sm:$0xff]   ;;  %v3571_v26 = vld [vmem:[%s4341_s23 + $0x88] sm:$0xff]   ;;  %v3572_v27 = vld [vmem:[%s4341_s23 + $0x90] sm:$0xff]  }
  0x2c   : > { %3259 = vmatmul.mubr.msk.bf16.vlgmr.msra.gmra.mrb[0].mxu0 %vm604_vm0, %v3555_v4  ;;  %v3573_v28 = vld [vmem:[%s4341_s23 + $0x98] sm:$0xff]   ;;  %v3574_v29 = vld [vmem:[%s4341_s23 + $0xa0] sm:$0xff]   ;;  %v3575_v30 = vld [vmem:[%s4341_s23 + $0xa8] sm:$0xff]  }
  0x2d   : > { %3262 = vmatprep.mubr.msk.bf16.mxu0 %vm604_vm0, %v3556_v5  ;;  %3323 = vmatpush3.bf16.msra.mxu0 %v3586_v12  ;;  %v3576_v31 = vld [vmem:[%s4341_s23 + $0xb0] sm:$0xff]   ;;  %v3577_v32 = vld [vmem:[%s4341_s23 + $0xb8] sm:$0xff]   ;;  %v3578_v33 = vld [vmem:[%s4341_s23 + $0xc0] sm:$0xff]  }
  0x2e   : > { %3324 = vmatprep.subr.bf16.mxu0 %v3587_v13  ;;  %3470 = vmatpush3.bf16.msra.mxu1 %v3587_v13  ;;  %v3579_v34 = vld [vmem:[%s4341_s23 + $0xc8] sm:$0xff]   ;;  %v3580_v35 = vld [vmem:[%s4341_s23 + $0xd0] sm:$0xff]   ;;  %v3581_v36 = vld [vmem:[%s4341_s23 + $0xd8] sm:$0xff]  }
  0x2f   : > { %3463 = vmatprep.subr.bf16.mxu1 %v3588_v15  ;;  %v3582_v37 = vld [vmem:[%s4341_s23 + $0xe0] sm:$0xff]   ;;  %v3583_v38 = vld [vmem:[%s4341_s23 + $0xe8] sm:$0xff]   ;;  %v3584_v39 = vld [vmem:[%s4341_s23 + $0xf0] sm:$0xff]  }
  0x30   : > { %v3592_v40 = vld [vmem:[%s5880_s4 + $0x30] sm:$0xff]   ;;  %v3585_v41 = vld [vmem:[%s4341_s23 + $0xf8] sm:$0xff]   ;;  %v4445_v43 = vld [vmem:[%s5878_s2] ss:$0 sm:$0xff] }
  0x31   : > { %3325 = vmatpush3.bf16.msra.mxu0 %v3587_v13  ;;  %v3593_v42 = vld [vmem:[%s5880_s4 + $0x38] sm:$0xff]   ;;  %v4450_v45 = vld [vmem:[%s5879_s3] ss:$0 sm:$0xff] }
  0x32   : > { %3326 = vmatprep.subr.bf16.mxu0 %v3588_v15  ;;  %3471 = vmatpush3.bf16.msra.mxu1 %v3588_v15 }
  0x33   : > { %3464 = vmatprep.subr.bf16.mxu1 %v3589_v17 }
  0x34   : > { %3263 = vmatmul.mubr.msk.bf16.gmra.mrb[4].mxu0 %vm604_vm0, %v3557_v6 }
  0x35   : > { %3266 = vmatprep.mubr.msk.bf16.mxu0 %vm604_vm0, %v3558_v7  ;;  %3327 = vmatpush3.bf16.msra.mxu0 %v3588_v15 }
  0x36   : > { %3328 = vmatprep.subr.bf16.mxu0 %v3589_v17  ;;  %3472 = vmatpush3.bf16.msra.mxu1 %v3589_v17 }
  0x37   : > { %3465 = vmatprep.subr.bf16.mxu1 %v3590_v19 }
  0x39   : > { %3329 = vmatpush3.bf16.msra.mxu0 %v3589_v17 }
  0x3a   : > { %3330 = vmatprep.subr.bf16.mxu0 %v3590_v19  ;;  %3473 = vmatpush3.bf16.msra.mxu1 %v3590_v19 }
  0x3b   : > { %3466 = vmatprep.subr.bf16.mxu1 %v3591_v21 }
  0x3c   : > { %3267 = vmatmul.mubr.msk.bf16.gmra.mrb[8].mxu0 %vm604_vm0, %v3559_v8 }
  0x3d   : > { %3270 = vmatprep.mubr.msk.bf16.mxu0 %vm604_vm0, %v3560_v9  ;;  %3331 = vmatpush3.bf16.msra.mxu0 %v3590_v19 }
  0x3e   : > { %3332 = vmatprep.subr.bf16.mxu0 %v3591_v21  ;;  %3474 = vmatpush3.bf16.msra.mxu1 %v3591_v21 }
  0x3f   : > { %3467 = vmatprep.subr.bf16.mxu1 %v3592_v40 }
  0x41   : > { %3333 = vmatpush3.bf16.msra.mxu0 %v3591_v21 }
  0x42   : > { %3334 = vmatprep.subr.bf16.mxu0 %v3592_v40  ;;  %3475 = vmatpush3.bf16.msra.mxu1 %v3592_v40 }
  0x43   : > { %3468 = vmatprep.subr.bf16.mxu1 %v3593_v42 }
  0x44   : > { %3271 = vmatmul.mubr.msk.bf16.gmra.mrb[12].mxu0 %vm604_vm0, %v3561_v10 }
  0x45   : > { %3274 = vmatprep.mubr.msk.bf16.mxu0 %vm604_vm0, %v3562_v11  ;;  %3335 = vmatpush3.bf16.msra.mxu0 %v3592_v40 }
  0x46   : > { %3336 = vmatprep.subr.bf16.mxu0 %v3593_v42  ;;  %3476 = vmatpush3.bf16.msra.mxu1 %v3593_v42 }
  0x49   : > { %3337 = vmatpush3.bf16.msra.mxu0 %v3593_v42 }
  0x4c   : > { %3275 = vmatmul.mubr.msk.bf16.gmra.mrb[16].mxu0 %vm604_vm0, %v3563_v14 }
  0x4d   : > { %3278 = vmatprep.mubr.msk.bf16.mxu0 %vm604_vm0, %v3564_v16 }
  0x54   : > { %3279 = vmatmul.mubr.msk.bf16.gmra.mrb[20].mxu0 %vm604_vm0, %v3565_v18 }
  0x55   : > { %3282 = vmatprep.mubr.msk.bf16.mxu0 %vm604_vm0, %v3566_v20 }
  0x5c   : > { %3283 = vmatmul.mubr.msk.bf16.gmra.mrb[24].mxu0 %vm604_vm0, %v3567_v22 }
  0x5d   : > { %3286 = vmatprep.mubr.msk.bf16.mxu0 %vm604_vm0, %v3568_v23 }
  0x64   : > { %3287 = vmatmul.mubr.msk.bf16.gmra.mrb[28].mxu0 %vm604_vm0, %v3569_v24 }
  0x65   : > { %3290 = vmatprep.mubr.msk.bf16.mxu0 %vm604_vm0, %v3570_v25 }
  0x6c   : > { %3291 = vmatmul.mubr.msk.bf16.gmra.mrb[32].mxu0 %vm604_vm0, %v3571_v26 }
  0x6d   : > { %3294 = vmatprep.mubr.msk.bf16.mxu0 %vm604_vm0, %v3572_v27 }
  0x74   : > { %3295 = vmatmul.mubr.msk.bf16.gmra.mrb[36].mxu0 %vm604_vm0, %v3573_v28 }
  0x75   : > { %3298 = vmatprep.mubr.msk.bf16.mxu0 %vm604_vm0, %v3574_v29 }
  0x7c   : > { %3299 = vmatmul.mubr.msk.bf16.gmra.mrb[40].mxu0 %vm604_vm0, %v3575_v30 }
  0x7d   : > { %3302 = vmatprep.mubr.msk.bf16.mxu0 %vm604_vm0, %v3576_v31 }
  0x84   : > { %3303 = vmatmul.mubr.msk.bf16.gmra.mrb[44].mxu0 %vm604_vm0, %v3577_v32 }
  0x85   : > { %3306 = vmatprep.mubr.msk.bf16.mxu0 %vm604_vm0, %v3578_v33 }
  0x8c   : > { %3307 = vmatmul.mubr.msk.bf16.gmra.mrb[48].mxu0 %vm604_vm0, %v3579_v34 }
  0x8d   : > { %3310 = vmatprep.mubr.msk.bf16.mxu0 %vm604_vm0, %v3580_v35 }
  0x94   : > { %3311 = vmatmul.mubr.msk.bf16.gmra.mrb[52].mxu0 %vm604_vm0, %v3581_v36 }
  0x95   : > { %3314 = vmatprep.mubr.msk.bf16.mxu0 %vm604_vm0, %v3582_v37 }
  0x9c   : > { %3315 = vmatmul.mubr.msk.bf16.gmra.mrb[56].mxu0 %vm604_vm0, %v3583_v38 }
  0x9d   : > { %3318 = vmatprep.mubr.msk.bf16.mxu0 %vm604_vm0, %v3584_v39 }
  0xa4   : > { %3319 = vmatmul.mubr.msk.bf16.gmra.mrb[60].mxu0 %vm604_vm0, %v3585_v41 }
  0xff   : > { %v3260_v44 = vpop.f32.mrb[0].mxu0 }
 0x100   : > { %v999_v46 = vmul.f32 %v3260_v44, %v4445_v43  ;;  %v735_v47 = vpop.f32.mrb[1].mxu0 }
 0x101   : > { %v997_v48 = vmul.f32 %v4445_v43, %v735_v47  ;;  %v3261_v49 = vpop.f32.mrb[2].mxu0 }
 0x102   : > { %v4455_v50 = vadd.f32 %v4450_v45, %v999_v46  ;;  %v1000_v51 = vmul.f32 %v3261_v49, %v4445_v43  ;;  %v738_v52 = vpop.f32.mrb[3].mxu0 }
 0x103   : > { %v4459_v53 = vadd.f32 %v4450_v45, %v997_v48  ;;  %v998_v54 = vmul.f32 %v4445_v43, %v738_v52 }
 0x104   : > { %v1134_v55 = vsub.f32 0.0, %v4455_v50  ;;  %v4464_v56 = vadd.f32 %v4450_v45, %v1000_v51 }
 0x105   : > { %v1132_v57 = vsub.f32 0.0, %v4459_v53  ;;  %v4468_v58 = vadd.f32 %v4450_v45, %v998_v54 }
 0x106   : > { %v1200_v59 = vmul.f32 1.442695, %v1134_v55  ;;  %v1135_v60 = vsub.f32 0.0, %v4464_v56 }
 0x107   : > { %v1196_v61 = vmul.f32 1.442695, %v1132_v57  ;;  %v1133_v62 = vsub.f32 0.0, %v4468_v58  ;;  %v3264_v63 = vpop.f32.mrb[4].mxu0 }
 0x108   : > { %3594 = vpow2.f32 %v1200_v59  ;;  %v1202_v0 = vmul.f32 1.442695, %v1135_v60  ;;  %v1003_v1 = vmul.f32 %v3264_v63, %v4445_v43  ;;  %v751_v2 = vpop.f32.mrb[5].mxu0 }
 0x109   : > { %3596 = vpow2.f32 %v1196_v61  ;;  %v1198_v3 = vmul.f32 1.442695, %v1133_v62  ;;  %v1001_v4 = vmul.f32 %v4445_v43, %v751_v2  ;;  %v3265_v5 = vpop.f32.mrb[6].mxu0 }
 0x10a   : > { %3598 = vpow2.f32 %v1202_v0  ;;  %v4475_v6 = vadd.f32 %v4450_v45, %v1003_v1  ;;  %v1004_v7 = vmul.f32 %v3265_v5, %v4445_v43  ;;  %v754_v8 = vpop.f32.mrb[7].mxu0 }
 0x10b   : > { %3600 = vpow2.f32 %v1198_v3  ;;  %v4479_v9 = vadd.f32 %v4450_v45, %v1001_v4  ;;  %v1002_v10 = vmul.f32 %v4445_v43, %v754_v8 }
 0x10c   : > { %v1138_v11 = vsub.f32 0.0, %v4475_v6  ;;  %v4484_v12 = vadd.f32 %v4450_v45, %v1004_v7 }
 0x10d   : > { %v1136_v13 = vsub.f32 0.0, %v4479_v9  ;;  %v4488_v14 = vadd.f32 %v4450_v45, %v1002_v10 }
 0x10e   : > { %v1208_v15 = vmul.f32 1.442695, %v1138_v11  ;;  %v1139_v16 = vsub.f32 0.0, %v4484_v12 }
 0x10f   : > { %v1204_v17 = vmul.f32 1.442695, %v1136_v13  ;;  %v1137_v18 = vsub.f32 0.0, %v4488_v14  ;;  %v3268_v19 = vpop.f32.mrb[8].mxu0 }
 0x110   : > { %3602 = vpow2.f32 %v1208_v15  ;;  %v1210_v20 = vmul.f32 1.442695, %v1139_v16  ;;  %v1007_v21 = vmul.f32 %v3268_v19, %v4445_v43  ;;  %v767_v22 = vpop.f32.mrb[9].mxu0 }
 0x111   : > { %3604 = vpow2.f32 %v1204_v17  ;;  %v1206_v23 = vmul.f32 1.442695, %v1137_v18  ;;  %v1005_v24 = vmul.f32 %v4445_v43, %v767_v22  ;;  %v3269_v25 = vpop.f32.mrb[10].mxu0 }
 0x112   : > { %v3595_v26 = vpop.eup %3594  ;;  %3606 = vpow2.f32 %v1210_v20  ;;  %v4495_v27 = vadd.f32 %v4450_v45, %v1007_v21  ;;  %v1008_v28 = vmul.f32 %v3269_v25, %v4445_v43  ;;  %v770_v29 = vpop.f32.mrb[11].mxu0 }
 0x113   : > { %v3597_v30 = vpop.eup %3596  ;;  %v1326_v31 = vadd.f32 1.0, %v3595_v26  ;;  %3608 = vpow2.f32 %v1206_v23  ;;  %v4499_v32 = vadd.f32 %v4450_v45, %v1005_v24  ;;  %v1006_v33 = vmul.f32 %v4445_v43, %v770_v29 }
 0x114   : > { %v3599_v34 = vpop.eup %3598  ;;  %v1324_v35 = vadd.f32 1.0, %v3597_v30  ;;  %v1142_v36 = vsub.f32 0.0, %v4495_v27  ;;  %v4504_v37 = vadd.f32 %v4450_v45, %v1008_v28 }
 0x115   : > { %v3601_v38 = vpop.eup %3600  ;;  %3610 = vrcp.f32 %v1326_v31  ;;  %v1327_v39 = vadd.f32 1.0, %v3599_v34  ;;  %v1140_v40 = vsub.f32 0.0, %v4499_v32  ;;  %v4508_v41 = vadd.f32 %v4450_v45, %v1006_v33 }
 0x116   : > { %3612 = vrcp.f32 %v1324_v35  ;;  %v1325_v42 = vadd.f32 1.0, %v3601_v38  ;;  %v1216_v44 = vmul.f32 1.442695, %v1142_v36  ;;  %v1143_v46 = vsub.f32 0.0, %v4504_v37 }
 0x117   : > { %3614 = vrcp.f32 %v1327_v39  ;;  %v1212_v47 = vmul.f32 1.442695, %v1140_v40  ;;  %v1141_v48 = vsub.f32 0.0, %v4508_v41  ;;  %v3272_v49 = vpop.f32.mrb[12].mxu0 }
 0x118   : > { %3616 = vrcp.f32 %v1325_v42  ;;  %v1218_v51 = vmul.f32 1.442695, %v1143_v46  ;;  %v1011_v52 = vmul.f32 %v3272_v49, %v4445_v43  ;;  %v783_v54 = vpop.f32.mrb[13].mxu0 }
 0x119   : > { %3618 = vpow2.f32 %v1216_v44  ;;  %v1214_v55 = vmul.f32 1.442695, %v1141_v48  ;;  %v1009_v57 = vmul.f32 %v4445_v43, %v783_v54  ;;  %v3273_v59 = vpop.f32.mrb[14].mxu0 }
 0x11a   : > { %v3603_v60 = vpop.eup %3602  ;;  %3620 = vpow2.f32 %v1212_v47  ;;  %v4515_v61 = vadd.f32 %v4450_v45, %v1011_v52  ;;  %v1012_v62 = vmul.f32 %v3273_v59, %v4445_v43  ;;  %v786_v63 = vpop.f32.mrb[15].mxu0 }
 0x11b   : > { %v3605_v0 = vpop.eup %3604  ;;  %v1330_v1 = vadd.f32 1.0, %v3603_v60  ;;  %3622 = vpow2.f32 %v1218_v51  ;;  %v4519_v2 = vadd.f32 %v4450_v45, %v1009_v57  ;;  %v1010_v3 = vmul.f32 %v4445_v43, %v786_v63 }
 0x11c   : > { %v3607_v4 = vpop.eup %3606  ;;  %v1328_v5 = vadd.f32 1.0, %v3605_v0  ;;  %3624 = vpow2.f32 %v1214_v55  ;;  %v1146_v7 = vsub.f32 0.0, %v4515_v61  ;;  %v4524_v8 = vadd.f32 %v4450_v45, %v1012_v62 }
 0x11d   : > { %v3609_v10 = vpop.eup %3608  ;;  %3626 = vrcp.f32 %v1330_v1  ;;  %v1331_v11 = vadd.f32 1.0, %v3607_v4  ;;  %v1144_v13 = vsub.f32 0.0, %v4519_v2  ;;  %v4528_v15 = vadd.f32 %v4450_v45, %v1010_v3 }
 0x11e   : > { %3628 = vrcp.f32 %v1328_v5  ;;  %v1329_v16 = vadd.f32 1.0, %v3609_v10  ;;  %v1224_v17 = vmul.f32 1.442695, %v1146_v7  ;;  %v1147_v18 = vsub.f32 0.0, %v4524_v8 }
 0x11f   : > { %v3611_v19 = vpop.eup %3610  ;;  %3630 = vrcp.f32 %v1331_v11  ;;  %v1220_v20 = vmul.f32 1.442695, %v1144_v13  ;;  %v1145_v21 = vsub.f32 0.0, %v4528_v15  ;;  %v3276_v22 = vpop.f32.mrb[16].mxu0 }
 0x120   : > { %v3613_v23 = vpop.eup %3612  ;;  %v1454_v24 = vmul.f32 %v3611_v19, %v4455_v50  ;;  %3632 = vrcp.f32 %v1329_v16  ;;  %v1226_v25 = vmul.f32 1.442695, %v1147_v18  ;;  %v1015_v26 = vmul.f32 %v3276_v22, %v4445_v43  ;;  %v799_v28 = vpop.f32.mrb[17].mxu0 }
 0x121   : > { %v3615_v29 = vpop.eup %3614  ;;  %v1452_v30 = vmul.f32 %v3613_v23, %v4459_v53  ;;  %3634 = vpow2.f32 %v1224_v17  ;;  %v1222_v31 = vmul.f32 1.442695, %v1145_v21  ;;  %v1013_v33 = vmul.f32 %v4445_v43, %v799_v28  ;;  %v3277_v34 = vpop.f32.mrb[18].mxu0 }
 0x122   : > { %v3617_v35 = vpop.eup %3616  ;;  %v1455_v36 = vmul.f32 %v3615_v29, %v4464_v56  ;;  %3636 = vpow2.f32 %v1220_v20  ;;  %v4538_v38 = vadd.f32 %v4450_v45, %v1015_v26  ;;  %v1016_v50 = vmul.f32 %v3277_v34, %v4445_v43  ;;  %v802_v39 = vpop.f32.mrb[19].mxu0 }
 0x123   : > { %v3619_v40 = vpop.eup %3618  ;;  %v1453_v42 = vmul.f32 %v3617_v35, %v4468_v58  ;;  %3638 = vpow2.f32 %v1226_v25  ;;  %v4543_v53 = vadd.f32 %v4450_v45, %v1013_v33  ;;  %v1014_v44 = vmul.f32 %v4445_v43, %v802_v39 }
 0x124   : > { %v3621_v46 = vpop.eup %3620  ;;  %v1517_v47 = vpack.c.bf16 %v1455_v36, %v1454_v24  ;;  %v1334_v48 = vadd.f32 1.0, %v3619_v40  ;;  %3640 = vpow2.f32 %v1222_v31  ;;  %v1150_v56 = vsub.f32 0.0, %v4538_v38 }
 0x125   : > { %v3623_v49 = vpop.eup %3622  ;;  %v1332_v51 = vadd.f32 1.0, %v3621_v46  ;;  %v1148_v52 = vsub.f32 0.0, %v4543_v53  ;;  %v4549_v54 = vadd.f32 %v4450_v45, %v1016_v50  ;;  %v4552_v58 = vadd.f32 %v4450_v45, %v1014_v44 }
 0x126   : > { %v3625_v55 = vpop.eup %3624  ;;  %3642 = vrcp.f32 %v1334_v48  ;;  %v1335_v57 = vadd.f32 1.0, %v3623_v49  ;;  %v1232_v59 = vmul.f32 1.442695, %v1150_v56  ;;  %v1516_v60 = vpack.c.bf16 %v1453_v42, %v1452_v30 }
 0x127   : > { %v3627_v62 = vpop.eup %3626  ;;  %3644 = vrcp.f32 %v1332_v51  ;;  %v1333_v63 = vadd.f32 1.0, %v3625_v55  ;;  %v1228_v0 = vmul.f32 1.442695, %v1148_v52  ;;  %v1151_v1 = vsub.f32 0.0, %v4549_v54  ;;  %v3280_v3 = vpop.f32.mrb[20].mxu0 }
 0x128   : > { %v3629_v4 = vpop.eup %3628  ;;  %v4556_v5 = vmul.f32 %v3627_v62, %v4475_v6  ;;  %3646 = vrcp.f32 %v1335_v57  ;;  %v1149_v7 = vsub.f32 0.0, %v4552_v58  ;;  %v1019_v10 = vmul.f32 %v3280_v3, %v4445_v43  ;;  %3338 = vmatprep.mubr.bf16.mxu0 %v1516_v60  ;;  %v815_v11 = vpop.f32.mrb[21].mxu0 }
 0x129   : > { %v3631_v13 = vpop.eup %3630  ;;  %3648 = vrcp.f32 %v1333_v63  ;;  %v1234_v16 = vmul.f32 1.442695, %v1151_v1  ;;  %v1017_v17 = vmul.f32 %v4445_v43, %v815_v11  ;;  %3339 = vmatmul.mubr.bf16.vlgmr.msra.gmra.mrb[64].mxu0 %v1517_v47  ;;  %v3281_v18 = vpop.f32.mrb[22].mxu0  ;;  %v1456_v19 = vmul.f32 %v3629_v4, %v4479_v9 }
 0x12a   : > { %v3633_v20 = vpop.eup %3632  ;;  %v4563_v6 = vmul.f32 %v3631_v13, %v4484_v12  ;;  %3650 = vpow2.f32 %v1232_v59  ;;  %v1230_v21 = vmul.f32 1.442695, %v1149_v7  ;;  %v4566_v22 = vadd.f32 %v4450_v45, %v1019_v10  ;;  %v818_v23 = vpop.f32.mrb[23].mxu0 }
 0x12b   : > { %v3635_v24 = vpop.eup %3634  ;;  %3652 = vpow2.f32 %v1228_v0  ;;  %v4569_v25 = vadd.f32 %v4450_v45, %v1017_v17  ;;  %v1020_v26 = vmul.f32 %v3281_v18, %v4445_v43  ;;  %v1018_v28 = vmul.f32 %v4445_v43, %v818_v23 }
 0x12c   : > { %v3637_v9 = vpop.eup %3636  ;;  %v1338_v29 = vadd.f32 1.0, %v3635_v24  ;;  %3654 = vpow2.f32 %v1234_v16  ;;  %v1154_v12 = vsub.f32 0.0, %v4566_v22  ;;  %v1457_v30 = vmul.f32 %v3633_v20, %v4488_v14 }
 0x12d   : > { %v3639_v31 = vpop.eup %3638  ;;  %v1336_v33 = vadd.f32 1.0, %v3637_v9  ;;  %3656 = vpow2.f32 %v1230_v21  ;;  %v1152_v34 = vsub.f32 0.0, %v4569_v25  ;;  %v4577_v35 = vadd.f32 %v4450_v45, %v1020_v26 }
 0x12e   : > { %v3641_v36 = vpop.eup %3640  ;;  %3658 = vrcp.f32 %v1338_v29  ;;  %v1339_v50 = vadd.f32 1.0, %v3639_v31  ;;  %v1240_v39 = vmul.f32 1.442695, %v1154_v12  ;;  %v4580_v40 = vadd.f32 %v4450_v45, %v1018_v28 }
 0x12f   : > { %3660 = vrcp.f32 %v1336_v33  ;;  %v1337_v42 = vadd.f32 1.0, %v3641_v36  ;;  %v1236_v44 = vmul.f32 1.442695, %v1152_v34  ;;  %v1155_v14 = vsub.f32 0.0, %v4577_v35  ;;  %v3284_v46 = vpop.f32.mrb[24].mxu0 }
 0x130   : > { %v3643_v47 = vpop.eup %3642  ;;  %3662 = vrcp.f32 %v1339_v50  ;;  %v1153_v48 = vsub.f32 0.0, %v4580_v40  ;;  %v1023_v56 = vmul.f32 %v3284_v46, %v4445_v43  ;;  %v1518_v49 = vpack.c.bf16 %v1457_v30, %v1456_v19  ;;  %v831_v51 = vpop.f32.mrb[25].mxu0 }
 0x131   : > { %v3645_v52 = vpop.eup %3644  ;;  %v4586_v55 = vmul.f32 %v3643_v47, %v4495_v27  ;;  %3664 = vrcp.f32 %v1337_v42  ;;  %v1242_v57 = vmul.f32 1.442695, %v1155_v14  ;;  %v1021_v59 = vmul.f32 %v4445_v43, %v831_v51  ;;  %v3285_v60 = vpop.f32.mrb[26].mxu0 }
 0x132   : > { %v3647_v62 = vpop.eup %3646  ;;  %v1460_v63 = vmul.f32 %v3645_v52, %v4499_v32  ;;  %3666 = vpow2.f32 %v1240_v39  ;;  %v1238_v0 = vmul.f32 1.442695, %v1153_v48  ;;  %v4591_v1 = vadd.f32 %v4450_v45, %v1023_v56  ;;  %3342 = vmatprep.mubr.bf16.mxu1 %v1518_v49  ;;  %v834_v3 = vpop.f32.mrb[27].mxu0 }
 0x133   : > { %v3649_v4 = vpop.eup %3648  ;;  %v4594_v7 = vmul.f32 %v3647_v62, %v4504_v37  ;;  %3668 = vpow2.f32 %v1236_v44  ;;  %v4597_v27 = vadd.f32 %v4450_v45, %v1021_v59  ;;  %v1519_v10 = vpack.c.bf16 %v4563_v6, %v4556_v5 }
 0x134   : > { %v3651_v11 = vpop.eup %3650  ;;  %v1461_v32 = vmul.f32 %v3649_v4, %v4508_v41  ;;  %3670 = vpow2.f32 %v1242_v57  ;;  %v1158_v13 = vsub.f32 0.0, %v4591_v1  ;;  %v1024_v16 = vmul.f32 %v3285_v60, %v4445_v43 }
 0x135   : > { %v3653_v17 = vpop.eup %3652  ;;  %v1342_v18 = vadd.f32 1.0, %v3651_v11  ;;  %3672 = vpow2.f32 %v1238_v0  ;;  %v1156_v37 = vsub.f32 0.0, %v4597_v27  ;;  %3343 = vmatmul.mubr.bf16.vlgmr.msra.gmra.mrb[0].mxu1 %v1519_v10  ;;  %v1022_v19 = vmul.f32 %v4445_v43, %v834_v3 }
 0x136   : > { %v3655_v20 = vpop.eup %3654  ;;  %v1340_v21 = vadd.f32 1.0, %v3653_v17  ;;  %v1248_v23 = vmul.f32 1.442695, %v1158_v13  ;;  %v4607_v5 = vadd.f32 %v4450_v45, %v1024_v16  ;;  %v1520_v41 = vpack.c.bf16 %v1461_v32, %v1460_v63 }
 0x137   : > { %v3657_v6 = vpop.eup %3656  ;;  %3674 = vrcp.f32 %v1342_v18  ;;  %v1343_v24 = vadd.f32 1.0, %v3655_v20  ;;  %v1244_v26 = vmul.f32 1.442695, %v1156_v37  ;;  %v4610_v28 = vadd.f32 %v4450_v45, %v1022_v19  ;;  %v3288_v9 = vpop.f32.mrb[28].mxu0 }
 0x138   : > { %v3659_v29 = vpop.eup %3658  ;;  %3676 = vrcp.f32 %v1340_v21  ;;  %v1341_v12 = vadd.f32 1.0, %v3657_v6  ;;  %v1159_v30 = vsub.f32 0.0, %v4607_v5  ;;  %v1027_v31 = vmul.f32 %v3288_v9, %v4445_v43  ;;  %3346 = vmatprep.mubr.bf16.mxu1 %v1520_v41  ;;  %v847_v33 = vpop.f32.mrb[29].mxu0 }
 0x139   : > { %v3661_v34 = vpop.eup %3660  ;;  %v4615_v36 = vmul.f32 %v3659_v29, %v4515_v61  ;;  %3678 = vrcp.f32 %v1343_v24  ;;  %v1157_v50 = vsub.f32 0.0, %v4610_v28  ;;  %v1025_v39 = vmul.f32 %v4445_v43, %v847_v33  ;;  %v3289_v42 = vpop.f32.mrb[30].mxu0 }
 0x13a   : > { %v3663_v44 = vpop.eup %3662  ;;  %v1464_v14 = vmul.f32 %v3661_v34, %v4519_v2  ;;  %3680 = vrcp.f32 %v1341_v12  ;;  %v1250_v46 = vmul.f32 1.442695, %v1159_v30  ;;  %v4621_v47 = vadd.f32 %v4450_v45, %v1027_v31  ;;  %v850_v48 = vpop.f32.mrb[31].mxu0 }
 0x13b   : > { %v3665_v56 = vpop.eup %3664  ;;  %v4624_v49 = vmul.f32 %v3663_v44, %v4524_v8  ;;  %3682 = vpow2.f32 %v1248_v23  ;;  %v1246_v61 = vmul.f32 1.442695, %v1157_v50  ;;  %v4627_v51 = vadd.f32 %v4450_v45, %v1025_v39 }
 0x13c   : > { %v3667_v52 = vpop.eup %3666  ;;  %v1465_v57 = vmul.f32 %v3665_v56, %v4528_v15  ;;  %3684 = vpow2.f32 %v1244_v26  ;;  %v1162_v2 = vsub.f32 0.0, %v4621_v47  ;;  %v1521_v59 = vpack.c.bf16 %v4594_v7, %v4586_v55 }
 0x13d   : > { %v3669_v60 = vpop.eup %3668  ;;  %v1346_v62 = vadd.f32 1.0, %v3667_v52  ;;  %3686 = vpow2.f32 %v1250_v46  ;;  %v1160_v8 = vsub.f32 0.0, %v4627_v51  ;;  %v1028_v63 = vmul.f32 %v3289_v42, %v4445_v43 }
 0x13e   : > { %v3671_v0 = vpop.eup %3670  ;;  %v1344_v3 = vadd.f32 1.0, %v3669_v60  ;;  %3688 = vpow2.f32 %v1246_v61  ;;  %v1256_v4 = vmul.f32 1.442695, %v1162_v2  ;;  %3347 = vmatmul.mubr.bf16.gmra.mrb[4].mxu1 %v1521_v59  ;;  %v1026_v15 = vmul.f32 %v4445_v43, %v850_v48 }
 0x13f   : > { %v3673_v10 = vpop.eup %3672  ;;  %3690 = vrcp.f32 %v1346_v62  ;;  %v1347_v11 = vadd.f32 1.0, %v3671_v0  ;;  %v1252_v32 = vmul.f32 1.442695, %v1160_v8  ;;  %v4637_v55 = vadd.f32 %v4450_v45, %v1028_v63  ;;  %v3292_v7 = vpop.f32.mrb[32].mxu0 }
 0x140   : > { %3692 = vrcp.f32 %v1344_v3  ;;  %v1345_v13 = vadd.f32 1.0, %v3673_v10  ;;  %v4640_v16 = vadd.f32 %v4450_v45, %v1026_v15  ;;  %v1031_v17 = vmul.f32 %v3292_v7, %v4445_v43  ;;  %v863_v18 = vpop.f32.mrb[33].mxu0 }
 0x141   : > { %v3675_v37 = vpop.eup %3674  ;;  %3694 = vrcp.f32 %v1347_v11  ;;  %v1163_v19 = vsub.f32 0.0, %v4637_v55  ;;  %v1522_v20 = vpack.c.bf16 %v1465_v57, %v1464_v14  ;;  %v1029_v21 = vmul.f32 %v4445_v43, %v863_v18  ;;  %v3293_v23 = vpop.f32.mrb[34].mxu0 }
 0x142   : > { %v3677_v41 = vpop.eup %3676  ;;  %v4646_v6 = vmul.f32 %v3675_v37, %v4538_v38  ;;  %3696 = vrcp.f32 %v1345_v13  ;;  %v1161_v24 = vsub.f32 0.0, %v4640_v16  ;;  %v4650_v26 = vadd.f32 %v4450_v45, %v1031_v17  ;;  %v866_v9 = vpop.f32.mrb[35].mxu0 }
 0x143   : > { %v3679_v29 = vpop.eup %3678  ;;  %v1468_v12 = vmul.f32 %v3677_v41, %v4543_v53  ;;  %3698 = vpow2.f32 %v1256_v4  ;;  %v1258_v30 = vmul.f32 1.442695, %v1163_v19  ;;  %3350 = vmatprep.mubr.bf16.mxu1 %v1522_v20  ;;  %v4654_v31 = vadd.f32 %v4450_v45, %v1029_v21 }
 0x144   : > { %v3681_v33 = vpop.eup %3680  ;;  %v4657_v38 = vmul.f32 %v3679_v29, %v4549_v54  ;;  %3700 = vpow2.f32 %v1252_v32  ;;  %v1254_v34 = vmul.f32 1.442695, %v1161_v24  ;;  %v1166_v50 = vsub.f32 0.0, %v4650_v26 }
 0x145   : > { %v3683_v39 = vpop.eup %3682  ;;  %v1469_v42 = vmul.f32 %v3681_v33, %v4552_v58  ;;  %3702 = vpow2.f32 %v1258_v30  ;;  %v1164_v53 = vsub.f32 0.0, %v4654_v31  ;;  %v1523_v44 = vpack.c.bf16 %v4624_v49, %v4615_v36 }
 0x146   : > { %v3685_v14 = vpop.eup %3684  ;;  %v1350_v46 = vadd.f32 1.0, %v3683_v39  ;;  %3704 = vpow2.f32 %v1254_v34  ;;  %v1264_v48 = vmul.f32 1.442695, %v1166_v50  ;;  %v1032_v54 = vmul.f32 %v3293_v23, %v4445_v43 }
 0x147   : > { %v3687_v56 = vpop.eup %3686  ;;  %v1348_v61 = vadd.f32 1.0, %v3685_v14  ;;  %v1260_v52 = vmul.f32 1.442695, %v1164_v53  ;;  %3351 = vmatmul.mubr.bf16.gmra.mrb[8].mxu1 %v1523_v44  ;;  %v1030_v57 = vmul.f32 %v4445_v43, %v866_v9  ;;  %v3296_v2 = vpop.f32.mrb[36].mxu0  ;;  %v1524_v58 = vpack.c.bf16 %v1469_v42, %v1468_v12 }
 0x148   : > { %v3689_v59 = vpop.eup %3688  ;;  %3706 = vrcp.f32 %v1350_v46  ;;  %v1351_v60 = vadd.f32 1.0, %v3687_v56  ;;  %v4667_v62 = vadd.f32 %v4450_v45, %v1032_v54  ;;  %v1035_v36 = vmul.f32 %v3296_v2, %v4445_v43  ;;  %v879_v49 = vpop.f32.mrb[37].mxu0 }
 0x149   : > { %v3691_v8 = vpop.eup %3690  ;;  %3708 = vrcp.f32 %v1348_v61  ;;  %v1349_v63 = vadd.f32 1.0, %v3689_v59  ;;  %v4671_v0 = vadd.f32 %v4450_v45, %v1030_v57  ;;  %3354 = vmatprep.mubr.bf16.mxu1 %v1524_v58  ;;  %v1033_v3 = vmul.f32 %v4445_v43, %v879_v49  ;;  %v3297_v4 = vpop.f32.mrb[38].mxu0 }
 0x14a   : > { %v3693_v15 = vpop.eup %3692  ;;  %v4675_v10 = vmul.f32 %v3691_v8, %v4566_v22  ;;  %3710 = vrcp.f32 %v1351_v60  ;;  %v1167_v11 = vsub.f32 0.0, %v4667_v62  ;;  %v4679_v32 = vadd.f32 %v4450_v45, %v1035_v36  ;;  %v882_v7 = vpop.f32.mrb[39].mxu0 }
 0x14b   : > { %v3695_v13 = vpop.eup %3694  ;;  %v1472_v17 = vmul.f32 %v3693_v15, %v4569_v25  ;;  %3712 = vrcp.f32 %v1349_v63  ;;  %v1165_v18 = vsub.f32 0.0, %v4671_v0  ;;  %v4684_v37 = vadd.f32 %v4450_v45, %v1033_v3 }
 0x14c   : > { %v3697_v19 = vpop.eup %3696  ;;  %v4687_v22 = vmul.f32 %v3695_v13, %v4577_v35  ;;  %3714 = vpow2.f32 %v1264_v48  ;;  %v1266_v20 = vmul.f32 1.442695, %v1167_v11  ;;  %v1170_v21 = vsub.f32 0.0, %v4679_v32 }
 0x14d   : > { %v3699_v23 = vpop.eup %3698  ;;  %v1473_v41 = vmul.f32 %v3697_v19, %v4580_v40  ;;  %3716 = vpow2.f32 %v1260_v52  ;;  %v1262_v24 = vmul.f32 1.442695, %v1165_v18  ;;  %v1168_v25 = vsub.f32 0.0, %v4684_v37 }
 0x14e   : > { %v3701_v9 = vpop.eup %3700  ;;  %v1354_v29 = vadd.f32 1.0, %v3699_v23  ;;  %3718 = vpow2.f32 %v1266_v20  ;;  %v1272_v12 = vmul.f32 1.442695, %v1170_v21  ;;  %v1525_v30 = vpack.c.bf16 %v4657_v38, %v4646_v6 }
 0x14f   : > { %v3703_v35 = vpop.eup %3702  ;;  %v1352_v33 = vadd.f32 1.0, %v3701_v9  ;;  %3720 = vpow2.f32 %v1262_v24  ;;  %v1268_v34 = vmul.f32 1.442695, %v1168_v25  ;;  %v1036_v50 = vmul.f32 %v3297_v4, %v4445_v43  ;;  %v3300_v39 = vpop.f32.mrb[40].mxu0 }
 0x150   : > { %v3705_v42 = vpop.eup %3704  ;;  %3722 = vrcp.f32 %v1354_v29  ;;  %v1355_v40 = vadd.f32 1.0, %v3703_v35  ;;  %3355 = vmatmul.mubr.bf16.gmra.mrb[12].mxu1 %v1525_v30  ;;  %v1034_v53 = vmul.f32 %v4445_v43, %v882_v7  ;;  %v1039_v44 = vmul.f32 %v3300_v39, %v4445_v43  ;;  %v895_v14 = vpop.f32.mrb[41].mxu0 }
 0x151   : > { %3724 = vrcp.f32 %v1352_v33  ;;  %v1353_v46 = vadd.f32 1.0, %v3705_v42  ;;  %v4698_v6 = vadd.f32 %v4450_v45, %v1036_v50  ;;  %v1526_v38 = vpack.c.bf16 %v1473_v41, %v1472_v17  ;;  %v3301_v48 = vpop.f32.mrb[42].mxu0 }
 0x152   : > { %v3707_v54 = vpop.eup %3706  ;;  %3726 = vrcp.f32 %v1355_v40  ;;  %v4701_v56 = vadd.f32 %v4450_v45, %v1034_v53  ;;  %v4704_v61 = vadd.f32 %v4450_v45, %v1039_v44  ;;  %v1037_v52 = vmul.f32 %v4445_v43, %v895_v14  ;;  %v898_v57 = vpop.f32.mrb[43].mxu0 }
 0x153   : > { %v3709_v2 = vpop.eup %3708  ;;  %3728 = vrcp.f32 %v1353_v46  ;;  %v1171_v58 = vsub.f32 0.0, %v4698_v6  ;;  %3358 = vmatprep.mubr.bf16.mxu1 %v1526_v38  ;;  %v1527_v59 = vpack.c.bf16 %v4687_v22, %v4675_v10  ;;  %v1478_v42 = vmul.f32 %v3707_v54, %v4591_v1 }
 0x154   : > { %v3711_v60 = vpop.eup %3710  ;;  %v1476_v36 = vmul.f32 %v3709_v2, %v4597_v27  ;;  %3730 = vpow2.f32 %v1272_v12  ;;  %v1169_v49 = vsub.f32 0.0, %v4701_v56  ;;  %v1174_v8 = vsub.f32 0.0, %v4704_v61 }
 0x155   : > { %v3713_v63 = vpop.eup %3712  ;;  %v4714_v3 = vmul.f32 %v3711_v60, %v4607_v5  ;;  %3732 = vpow2.f32 %v1268_v34  ;;  %v1274_v4 = vmul.f32 1.442695, %v1171_v58  ;;  %v4717_v15 = vadd.f32 %v4450_v45, %v1037_v52 }
 0x156   : > { %v3715_v11 = vpop.eup %3714  ;;  %v1477_v10 = vmul.f32 %v3713_v63, %v4610_v28  ;;  %v1270_v7 = vmul.f32 1.442695, %v1169_v49  ;;  %v1280_v13 = vmul.f32 1.442695, %v1174_v8  ;;  %v1040_v27 = vmul.f32 %v3301_v48, %v4445_v43 }
 0x157   : > { %v3717_v17 = vpop.eup %3716  ;;  %v1358_v18 = vadd.f32 1.0, %v3715_v11  ;;  %3734 = vpow2.f32 %v1274_v4  ;;  %v1172_v19 = vsub.f32 0.0, %v4717_v15  ;;  %v1038_v5 = vmul.f32 %v4445_v43, %v898_v57  ;;  %v3304_v22 = vpop.f32.mrb[44].mxu0 }
 0x158   : > { %v3719_v20 = vpop.eup %3718  ;;  %v1356_v21 = vadd.f32 1.0, %v3717_v17  ;;  %3736 = vpow2.f32 %v1270_v7  ;;  %3359 = vmatmul.mubr.bf16.gmra.mrb[16].mxu1 %v1527_v59  ;;  %v4724_v23 = vadd.f32 %v4450_v45, %v1040_v27  ;;  %v1043_v28 = vmul.f32 %v3304_v22, %v4445_v43  ;;  %v911_v41 = vpop.f32.mrb[45].mxu0 }
 0x159   : > { %v3721_v24 = vpop.eup %3720  ;;  %3738 = vrcp.f32 %v1358_v18  ;;  %v1359_v25 = vadd.f32 1.0, %v3719_v20  ;;  %v1276_v9 = vmul.f32 1.442695, %v1172_v19  ;;  %v4728_v29 = vadd.f32 %v4450_v45, %v1038_v5  ;;  %v3305_v12 = vpop.f32.mrb[46].mxu0 }
 0x15a   : > { %v3723_v30 = vpop.eup %3722  ;;  %3740 = vrcp.f32 %v1356_v21  ;;  %v1357_v35 = vadd.f32 1.0, %v3721_v24  ;;  %v1175_v33 = vsub.f32 0.0, %v4724_v23  ;;  %v4732_v34 = vadd.f32 %v4450_v45, %v1043_v28  ;;  %v914_v50 = vpop.f32.mrb[47].mxu0 }
 0x15b   : > { %v3725_v39 = vpop.eup %3724  ;;  %3742 = vrcp.f32 %v1359_v25  ;;  %v1173_v40 = vsub.f32 0.0, %v4728_v29  ;;  %v1528_v53 = vpack.c.bf16 %v1477_v10, %v1476_v36  ;;  %v1041_v1 = vmul.f32 %v4445_v43, %v911_v41 }
 0x15c   : > { %v3727_v44 = vpop.eup %3726  ;;  %v1480_v14 = vmul.f32 %v3725_v39, %v4627_v51  ;;  %3744 = vrcp.f32 %v1357_v35  ;;  %v1282_v46 = vmul.f32 1.442695, %v1175_v33  ;;  %v1178_v38 = vsub.f32 0.0, %v4732_v34 }
 0x15d   : > { %v3729_v48 = vpop.eup %3728  ;;  %v4739_v52 = vmul.f32 %v3727_v44, %v4637_v55  ;;  %3746 = vpow2.f32 %v1280_v13  ;;  %v1278_v57 = vmul.f32 1.442695, %v1173_v40  ;;  %3362 = vmatprep.mubr.bf16.mxu1 %v1528_v53  ;;  %v1529_v51 = vpack.c.bf16 %v4714_v3, %v1478_v42  ;;  %v4773_v53 = vld [vmem:[%s5879_s3] ss:$0 sm:$0xff] }
 0x15e   : > { %v3731_v54 = vpop.eup %3730  ;;  %v1481_v2 = vmul.f32 %v3729_v48, %v4640_v16  ;;  %3748 = vpow2.f32 %v1276_v9  ;;  %v1288_v58 = vmul.f32 1.442695, %v1178_v38  ;;  %v4745_v36 = vadd.f32 %v4450_v45, %v1041_v1 }
 0x15f   : > { %v3733_v59 = vpop.eup %3732  ;;  %v1362_v60 = vadd.f32 1.0, %v3731_v54  ;;  %3750 = vpow2.f32 %v1282_v46  ;;  %v1044_v55 = vmul.f32 %v3305_v12, %v4445_v43  ;;  %v3308_v49 = vpop.f32.mrb[48].mxu0  ;;  %v1042_v63 = vmul.f32 %v4445_v43, %v914_v50  ;;  %v4782_v46 = vld [vmem:[%s5878_s2] ss:$0 sm:$0xff] }
 0x160   : > { %v1360_v8 = vadd.f32 1.0, %v3733_v59  ;;  %3752 = vpow2.f32 %v1278_v57  ;;  %3363 = vmatmul.mubr.bf16.gmra.mrb[20].mxu1 %v1529_v51  ;;  %v1047_v16 = vmul.f32 %v3308_v49, %v4445_v43  ;;  %v927_v4 = vpop.f32.mrb[49].mxu0  ;;  %v1176_v3 = vsub.f32 0.0, %v4745_v36 }
 0x161   : > { %v3735_v11 = vpop.eup %3734  ;;  %3754 = vrcp.f32 %v1362_v60  ;;  %v4752_v10 = vadd.f32 %v4450_v45, %v1044_v55  ;;  %v1530_v7 = vpack.c.bf16 %v1481_v2, %v1480_v14  ;;  %v3309_v13 = vpop.f32.mrb[50].mxu0  ;;  %v4755_v18 = vadd.f32 %v4450_v45, %v1042_v63 }
 0x162   : > { %v3737_v27 = vpop.eup %3736  ;;  %3756 = vrcp.f32 %v1360_v8  ;;  %v1363_v17 = vadd.f32 1.0, %v3735_v11  ;;  %v4758_v19 = vadd.f32 %v4450_v45, %v1047_v16  ;;  %v930_v5 = vpop.f32.mrb[51].mxu0  ;;  %v1284_v21 = vmul.f32 1.442695, %v1176_v3 }
 0x163   : > { %v3739_v22 = vpop.eup %3738  ;;  %v1361_v20 = vadd.f32 1.0, %v3737_v27  ;;  %3758 = vpow2.f32 %v1288_v58  ;;  %v1179_v28 = vsub.f32 0.0, %v4752_v10  ;;  %3366 = vmatprep.mubr.bf16.mxu1 %v1530_v7  ;;  %v1482_v24 = vmul.f32 %v3723_v30, %v4621_v47 }
 0x164   : > { %v3741_v41 = vpop.eup %3740  ;;  %3760 = vrcp.f32 %v1363_v17  ;;  %v1177_v25 = vsub.f32 0.0, %v4755_v18  ;;  %v1182_v9 = vsub.f32 0.0, %v4758_v19  ;;  %v1045_v33 = vmul.f32 %v4445_v43, %v927_v4 }
 0x165   : > { %v3743_v12 = vpop.eup %3742  ;;  %v1484_v45 = vmul.f32 %v3741_v41, %v4654_v31  ;;  %3762 = vrcp.f32 %v1361_v20  ;;  %v1290_v35 = vmul.f32 1.442695, %v1179_v28  ;;  %v1531_v43 = vpack.c.bf16 %v4739_v52, %v1482_v24 }
 0x166   : > { %v3745_v50 = vpop.eup %3744  ;;  %v4767_v39 = vmul.f32 %v3743_v12, %v4667_v62  ;;  %3764 = vpow2.f32 %v1284_v21  ;;  %v1286_v42 = vmul.f32 1.442695, %v1177_v25  ;;  %v1296_v40 = vmul.f32 1.442695, %v1182_v9 }
 0x167   : > { %v3747_v47 = vpop.eup %3746  ;;  %v1485_v30 = vmul.f32 %v3745_v50, %v4671_v0  ;;  %3766 = vpow2.f32 %v1290_v35  ;;  %v4776_v31 = vadd.f32 %v4773_v53, %v1045_v33  ;;  %v3312_v44 = vpop.f32.mrb[52].mxu0  ;;  %v1048_v0 = vmul.f32 %v4782_v46, %v3309_v13 }
 0x168   : > { %v3749_v62 = vpop.eup %3748  ;;  %v1366_v14 = vadd.f32 1.0, %v3747_v47  ;;  %3768 = vpow2.f32 %v1286_v42  ;;  %v1046_v38 = vmul.f32 %v4782_v46, %v930_v5  ;;  %v943_v48 = vpop.f32.mrb[53].mxu0  ;;  %3367 = vmatmul.mubr.bf16.gmra.mrb[24].mxu1 %v1531_v43  ;;  %v1051_v52 = vmul.f32 %v4782_v46, %v3312_v44 }
 0x169   : > { %v3751_v57 = vpop.eup %3750  ;;  %v1364_v1 = vadd.f32 1.0, %v3749_v62  ;;  %3770 = vpow2.f32 %v1296_v40  ;;  %v1180_v54 = vsub.f32 0.0, %v4776_v31  ;;  %v3313_v2 = vpop.f32.mrb[54].mxu0  ;;  %v4789_v59 = vadd.f32 %v4773_v53, %v1048_v0 }
 0x16a   : > { %v3753_v58 = vpop.eup %3752  ;;  %3772 = vrcp.f32 %v1366_v14  ;;  %v1367_v51 = vadd.f32 1.0, %v3751_v57  ;;  %v4792_v60 = vadd.f32 %v4773_v53, %v1046_v38  ;;  %v946_v55 = vpop.f32.mrb[55].mxu0  ;;  %v4795_v16 = vadd.f32 %v4773_v53, %v1051_v52 }
 0x16b   : > { %v3755_v49 = vpop.eup %3754  ;;  %3774 = vrcp.f32 %v1364_v1  ;;  %v1365_v8 = vadd.f32 1.0, %v3753_v58  ;;  %v1292_v63 = vmul.f32 1.442695, %v1180_v54  ;;  %v1486_v11 = vmul.f32 %v3739_v22, %v4650_v26 }
 0x16c   : > { %v3757_v4 = vpop.eup %3756  ;;  %3776 = vrcp.f32 %v1367_v51  ;;  %v1183_v3 = vsub.f32 0.0, %v4789_v59  ;;  %v1181_v7 = vsub.f32 0.0, %v4792_v60  ;;  %v4801_v27 = vmul.f32 %v3755_v49, %v4679_v32 }
 0x16d   : > { %v3759_v13 = vpop.eup %3758  ;;  %3778 = vrcp.f32 %v1365_v8  ;;  %v1186_v17 = vsub.f32 0.0, %v4795_v16  ;;  %v1532_v5 = vpack.c.bf16 %v1485_v30, %v1484_v45  ;;  %v1049_v25 = vmul.f32 %v4782_v46, %v943_v48 }
 0x16e   : > { %v3761_v20 = vpop.eup %3760  ;;  %v1370_v21 = vadd.f32 1.0, %v3759_v13  ;;  %3780 = vpow2.f32 %v1292_v63  ;;  %v1298_v28 = vmul.f32 1.442695, %v1183_v3  ;;  %v1294_v41 = vmul.f32 1.442695, %v1181_v7 }
 0x16f   : > { %v3763_v24 = vpop.eup %3762  ;;  %v4805_v26 = vmul.f32 %v3761_v20, %v4698_v6  ;;  %v1304_v22 = vmul.f32 1.442695, %v1186_v17  ;;  %3370 = vmatprep.mubr.bf16.mxu1 %v1532_v5  ;;  %v1533_v32 = vpack.c.bf16 %v4767_v39, %v1486_v11  ;;  %v3316_v9 = vpop.f32.mrb[56].mxu0  ;;  %v1052_v45 = vmul.f32 %v4782_v46, %v3313_v2 }
 0x170   : > { %v3765_v12 = vpop.eup %3764  ;;  %v1489_v35 = vmul.f32 %v3763_v24, %v4701_v56  ;;  %3782 = vrcp.f32 %v1370_v21  ;;  %v1050_v33 = vmul.f32 %v4782_v46, %v946_v55  ;;  %v959_v50 = vpop.f32.mrb[57].mxu0  ;;  %v4813_v6 = vadd.f32 %v4773_v53, %v1049_v25 }
 0x171   : > { %v3767_v42 = vpop.eup %3766  ;;  %v1368_v40 = vadd.f32 1.0, %v3765_v12  ;;  %3784 = vpow2.f32 %v1298_v28  ;;  %3371 = vmatmul.mubr.bf16.gmra.mrb[28].mxu1 %v1533_v32  ;;  %v1055_v47 = vmul.f32 %v4782_v46, %v3316_v9  ;;  %v3317_v39 = vpop.f32.mrb[58].mxu0  ;;  %v4817_v56 = vadd.f32 %v4773_v53, %v1052_v45 }
 0x172   : > { %v3769_v30 = vpop.eup %3768  ;;  %v1371_v43 = vadd.f32 1.0, %v3767_v42  ;;  %3786 = vpow2.f32 %v1294_v41  ;;  %v4820_v44 = vadd.f32 %v4773_v53, %v1050_v33  ;;  %v962_v62 = vpop.f32.mrb[59].mxu0  ;;  %v1184_v38 = vsub.f32 0.0, %v4813_v6 }
 0x173   : > { %v3771_v14 = vpop.eup %3770  ;;  %3788 = vrcp.f32 %v1368_v40  ;;  %v1369_v0 = vadd.f32 1.0, %v3769_v30  ;;  %v4824_v48 = vadd.f32 %v4773_v53, %v1055_v47  ;;  %v1187_v54 = vsub.f32 0.0, %v4817_v56 }
 0x174   : > { %v3773_v57 = vpop.eup %3772  ;;  %3790 = vrcp.f32 %v1371_v43  ;;  %v1374_v1 = vadd.f32 1.0, %v3771_v14  ;;  %v1185_v52 = vsub.f32 0.0, %v4820_v44  ;;  %v1488_v58 = vmul.f32 %v3757_v4, %v4684_v37 }
 0x175   : > { %v3775_v2 = vpop.eup %3774  ;;  %3792 = vrcp.f32 %v1369_v0  ;;  %v1300_v51 = vmul.f32 1.442695, %v1184_v38  ;;  %v1190_v55 = vsub.f32 0.0, %v4824_v48  ;;  %v4831_v8 = vmul.f32 %v3773_v57, %v4704_v61 }
 0x176   : > { %v3777_v49 = vpop.eup %3776  ;;  %3794 = vrcp.f32 %v1374_v1  ;;  %v1306_v63 = vmul.f32 1.442695, %v1187_v54  ;;  %v1302_v11 = vmul.f32 1.442695, %v1185_v52  ;;  %v1492_v7 = vmul.f32 %v3775_v2, %v4717_v15 }
 0x177   : > { %v3779_v3 = vpop.eup %3778  ;;  %3796 = vpow2.f32 %v1304_v22  ;;  %v1312_v13 = vmul.f32 1.442695, %v1190_v55  ;;  %v1534_v17 = vpack.c.bf16 %v1489_v35, %v1488_v58  ;;  %v3320_v5 = vpop.f32.mrb[60].mxu0  ;;  %v1053_v4 = vmul.f32 %v4782_v46, %v959_v50 }
 0x178   : > { %v3781_v20 = vpop.eup %3780  ;;  %v1493_v37 = vmul.f32 %v3779_v3, %v4728_v29  ;;  %3798 = vpow2.f32 %v1300_v51  ;;  %v1535_v61 = vpack.c.bf16 %v4805_v26, %v4801_v27  ;;  %v975_v21 = vpop.f32.mrb[61].mxu0  ;;  %v1056_v41 = vmul.f32 %v4782_v46, %v3317_v39 }
 0x179   : > { %v1372_v28 = vadd.f32 1.0, %v3781_v20  ;;  %3800 = vpow2.f32 %v1306_v63  ;;  %3374 = vmatprep.mubr.bf16.mxu1 %v1534_v17  ;;  %v1054_v15 = vmul.f32 %v4782_v46, %v962_v62  ;;  %v3321_v24 = vpop.f32.mrb[62].mxu0  ;;  %v4841_v25 = vadd.f32 %v4773_v53, %v1053_v4 }
 0x17a   : > { %v3783_v22 = vpop.eup %3782  ;;  %3802 = vpow2.f32 %v1302_v11  ;;  %3375 = vmatmul.mubr.bf16.gmra.mrb[32].mxu1 %v1535_v61  ;;  %v1059_v29 = vmul.f32 %v4782_v46, %v3320_v5  ;;  %v1536_v32 = vpack.c.bf16 %v1493_v37, %v1492_v7  ;;  %v978_v9 = vpop.f32.mrb[63].mxu0  ;;  %v1495_v26 = vmul.f32 %v3777_v49, %v4724_v23 }
 0x17b   : > { %v3785_v27 = vpop.eup %3784  ;;  %3804 = vrcp.f32 %v1372_v28  ;;  %v4846_v12 = vadd.f32 %v4773_v53, %v1056_v41  ;;  %v4849_v35 = vadd.f32 %v4773_v53, %v1054_v15  ;;  %v1188_v50 = vsub.f32 0.0, %v4841_v25 }
 0x17c   : > { %v3787_v45 = vpop.eup %3786  ;;  %v1375_v33 = vadd.f32 1.0, %v3785_v27  ;;  %3806 = vpow2.f32 %v1312_v13  ;;  %v4853_v42 = vadd.f32 %v4773_v53, %v1059_v29  ;;  %3378 = vmatprep.mubr.bf16.mxu1 %v1536_v32  ;;  %v1057_v30 = vmul.f32 %v4782_v46, %v975_v21 }
 0x17d   : > { %v3789_v40 = vpop.eup %3788  ;;  %v1373_v47 = vadd.f32 1.0, %v3787_v45  ;;  %v1191_v23 = vsub.f32 0.0, %v4846_v12  ;;  %v1189_v39 = vsub.f32 0.0, %v4849_v35  ;;  %v1498_v62 = vmul.f32 %v3783_v22, %v4732_v34 }
 0x17e   : > { %v3791_v43 = vpop.eup %3790  ;;  %3808 = vrcp.f32 %v1375_v33  ;;  %v1308_v14 = vmul.f32 1.442695, %v1188_v50  ;;  %v1194_v0 = vsub.f32 0.0, %v4853_v42  ;;  %v1496_v57 = vmul.f32 %v3789_v40, %v4745_v36 }
 0x17f   : > { %v3793_v38 = vpop.eup %3792  ;;  %3810 = vrcp.f32 %v1373_v47  ;;  %v1314_v1 = vmul.f32 1.442695, %v1191_v23  ;;  %v1310_v54 = vmul.f32 1.442695, %v1189_v39  ;;  %v4863_v51 = vadd.f32 %v4773_v53, %v1057_v30 }
 0x180   : > { %v3795_v52 = vpop.eup %3794  ;;  %v1497_v2 = vmul.f32 %v3793_v38, %v4755_v18  ;;  %3812 = vpow2.f32 %v1308_v14  ;;  %v1320_v58 = vmul.f32 1.442695, %v1194_v0  ;;  %v1499_v34 = vmul.f32 %v3791_v43, %v4752_v10 }
 0x181   : > { %v3797_v55 = vpop.eup %3796  ;;  %3814 = vpow2.f32 %v1314_v1  ;;  %v1537_v49 = vpack.c.bf16 %v1495_v26, %v4831_v8  ;;  %v1060_v63 = vmul.f32 %v4782_v46, %v3321_v24  ;;  %v1192_v3 = vsub.f32 0.0, %v4863_v51 }
 0x182   : > { %v3799_v36 = vpop.eup %3798  ;;  %v1378_v11 = vadd.f32 1.0, %v3797_v55  ;;  %3816 = vpow2.f32 %v1310_v54  ;;  %v1058_v18 = vmul.f32 %v4782_v46, %v978_v9  ;;  %v1538_v10 = vpack.c.bf16 %v1497_v2, %v1496_v57 }
 0x183   : > { %v3801_v7 = vpop.eup %3800  ;;  %v1376_v13 = vadd.f32 1.0, %v3799_v36  ;;  %3818 = vpow2.f32 %v1320_v58  ;;  %3379 = vmatmul.mubr.bf16.gmra.mrb[36].mxu1 %v1537_v49  ;;  %v4871_v17 = vadd.f32 %v4773_v53, %v1060_v63  ;;  %v1316_v20 = vmul.f32 1.442695, %v1192_v3 }
 0x184   : > { %v3803_v5 = vpop.eup %3802  ;;  %3820 = vrcp.f32 %v1378_v11  ;;  %v1379_v8 = vadd.f32 1.0, %v3801_v7  ;;  %v4874_v37 = vadd.f32 %v4773_v53, %v1058_v18  ;;  %3382 = vmatprep.mubr.bf16.mxu1 %v1538_v10  ;;  %v1539_v21 = vpack.c.bf16 %v1499_v34, %v1498_v62 }
 0x185   : > { %v3805_v4 = vpop.eup %3804  ;;  %3822 = vrcp.f32 %v1376_v13  ;;  %v1377_v61 = vadd.f32 1.0, %v3803_v5  ;;  %v1195_v46 = vsub.f32 0.0, %v4871_v17  ;;  %v1502_v53 = vmul.f32 %v3795_v52, %v4758_v19 }
 0x186   : > { %v3807_v28 = vpop.eup %3806  ;;  %3824 = vrcp.f32 %v1379_v8  ;;  %v1193_v41 = vsub.f32 0.0, %v4874_v37  ;;  %v1500_v26 = vmul.f32 %v3805_v4, %v4776_v31 }
 0x187   : > { %3826 = vrcp.f32 %v1377_v61  ;;  %v1322_v15 = vmul.f32 1.442695, %v1195_v46  ;;  %v1382_v22 = vadd.f32 1.0, %v3807_v28  ;;  %v2427_v61 = vlaneseq }
 0x188   : > { %v3809_v24 = vpop.eup %3808  ;;  %3828 = vpow2.f32 %v1316_v20  ;;  %v1318_v29 = vmul.f32 1.442695, %v1193_v41  ;;  %v4898_v28 = vstv %s3158_s17 }
 0x189   : > { %v3811_v32 = vpop.eup %3810  ;;  %v1503_v9 = vmul.f32 %v3809_v24, %v4789_v59  ;;  %3830 = vpow2.f32 %v1322_v15  ;;  %v4894_v46 = vshrl.u32 %v2427_v61, 7 }
 0x18a   : > { %v3813_v27 = vpop.eup %3812  ;;  %v1501_v45 = vmul.f32 %v3811_v32, %v4792_v60  ;;  %3832 = vpow2.f32 %v1318_v29  ;;  %v4917_v32 = vld [vmem:[%s5881_s5] ss:$0 sm:$0xff] }
 0x18b   : > { %v3815_v33 = vpop.eup %3814  ;;  %v1380_v50 = vadd.f32 1.0, %v3813_v27  ;;  %3383 = vmatmul.mubr.bf16.gmra.mrb[40].mxu1 %v1539_v21  ;;  %v1541_v40 = vpack.c.bf16 %v1503_v9, %v1502_v53  ;;  %3834 = vrcp.f32 %v1382_v22  ;;  %v2430_v21 = vadd.s32 16, %v4894_v46 }
 0x18c   : > { %v3817_v47 = vpop.eup %3816  ;;  %v1383_v23 = vadd.f32 1.0, %v3815_v33  ;;  %v1540_v39 = vpack.c.bf16 %v1501_v45, %v1500_v26  ;;  %v2435_v41 = vadd.s32 56, %v4894_v46  ;;  %v4910_v24 = vadd.s32 %v4898_v28, %v4894_v46 }
 0x18d   : > { %v3819_v30 = vpop.eup %3818  ;;  %3836 = vrcp.f32 %v1380_v50  ;;  %v1381_v19 = vadd.f32 1.0, %v3817_v47  ;;  %v4906_v15 = vadd.s32 %v4898_v28, %v2430_v21  ;;  %v2433_v22 = vadd.s32 40, %v4894_v46 }
 0x18e   : > { %v3821_v43 = vpop.eup %3820  ;;  %3838 = vrcp.f32 %v1383_v23  ;;  %3386 = vmatprep.mubr.bf16.mxu1 %v1540_v39  ;;  %v1386_v0 = vadd.f32 1.0, %v3819_v30  ;;  %v2438_v29 = vadd.s32 80, %v4894_v46  ;;  %v2436_v9 = vadd.s32 64, %v4894_v46  ;;  %v4936_v23 = vld [vmem:[%s5882_s6] ss:$0 sm:$0xff] }
 0x18f   : > { %v3823_v59 = vpop.eup %3822  ;;  %3840 = vrcp.f32 %v1381_v19  ;;  %v1506_v62 = vmul.f32 %v3821_v43, %v4795_v16  ;;  %v2439_v27 = vadd.s32 88, %v4894_v46  ;;  %v2437_v26 = vadd.s32 72, %v4894_v46 }
 0x190   : > { %v3825_v31 = vpop.eup %3824  ;;  %v1504_v57 = vmul.f32 %v3823_v59, %v4813_v6  ;;  %3842 = vrcp.f32 %v1386_v0  ;;  %v2442_v50 = vadd.s32 112, %v4894_v46  ;;  %v4942_v30 = vadd.s32 %v4898_v28, %v2435_v41 }
 0x191   : > { %v3827_v60 = vpop.eup %3826  ;;  %v1507_v14 = vmul.f32 %v3825_v31, %v4817_v56  ;;  %v2443_v19 = vadd.s32 120, %v4894_v46  ;;  %v2441_v43 = vadd.s32 104, %v4894_v46  ;;  %v2454_v21 = vadd.s32 208, %v4894_v46 }
 0x192   : > { %v3829_v38 = vpop.eup %3828  ;;  %v1505_v1 = vmul.f32 %v3827_v60, %v4820_v44  ;;  %v4948_v60 = vadd.s32 %v4898_v28, %v2433_v22  ;;  %vm2560_vm1 = vcmp.lt.s32.totalorder %v4906_v15, 1024  ;;  %vm2558_vm2 = vcmp.lt.s32.totalorder %v4910_v24, 1024 }
 0x193   : > { %v1384_v54 = vadd.f32 1.0, %v3829_v38  ;;  %3387 = vmatmul.mubr.bf16.gmra.mrb[44].mxu1 %v1541_v40  ;;  %v1543_v52 = vpack.c.bf16 %v1507_v14, %v1506_v62  ;;  %v3831_v2 = vpop.eup %3830  ;;  %v2440_v40 = vadd.s32 96, %v4894_v46  ;;  %v4951_v62 = vadd.s32 %v4898_v28, %v2438_v29 }
 0x194   : > { %v1542_v58 = vpack.c.bf16 %v1505_v1, %v1504_v57  ;;  %v3833_v55 = vpop.eup %3832  ;;  %v1387_v34 = vadd.f32 1.0, %v3831_v2  ;;  %v2446_v14 = vadd.s32 144, %v4894_v46  ;;  %v4956_v57 = vadd.s32 %v4898_v28, %v2436_v9 }
 0x195   : > { %v3835_v49 = vpop.eup %3834  ;;  %3844 = vrcp.f32 %v1384_v54  ;;  %v1385_v63 = vadd.f32 1.0, %v3833_v55  ;;  %v4959_v1 = vadd.s32 %v4898_v28, %v2439_v27  ;;  %v4962_v54 = vadd.s32 %v4898_v28, %v2437_v26 }
 0x196   : > { %3390 = vmatprep.mubr.bf16.mxu1 %v1542_v58  ;;  %3846 = vrcp.f32 %v1387_v34  ;;  %v1510_v6 = vmul.f32 %v3835_v49, %v4824_v48  ;;  %v4969_v55 = vadd.s32 %v4898_v28, %v2442_v50  ;;  %v4972_v34 = vadd.s32 %v4898_v28, %v2440_v40 }
 0x197   : > { %v3837_v16 = vpop.eup %3836  ;;  %3848 = vrcp.f32 %v1385_v63  ;;  %v2455_v26 = vadd.s32 216, %v4894_v46  ;;  %vm2563_vm7 = vcmp.lt.s32.totalorder %v4948_v60, 1024  ;;  %vm2565_vm8 = vcmp.lt.s32.totalorder %v4942_v30, 1024 }
 0x198   : > { %v3839_v56 = vpop.eup %3838  ;;  %v1508_v11 = vmul.f32 %v3837_v16, %v4841_v25  ;;  %v4979_v16 = vadd.s32 %v4898_v28, %v2443_v19  ;;  %v2453_v19 = vadd.s32 200, %v4894_v46  ;;  %vm2568_vm9 = vcmp.lt.s32.totalorder %v4951_v62, 1024 }
 0x199   : > { %v3841_v36 = vpop.eup %3840  ;;  %v1511_v44 = vmul.f32 %v3839_v56, %v4846_v12  ;;  %v4982_v56 = vadd.s32 %v4898_v28, %v2441_v43  ;;  %v2458_v43 = vadd.s32 240, %v4894_v46  ;;  %vm2566_vm10 = vcmp.lt.s32.totalorder %v4956_v57, 1024 }
 0x19a   : > { %v1509_v3 = vmul.f32 %v3841_v36, %v4849_v35  ;;  %v3843_v13 = vpop.eup %3842  ;;  %vm2567_vm11 = vcmp.lt.s32.totalorder %v4962_v54, 1024  ;;  %vm2569_vm12 = vcmp.lt.s32.totalorder %v4959_v1, 1024  ;;  %vm2570_vm13 = vcmp.lt.s32.totalorder %v4972_v34, 1024 }
 0x19b   : > { %3391 = vmatmul.mubr.bf16.gmra.mrb[48].mxu1 %v1543_v52  ;;  %v1545_v18 = vpack.c.bf16 %v1511_v44, %v1510_v6  ;;  %v1514_v20 = vmul.f32 %v3843_v13, %v4853_v42  ;;  %v2431_v42 = vadd.s32 24, %v4894_v46  ;;  %v4989_v44 = vadd.s32 %v4898_v28, %v2446_v14 }
 0x19c   : > { %v1544_v7 = vpack.c.bf16 %v1509_v3, %v1508_v11  ;;  %v2444_v11 = vadd.s32 128, %v4894_v46  ;;  %v2445_v13 = vadd.s32 136, %v4894_v46  ;;  %vm2572_vm14 = vcmp.lt.s32.totalorder %v4969_v55, 1024 }
 0x19d   : > { %v4920_v53 = vadd.s32 %v4898_v28, %v2431_v42  ;;  %vm2571_vm15 = vcmp.lt.s32.totalorder %v4982_v56, 1024  ;;  %vm2573_vm0 = vcmp.lt.s32.totalorder %v4979_v16, 1024 }
 0x19e   : > { %3394 = vmatprep.mubr.bf16.mxu1 %v1544_v7  ;;  %v2447_v7 = vadd.s32 152, %v4894_v46  ;;  %v5005_v61 = vadd.s32 %v4898_v28, %v2444_v11  ;;  %v2462_v11 = vadd.s32 272, %v4894_v46 }
 0x19f   : > { %v3845_v10 = vpop.eup %3844  ;;  %vm2561_vm3 = vcmp.lt.s32.totalorder %v4920_v53, 1024 }
 0x1a0   : > { %v3847_v5 = vpop.eup %3846  ;;  %v1512_v48 = vmul.f32 %v3845_v10, %v4863_v51  ;;  %v2434_v51 = vadd.s32 48, %v4894_v46 }
 0x1a1   : > { %v3849_v8 = vpop.eup %3848  ;;  %v1515_v4 = vmul.f32 %v3847_v5, %v4871_v17  ;;  %v2429_v17 = vadd.s32 8, %v4894_v46 }
 0x1a2   : > { %v1513_v12 = vmul.f32 %v3849_v8, %v4874_v37  ;;  %v2432_v37 = vadd.s32 32, %v4894_v46  ;;  %v4929_v33 = vadd.s32 %v4898_v28, %v2434_v51  ;;  %v2450_v8 = vadd.s32 176, %v4894_v46 }
 0x1a3   : > { %3395 = vmatmul.mubr.bf16.gmra.mrb[52].mxu1 %v1545_v18  ;;  %v1547_v25 = vpack.c.bf16 %v1515_v4, %v1514_v20  ;;  %v4926_v45 = vadd.s32 %v4898_v28, %v2429_v17  ;;  %v2448_v20 = vadd.s32 160, %v4894_v46  ;;  %v5009_v17 = vadd.s32 %v4898_v28, %v2447_v7 }
 0x1a4   : > { %v1546_v35 = vpack.c.bf16 %v1513_v12, %v1512_v48  ;;  %v4939_v39 = vadd.s32 %v4898_v28, %v2432_v37  ;;  %v2451_v12 = vadd.s32 184, %v4894_v46  ;;  %v2452_v51 = vadd.s32 192, %v4894_v46 }
 0x1a5   : > { %v5013_v37 = vadd.s32 %v4898_v28, %v2445_v13  ;;  %v5016_v41 = vadd.s32 %v4898_v28, %v2450_v8  ;;  %v5019_v22 = vadd.s32 %v4898_v28, %v2448_v20  ;;  %v5051_v13 = vadd.s32 %v4898_v28, %v2455_v26 }
 0x1a6   : > { %3398 = vmatprep.mubr.bf16.mxu1 %v1546_v35  ;;  %v5022_v9 = vadd.s32 %v4898_v28, %v2451_v12  ;;  %v5036_v14 = vadd.s32 %v4898_v28, %v2452_v51  ;;  %v5059_v20 = vadd.s32 %v4898_v28, %v2453_v19  ;;  %v5079_v26 = vadd.s32 %v4898_v28, %v2462_v11 }
 0x1a7   : > { %5912 = vst [vmem:[#allocation11_spill] sm:$0xff] %v5051_v13  ;;  %vm2559_vm4 = vcmp.lt.s32.totalorder %v4926_v45, 1024  ;;  %vm2562_vm5 = vcmp.lt.s32.totalorder %v4939_v39, 1024  ;;  %vm2564_vm6 = vcmp.lt.s32.totalorder %v4929_v33, 1024 }
 0x1a8   : > { %5917 = vst [vmem:[#allocation16_spill] sm:$0xff] %v5079_v26 }
 0x1ab   : > { %3399 = vmatmul.mubr.bf16.gmra.mrb[56].mxu1 %v1547_v25  ;;  %v2449_v25 = vadd.s32 168, %v4894_v46 }
 0x1ad   : > { %v5025_v27 = vadd.s32 %v4898_v28, %v2449_v25 }
 0x1fc   : > { %v3340_v47 = vpop.f32.mrb[64].mxu0 }
 0x1fd   : > { %v1910_v59 = vmul.f32 %v3340_v47, %v4917_v32  ;;  %v1646_v31 = vpop.f32.mrb[65].mxu0  ;;  %v5030_v47 = vadd.s32 %v4898_v28, %v2454_v21 }
 0x1fe   : > { %v1908_v0 = vmul.f32 %v4917_v32, %v1646_v31  ;;  %v3341_v38 = vpop.f32.mrb[66].mxu0 }
 0x1ff   : > { %v4965_v52 = vadd.f32 %v4936_v23, %v1910_v59  ;;  %v1911_v2 = vmul.f32 %v3341_v38, %v4917_v32  ;;  %v1649_v58 = vpop.f32.mrb[67].mxu0  ;;  %5911 = vst [vmem:[#allocation10_spill] sm:$0xff] %v5030_v47  ;;  %v2459_v38 = vadd.s32 248, %v4894_v46 }
 0x200   : > { %v4975_v49 = vadd.f32 %v4936_v23, %v1908_v0  ;;  %v1909_v63 = vmul.f32 %v4917_v32, %v1649_v58  ;;  %v2456_v0 = vadd.s32 224, %v4894_v46 }
 0x201   : > { %v2045_v36 = vsub.f32 0.0, %v4965_v52  ;;  %v4986_v6 = vadd.f32 %v4936_v23, %v1911_v2 }
 0x202   : > { %v2043_v3 = vsub.f32 0.0, %v4975_v49  ;;  %v4994_v18 = vadd.f32 %v4936_v23, %v1909_v63  ;;  %v5069_v25 = vadd.s32 %v4898_v28, %v2456_v0 }
 0x203   : > { %v2111_v10 = vmul.f32 1.442695, %v2045_v36  ;;  %v2046_v5 = vsub.f32 0.0, %v4986_v6  ;;  %v2457_v36 = vadd.s32 232, %v4894_v46 }
 0x204   : > { %v2107_v4 = vmul.f32 1.442695, %v2043_v3  ;;  %v2044_v48 = vsub.f32 0.0, %v4994_v18  ;;  %5914 = vst [vmem:[#allocation13_spill] sm:$0xff] %v5069_v25 }
 0x205   : > { %3850 = vpow2.f32 %v2111_v10  ;;  %v2113_v35 = vmul.f32 1.442695, %v2046_v5  ;;  %v2460_v10 = vadd.s32 256, %v4894_v46 }
 0x206   : > { %3852 = vpow2.f32 %v2107_v4  ;;  %v2109_v42 = vmul.f32 1.442695, %v2044_v48  ;;  %v5062_v4 = vadd.s32 %v4898_v28, %v2458_v43 }
 0x207   : > { %3854 = vpow2.f32 %v2113_v35  ;;  %v5072_v35 = vadd.s32 %v4898_v28, %v2459_v38  ;;  %v5083_v43 = vadd.s32 %v4898_v28, %v2460_v10 }
 0x208   : > { %3856 = vpow2.f32 %v2109_v42  ;;  %v3344_v29 = vpop.f32.mrb[0].mxu1  ;;  %5913 = vst [vmem:[#allocation12_spill] sm:$0xff] %v5062_v4 }
 0x209   : > { %v1914_v50 = vmul.f32 %v3344_v29, %v4917_v32  ;;  %v1662_v40 = vpop.f32.mrb[1].mxu1  ;;  %5915 = vst [vmem:[#allocation14_spill] sm:$0xff] %v5072_v35  ;;  %v5076_v29 = vadd.s32 %v4898_v28, %v2457_v36  ;;  %5918 = vst [vmem:[#allocation17_spill] sm:$0xff] %v5083_v43 }
 0x20a   : > { %v1912_v59 = vmul.f32 %v4917_v32, %v1662_v40  ;;  %v3345_v31 = vpop.f32.mrb[2].mxu1 }
 0x20b   : > { %v5041_v2 = vadd.f32 %v4936_v23, %v1914_v50  ;;  %v1915_v58 = vmul.f32 %v3345_v31, %v4917_v32  ;;  %v1665_v63 = vpop.f32.mrb[3].mxu1  ;;  %5916 = vst [vmem:[#allocation15_spill] sm:$0xff] %v5076_v29 }
 0x20c   : > { %v5047_v3 = vadd.f32 %v4936_v23, %v1912_v59  ;;  %v1913_v7 = vmul.f32 %v4917_v32, %v1665_v63  ;;  %v2463_v59 = vadd.s32 280, %v4894_v46  ;;  %v2466_v63 = vadd.s32 304, %v4894_v46 }
 0x20d   : > { %v2049_v5 = vsub.f32 0.0, %v5041_v2  ;;  %v5056_v8 = vadd.f32 %v4936_v23, %v1915_v58  ;;  %v2461_v58 = vadd.s32 264, %v4894_v46 }
 0x20e   : > { %v2047_v48 = vsub.f32 0.0, %v5047_v3  ;;  %v5066_v12 = vadd.f32 %v4936_v23, %v1913_v7 }
 0x20f   : > { %v3851_v21 = vpop.eup %3850  ;;  %v2119_v42 = vmul.f32 1.442695, %v2049_v5  ;;  %v2050_v51 = vsub.f32 0.0, %v5056_v8 }
 0x210   : > { %v3853_v50 = vpop.eup %3852  ;;  %v2237_v40 = vadd.f32 1.0, %v3851_v21  ;;  %v2048_v19 = vsub.f32 0.0, %v5066_v12  ;;  %v2115_v7 = vmul.f32 1.442695, %v2047_v48 }
 0x211   : > { %v3855_v31 = vpop.eup %3854  ;;  %v2235_v0 = vadd.f32 1.0, %v3853_v50  ;;  %3858 = vpow2.f32 %v2119_v42  ;;  %v3348_v38 = vpop.f32.mrb[4].mxu1  ;;  %v2121_v26 = vmul.f32 1.442695, %v2050_v51 }
 0x212   : > { %v3857_v36 = vpop.eup %3856  ;;  %3860 = vrcp.f32 %v2237_v40  ;;  %v2238_v11 = vadd.f32 1.0, %v3855_v31  ;;  %v1918_v5 = vmul.f32 %v3348_v38, %v4917_v32  ;;  %v1678_v21 = vpop.f32.mrb[5].mxu1  ;;  %v2117_v42 = vmul.f32 1.442695, %v2048_v19 }
 0x213   : > { %3862 = vrcp.f32 %v2235_v0  ;;  %v2236_v10 = vadd.f32 1.0, %v3857_v36  ;;  %v1916_v43 = vmul.f32 %v4917_v32, %v1678_v21  ;;  %v3349_v35 = vpop.f32.mrb[6].mxu1  ;;  %v2464_v31 = vadd.s32 288, %v4894_v46 }
 0x214   : > { %3864 = vrcp.f32 %v2238_v11  ;;  %v5091_v50 = vadd.f32 %v4936_v23, %v1918_v5  ;;  %v1919_v29 = vmul.f32 %v3349_v35, %v4917_v32  ;;  %v1681_v4 = vpop.f32.mrb[7].mxu1  ;;  %v2467_v35 = vadd.s32 312, %v4894_v46 }
 0x215   : > { %3866 = vrcp.f32 %v2236_v10  ;;  %v5095_v48 = vadd.f32 %v4936_v23, %v1916_v43  ;;  %v1917_v40 = vmul.f32 %v4917_v32, %v1681_v4  ;;  %v5113_v0 = vadd.s32 %v4898_v28, %v2463_v59 }
 0x216   : > { %3868 = vpow2.f32 %v2115_v7  ;;  %v2053_v51 = vsub.f32 0.0, %v5091_v50  ;;  %v5103_v19 = vadd.f32 %v4936_v23, %v1919_v29  ;;  %v2465_v36 = vadd.s32 296, %v4894_v46 }
 0x217   : > { %3870 = vpow2.f32 %v2121_v26  ;;  %v2051_v4 = vsub.f32 0.0, %v5095_v48  ;;  %v5110_v43 = vadd.f32 %v4936_v23, %v1917_v40  ;;  %5919 = vst [vmem:[#allocation18_spill] sm:$0xff] %v5113_v0  ;;  %v5119_v5 = vadd.s32 %v4898_v28, %v2461_v58 }
 0x218   : > { %3872 = vpow2.f32 %v2117_v42  ;;  %v2127_v38 = vmul.f32 1.442695, %v2053_v51  ;;  %v2054_v29 = vsub.f32 0.0, %v5103_v19  ;;  %v5122_v26 = vadd.s32 %v4898_v28, %v2466_v63 }
 0x219   : > { %v2123_v11 = vmul.f32 1.442695, %v2051_v4  ;;  %v2052_v7 = vsub.f32 0.0, %v5110_v43  ;;  %5920 = vst [vmem:[#allocation19_spill] sm:$0xff] %v5119_v5  ;;  %v5125_v59 = vadd.s32 %v4898_v28, %v2464_v31  ;;  %v5128_v42 = vadd.s32 %v4898_v28, %v2467_v35 }
 0x21a   : > { %5921 = vst [vmem:[#allocation20_spill] sm:$0xff] %v5122_v26  ;;  %3874 = vpow2.f32 %v2127_v38  ;;  %v2129_v21 = vmul.f32 1.442695, %v2054_v29  ;;  %v3352_v10 = vpop.f32.mrb[8].mxu1  ;;  %v2470_v58 = vadd.s32 336, %v4894_v46  ;;  %v5134_v31 = vadd.s32 %v4898_v28, %v2465_v36 }
 0x21b   : > { %5922 = vst [vmem:[#allocation21_spill] sm:$0xff] %v5125_v59  ;;  %5923 = vst [vmem:[#allocation22_spill] sm:$0xff] %v5128_v42  ;;  %v3859_v40 = vpop.eup %3858  ;;  %3876 = vpow2.f32 %v2123_v11  ;;  %v2125_v51 = vmul.f32 1.442695, %v2052_v7  ;;  %v1922_v4 = vmul.f32 %v3352_v10, %v4917_v32  ;;  %v1694_v0 = vpop.f32.mrb[9].mxu1  ;;  %v5147_v36 = vadd.s32 320, %v4894_v46 }
 0x21c   : > { %v3861_v5 = vpop.eup %3860  ;;  %v2241_v63 = vadd.f32 1.0, %v3859_v40  ;;  %3878 = vpow2.f32 %v2129_v21  ;;  %v1920_v38 = vmul.f32 %v4917_v32, %v1694_v0  ;;  %v3353_v29 = vpop.f32.mrb[10].mxu1  ;;  %5924 = vst [vmem:[#allocation23_spill] sm:$0xff] %v5134_v31 }
 0x21d   : > { %v3863_v26 = vpop.eup %3862  ;;  %v2365_v35 = vmul.f32 %v3861_v5, %v4965_v52  ;;  %3880 = vpow2.f32 %v2125_v51  ;;  %v5138_v11 = vadd.f32 %v4936_v23, %v1922_v4  ;;  %v1923_v7 = vmul.f32 %v3353_v29, %v4917_v32  ;;  %v1697_v10 = vpop.f32.mrb[11].mxu1 }
 0x21e   : > { %v3865_v42 = vpop.eup %3864  ;;  %v2363_v40 = vmul.f32 %v3863_v26, %v4975_v49  ;;  %v5143_v21 = vadd.f32 %v4936_v23, %v1920_v38  ;;  %v1921_v0 = vmul.f32 %v4917_v32, %v1697_v10  ;;  %v5155_v4 = vadd.s32 %v4898_v28, %v2470_v58 }
 0x21f   : > { %v3867_v31 = vpop.eup %3866  ;;  %v2366_v52 = vmul.f32 %v3865_v42, %v4986_v6  ;;  %v2057_v5 = vsub.f32 0.0, %v5138_v11  ;;  %v5152_v51 = vadd.f32 %v4936_v23, %v1923_v7  ;;  %3882 = vrcp.f32 %v2241_v63 }
 0x220   : > { %5925 = vst [vmem:[#allocation24_spill] sm:$0xff] %v5155_v4  ;;  %v3869_v49 = vpop.eup %3868  ;;  %v2364_v26 = vmul.f32 %v3867_v31, %v4994_v18  ;;  %v2055_v38 = vsub.f32 0.0, %v5143_v21  ;;  %v5160_v29 = vadd.f32 %v4936_v23, %v1921_v0  ;;  %v2752_v6 = vsel %vm2560_vm1, %v2365_v35, 0.0 }
 0x221   : > { %v3871_v10 = vpop.eup %3870  ;;  %v2750_v42 = vsel %vm2558_vm2, %v2363_v40, 0.0  ;;  %v2239_v7 = vadd.f32 1.0, %v3869_v49  ;;  %v2058_v58 = vsub.f32 0.0, %v5152_v51  ;;  %v2753_v18 = vsel %vm2561_vm3, %v2366_v52, 0.0 }
 0x222   : > { %v3873_v4 = vpop.eup %3872  ;;  %v2751_v63 = vsel %vm2559_vm4, %v2364_v26, 0.0  ;;  %v2242_v31 = vadd.f32 1.0, %v3871_v10  ;;  %v2135_v0 = vmul.f32 1.442695, %v2057_v5  ;;  %v2131_v15 = vmul.f32 1.442695, %v2055_v38 }
 0x223   : > { %v2815_v59 = vadd.f32 %v2751_v63, %v2750_v42  ;;  %3884 = vrcp.f32 %v2239_v7  ;;  %v2240_v25 = vadd.f32 1.0, %v3873_v4  ;;  %v3356_v35 = vpop.f32.mrb[12].mxu1  ;;  %v2137_v24 = vmul.f32 1.442695, %v2058_v58 }
 0x224   : > { %v3875_v13 = vpop.eup %3874  ;;  %3886 = vrcp.f32 %v2242_v31  ;;  %v2056_v40 = vsub.f32 0.0, %v5160_v29  ;;  %v1926_v49 = vmul.f32 %v3356_v35, %v4917_v32  ;;  %v1710_v47 = vpop.f32.mrb[13].mxu1  ;;  %vm2576_vm1 = vcmp.lt.s32.totalorder %v4989_v44, 1024 }
 0x225   : > { %v3877_v53 = vpop.eup %3876  ;;  %v2816_v52 = vadd.f32 %v2815_v59, %v2752_v6  ;;  %3888 = vrcp.f32 %v2240_v25  ;;  %v2245_v45 = vadd.f32 1.0, %v3875_v13  ;;  %v1924_v5 = vmul.f32 %v4917_v32, %v1710_v47  ;;  %v3357_v26 = vpop.f32.mrb[14].mxu1 }
 0x226   : > { %v3879_v4 = vpop.eup %3878  ;;  %v2243_v38 = vadd.f32 1.0, %v3877_v53  ;;  %3890 = vpow2.f32 %v2135_v0  ;;  %v5177_v10 = vadd.f32 %v4936_v23, %v1926_v49  ;;  %v1927_v42 = vmul.f32 %v3357_v26, %v4917_v32  ;;  %v1713_v7 = vpop.f32.mrb[15].mxu1 }
 0x227   : > { %v3881_v58 = vpop.eup %3880  ;;  %v2817_v59 = vadd.f32 %v2816_v52, %v2753_v18  ;;  %3892 = vrcp.f32 %v2245_v45  ;;  %v2246_v13 = vadd.f32 1.0, %v3879_v4  ;;  %v5182_v47 = vadd.f32 %v4936_v23, %v1924_v5 }
 0x228   : > { %3894 = vrcp.f32 %v2243_v38  ;;  %v2244_v25 = vadd.f32 1.0, %v3881_v58  ;;  %v2061_v6 = vsub.f32 0.0, %v5177_v10  ;;  %v5186_v63 = vadd.f32 %v4936_v23, %v1927_v42 }
 0x229   : > { %3896 = vrcp.f32 %v2246_v13  ;;  %v2133_v18 = vmul.f32 1.442695, %v2056_v40  ;;  %v2059_v31 = vsub.f32 0.0, %v5182_v47  ;;  %v1925_v0 = vmul.f32 %v4917_v32, %v1713_v7  ;;  %v3883_v35 = vpop.eup %3882 }
 0x22a   : > { %3898 = vrcp.f32 %v2244_v25  ;;  %v2143_v49 = vmul.f32 1.442695, %v2061_v6  ;;  %v2062_v53 = vsub.f32 0.0, %v5186_v63  ;;  %v5194_v52 = vadd.s32 344, %v4894_v46 }
 0x22b   : > { %3900 = vpow2.f32 %v2131_v15  ;;  %v2139_v45 = vmul.f32 1.442695, %v2059_v31  ;;  %v5198_v5 = vadd.f32 %v4936_v23, %v1925_v0  ;;  %v3360_v40 = vpop.f32.mrb[16].mxu1  ;;  %v5202_v26 = vadd.s32 %v4898_v28, %v5147_v36 }
 0x22c   : > { %3902 = vpow2.f32 %v2137_v24  ;;  %v2145_v4 = vmul.f32 1.442695, %v2062_v53  ;;  %v1930_v38 = vmul.f32 %v3360_v40, %v4917_v32  ;;  %v1726_v42 = vpop.f32.mrb[17].mxu1  ;;  %v5207_v7 = vadd.s32 328, %v4894_v46 }
 0x22d   : > { %5926 = vst [vmem:[#allocation25_spill] sm:$0xff] %v5202_v26  ;;  %v3885_v15 = vpop.eup %3884  ;;  %v2369_v58 = vmul.f32 %v3883_v35, %v5041_v2  ;;  %3904 = vpow2.f32 %v2133_v18  ;;  %v2060_v13 = vsub.f32 0.0, %v5198_v5  ;;  %v1928_v25 = vmul.f32 %v4917_v32, %v1726_v42  ;;  %v3361_v36 = vpop.f32.mrb[18].mxu1 }
 0x22e   : > { %v3887_v6 = vpop.eup %3886  ;;  %v2367_v31 = vmul.f32 %v3885_v15, %v5047_v3  ;;  %3906 = vpow2.f32 %v2143_v49  ;;  %v5214_v24 = vadd.f32 %v4936_v23, %v1930_v38  ;;  %v1931_v0 = vmul.f32 %v3361_v36, %v4917_v32  ;;  %v1729_v53 = vpop.f32.mrb[19].mxu1 }
 0x22f   : > { %v3889_v40 = vpop.eup %3888  ;;  %v2370_v26 = vmul.f32 %v3887_v6, %v5056_v8  ;;  %3908 = vpow2.f32 %v2139_v45  ;;  %v2141_v2 = vmul.f32 1.442695, %v2060_v13  ;;  %v5219_v18 = vadd.f32 %v4936_v23, %v1928_v25 }
 0x230   : > { %v3891_v35 = vpop.eup %3890  ;;  %v2754_v42 = vsel %vm2562_vm5, %v2367_v31, 0.0  ;;  %v2368_v3 = vmul.f32 %v3889_v40, %v5066_v12  ;;  %3910 = vpow2.f32 %v2145_v4  ;;  %v2065_v49 = vsub.f32 0.0, %v5214_v24 }
 0x231   : > { %v3893_v38 = vpop.eup %3892  ;;  %v2756_v15 = vsel %vm2564_vm6, %v2369_v58, 0.0  ;;  %v2818_v36 = vadd.f32 %v2817_v59, %v2754_v42  ;;  %v2249_v8 = vadd.f32 1.0, %v3891_v35  ;;  %3912 = vpow2.f32 %v2141_v2 }
 0x232   : > { %v3895_v45 = vpop.eup %3894  ;;  %v2755_v13 = vsel %vm2563_vm7, %v2368_v3, 0.0  ;;  %v2373_v25 = vmul.f32 %v3893_v38, %v5091_v50  ;;  %v2151_v39 = vmul.f32 1.442695, %v2065_v49  ;;  %v2063_v6 = vsub.f32 0.0, %v5219_v18 }
 0x233   : > { %v3897_v12 = vpop.eup %3896  ;;  %v2819_v4 = vadd.f32 %v2818_v36, %v2755_v13  ;;  %v2371_v31 = vmul.f32 %v3895_v45, %v5095_v48  ;;  %3914 = vrcp.f32 %v2249_v8  ;;  %v5234_v33 = vadd.f32 %v4936_v23, %v1931_v0  ;;  %v3364_v59 = vpop.f32.mrb[20].mxu1 }
 0x234   : > { %v3899_v58 = vpop.eup %3898  ;;  %v2757_v60 = vsel %vm2565_vm8, %v2370_v26, 0.0  ;;  %v2760_v50 = vsel %vm2568_vm9, %v2373_v25, 0.0  ;;  %3916 = vpow2.f32 %v2151_v39  ;;  %v2147_v40 = vmul.f32 1.442695, %v2063_v6  ;;  %v1742_v2 = vpop.f32.mrb[21].mxu1 }
 0x235   : > { %v3901_v35 = vpop.eup %3900  ;;  %v2820_v42 = vadd.f32 %v2819_v4, %v2756_v15  ;;  %v2374_v48 = vmul.f32 %v3897_v12, %v5103_v19  ;;  %v2372_v3 = vmul.f32 %v3899_v58, %v5110_v43  ;;  %v2066_v0 = vsub.f32 0.0, %v5234_v33  ;;  %v3365_v49 = vpop.f32.mrb[22].mxu1 }
 0x236   : > { %v3903_v38 = vpop.eup %3902  ;;  %v2758_v30 = vsel %vm2566_vm10, %v2371_v31, 0.0  ;;  %v2247_v26 = vadd.f32 1.0, %v3901_v35  ;;  %3918 = vpow2.f32 %v2147_v40  ;;  %v1929_v62 = vmul.f32 %v4917_v32, %v1729_v53  ;;  %v1745_v36 = vpop.f32.mrb[23].mxu1 }
 0x237   : > { %v3905_v8 = vpop.eup %3904  ;;  %v2821_v45 = vadd.f32 %v2820_v42, %v2757_v60  ;;  %v2759_v15 = vsel %vm2567_vm11, %v2372_v3, 0.0  ;;  %v2250_v19 = vadd.f32 1.0, %v3903_v38  ;;  %v2153_v13 = vmul.f32 1.442695, %v2066_v0 }
 0x238   : > { %v3907_v43 = vpop.eup %3906  ;;  %3920 = vrcp.f32 %v2247_v26  ;;  %v2248_v25 = vadd.f32 1.0, %v3905_v8  ;;  %v5249_v39 = vadd.f32 %v4936_v23, %v1929_v62  ;;  %v1934_v57 = vmul.f32 %v3364_v59, %v4917_v32 }
 0x239   : > { %v3909_v6 = vpop.eup %3908  ;;  %v2822_v12 = vadd.f32 %v2821_v45, %v2758_v30  ;;  %3922 = vrcp.f32 %v2250_v19  ;;  %v2253_v53 = vadd.f32 1.0, %v3907_v43  ;;  %v1932_v4 = vmul.f32 %v4917_v32, %v1742_v2 }
 0x23a   : > { %v3911_v31 = vpop.eup %3910  ;;  %3924 = vrcp.f32 %v2248_v25  ;;  %v2251_v54 = vadd.f32 1.0, %v3909_v6  ;;  %v2064_v58 = vsub.f32 0.0, %v5249_v39  ;;  %v5256_v60 = vadd.f32 %v4936_v23, %v1934_v57 }
 0x23b   : > { %v3913_v40 = vpop.eup %3912  ;;  %v2823_v35 = vadd.f32 %v2822_v12, %v2759_v15  ;;  %3926 = vrcp.f32 %v2253_v53  ;;  %v2254_v59 = vadd.f32 1.0, %v3911_v31  ;;  %v5260_v42 = vadd.f32 %v4936_v23, %v1932_v4  ;;  %v3368_v38 = vpop.f32.mrb[24].mxu1 }
 0x23c   : > { %3928 = vrcp.f32 %v2251_v54  ;;  %v2252_v2 = vadd.f32 1.0, %v3913_v40  ;;  %v2149_v3 = vmul.f32 1.442695, %v2064_v58  ;;  %v2069_v0 = vsub.f32 0.0, %v5256_v60  ;;  %v1758_v45 = vpop.f32.mrb[25].mxu1 }
 0x23d   : > { %v3915_v30 = vpop.eup %3914  ;;  %v2824_v26 = vadd.f32 %v2823_v35, %v2760_v50  ;;  %3930 = vrcp.f32 %v2254_v59  ;;  %v2067_v62 = vsub.f32 0.0, %v5260_v42  ;;  %v1935_v8 = vmul.f32 %v3365_v49, %v4917_v32  ;;  %v3369_v57 = vpop.f32.mrb[26].mxu1 }
 0x23e   : > { %v3917_v15 = vpop.eup %3916  ;;  %v2761_v19 = vsel %vm2569_vm12, %v2374_v48, 0.0  ;;  %3932 = vrcp.f32 %v2252_v2  ;;  %v2159_v43 = vmul.f32 1.442695, %v2069_v0  ;;  %v1933_v25 = vmul.f32 %v4917_v32, %v1745_v36  ;;  %v5273_v49 = vpop.f32.mrb[27].mxu1 }
 0x23f   : > { %v2377_v50 = vmul.f32 %v3915_v30, %v5138_v11  ;;  %v2825_v6 = vadd.f32 %v2824_v26, %v2761_v19  ;;  %vm2574_vm2 = vcmp.lt.s32.totalorder %v5005_v61, 1024  ;;  %v2257_v12 = vadd.f32 1.0, %v3917_v15 }
 0x240   : > { %3934 = vpow2.f32 %v2153_v13  ;;  %v3919_v53 = vpop.eup %3918  ;;  %vm2577_vm3 = vcmp.lt.s32.totalorder %v5009_v17, 1024  ;;  %v2155_v1 = vmul.f32 1.442695, %v2067_v62  ;;  %v5277_v48 = vadd.f32 %v4936_v23, %v1935_v8 }
 0x241   : > { %3936 = vpow2.f32 %v2149_v3  ;;  %v5280_v36 = vadd.f32 %v4936_v23, %v1933_v25  ;;  %vm2575_vm4 = vcmp.lt.s32.totalorder %v5013_v37, 1024  ;;  %v2255_v11 = vadd.f32 1.0, %v3919_v53 }
 0x242   : > { %3938 = vrcp.f32 %v2257_v12  ;;  %v1938_v4 = vmul.f32 %v3368_v38, %v4917_v32  ;;  %v1936_v13 = vmul.f32 %v4917_v32, %v1758_v45  ;;  %v3921_v31 = vpop.eup %3920  ;;  %v2070_v54 = vsub.f32 0.0, %v5277_v48 }
 0x243   : > { %3940 = vpow2.f32 %v2159_v43  ;;  %v2068_v58 = vsub.f32 0.0, %v5280_v36  ;;  %v1939_v40 = vmul.f32 %v3369_v57, %v4917_v32  ;;  %v3923_v35 = vpop.eup %3922  ;;  %v2375_v59 = vmul.f32 %v3921_v31, %v5143_v21 }
 0x244   : > { %3942 = vrcp.f32 %v2255_v11  ;;  %v5290_v2 = vadd.f32 %v4936_v23, %v1938_v4  ;;  %v5293_v3 = vadd.f32 %v4936_v23, %v1936_v13  ;;  %v3925_v0 = vpop.eup %3924  ;;  %v2378_v38 = vmul.f32 %v3923_v35, %v5152_v51  ;;  %v3372_v62 = vpop.f32.mrb[28].mxu1 }
 0x245   : > { %3944 = vpow2.f32 %v2155_v1  ;;  %v2161_v30 = vmul.f32 1.442695, %v2070_v54  ;;  %v2157_v26 = vmul.f32 1.442695, %v2068_v58  ;;  %v3927_v8 = vpop.eup %3926  ;;  %v2762_v45 = vsel %vm2570_vm13, %v2375_v59, 0.0  ;;  %v1774_v43 = vpop.f32.mrb[29].mxu1 }
 0x246   : > { %v2376_v21 = vmul.f32 %v3925_v0, %v5160_v29  ;;  %vm2578_vm5 = vcmp.lt.s32.totalorder %v5019_v22, 1024  ;;  %v2073_v15 = vsub.f32 0.0, %v5290_v2  ;;  %v2071_v19 = vsub.f32 0.0, %v5293_v3  ;;  %v3929_v25 = vpop.eup %3928  ;;  %v5305_v53 = vpop.f32.mrb[30].mxu1 }
 0x247   : > { %v2764_v51 = vsel %vm2572_vm14, %v2377_v50, 0.0  ;;  %v2826_v57 = vadd.f32 %v2825_v6, %v2762_v45  ;;  %v2381_v12 = vmul.f32 %v3927_v8, %v5177_v10  ;;  %3946 = vpow2.f32 %v2161_v30  ;;  %v3931_v34 = vpop.eup %3930  ;;  %v5310_v4 = vpop.f32.mrb[31].mxu1 }
 0x248   : > { %v2763_v29 = vsel %vm2571_vm15, %v2376_v21, 0.0  ;;  %v2379_v1 = vmul.f32 %v3929_v25, %v5182_v47  ;;  %3948 = vpow2.f32 %v2157_v26  ;;  %v2167_v11 = vmul.f32 1.442695, %v2073_v15  ;;  %v3933_v13 = vpop.eup %3932 }
 0x249   : > { %v2765_v55 = vsel %vm2573_vm0, %v2378_v38, 0.0  ;;  %v2827_v50 = vadd.f32 %v2826_v57, %v2763_v29  ;;  %v2382_v10 = vmul.f32 %v3931_v34, %v5186_v63  ;;  %v2163_v6 = vmul.f32 1.442695, %v2071_v19 }
 0x24a   : > { %v3935_v31 = vpop.eup %3934  ;;  %v2768_v54 = vsel %vm2576_vm1, %v2381_v12, 0.0  ;;  %v2380_v56 = vmul.f32 %v3933_v13, %v5198_v5  ;;  %3950 = vpow2.f32 %v2167_v11  ;;  %v5319_v47 = vadd.f32 %v4936_v23, %v1939_v40 }
 0x24b   : > { %v3937_v58 = vpop.eup %3936  ;;  %v2828_v35 = vadd.f32 %v2827_v50, %v2764_v51  ;;  %v2766_v16 = vsel %vm2574_vm2, %v2379_v1, 0.0  ;;  %v2258_v59 = vadd.f32 1.0, %v3935_v31  ;;  %3952 = vpow2.f32 %v2163_v6 }
 0x24c   : > { %v3939_v0 = vpop.eup %3938  ;;  %v2769_v63 = vsel %vm2577_vm3, %v2382_v10, 0.0  ;;  %v2256_v38 = vadd.f32 1.0, %v3937_v58  ;;  %v2074_v44 = vsub.f32 0.0, %v5319_v47  ;;  %v1937_v5 = vmul.f32 %v4917_v32, %v5273_v49 }
 0x24d   : > { %v3941_v30 = vpop.eup %3940  ;;  %v2829_v40 = vadd.f32 %v2828_v35, %v2765_v55  ;;  %v2767_v26 = vsel %vm2575_vm4, %v2380_v56, 0.0  ;;  %3954 = vrcp.f32 %v2258_v59  ;;  %v1942_v61 = vmul.f32 %v3372_v62, %v4917_v32  ;;  %v3376_v15 = vpop.f32.mrb[32].mxu1 }
 0x24e   : > { %v3943_v8 = vpop.eup %3942  ;;  %3956 = vrcp.f32 %v2256_v38  ;;  %v2261_v45 = vadd.f32 1.0, %v3941_v30  ;;  %v2169_v21 = vmul.f32 1.442695, %v2074_v44  ;;  %v5332_v17 = vadd.f32 %v4936_v23, %v1937_v5  ;;  %v1790_v62 = vpop.f32.mrb[33].mxu1 }
 0x24f   : > { %v3945_v19 = vpop.eup %3944  ;;  %v2830_v25 = vadd.f32 %v2829_v40, %v2766_v16  ;;  %v5335_v49 = vmul.f32 %v3939_v0, %v5214_v24  ;;  %vm2580_vm6 = vcmp.lt.s32.totalorder %v5016_v41, 1024  ;;  %v2383_v37 = vmul.f32 %v3943_v8, %v5219_v18  ;;  %v5346_v24 = vpop.f32.mrb[34].mxu1 }
 0x250   : > { %v5340_v51 = vadd.f32 %v4936_v23, %v1942_v61  ;;  %vm2581_vm7 = vcmp.lt.s32.totalorder %v5022_v9, 1024  ;;  %vm2579_vm8 = vcmp.lt.s32.totalorder %v5025_v27, 1024  ;;  %3958 = vrcp.f32 %v2261_v45  ;;  %v5351_v13 = vpop.f32.mrb[35].mxu1  ;;  %v5404_v9 = vld [vmem:[%s5881_s5] ss:$0 sm:$0xff] }
 0x251   : > { %v2259_v57 = vadd.f32 1.0, %v3945_v19  ;;  %v2072_v12 = vsub.f32 0.0, %v5332_v17  ;;  %v1940_v34 = vmul.f32 %v4917_v32, %v1774_v43  ;;  %v3947_v29 = vpop.eup %3946  ;;  %v2831_v1 = vadd.f32 %v2830_v25, %v2767_v26 }
 0x252   : > { %v2770_v18 = vsel %vm2578_vm5, %v2383_v37, 0.0  ;;  %3960 = vpow2.f32 %v2169_v21  ;;  %v2077_v11 = vsub.f32 0.0, %v5340_v51  ;;  %v3949_v55 = vpop.eup %3948  ;;  %v2262_v50 = vadd.f32 1.0, %v3947_v29  ;;  %v5927_v21 = vld [vmem:[#allocation10_spill] sm:$0xff] }
 0x253   : > { %3962 = vrcp.f32 %v2259_v57  ;;  %v2165_v10 = vmul.f32 1.442695, %v2072_v12  ;;  %v5354_v6 = vadd.f32 %v4936_v23, %v1940_v34  ;;  %v2832_v43 = vadd.f32 %v2831_v1, %v2768_v54  ;;  %v5928_v57 = vld [vmem:[#allocation11_spill] sm:$0xff] }
 0x254   : > { %v2260_v31 = vadd.f32 1.0, %v3949_v55  ;;  %v2175_v56 = vmul.f32 1.442695, %v2077_v11  ;;  %v1943_v58 = vmul.f32 %v5305_v53, %v4917_v32  ;;  %v3951_v22 = vpop.eup %3950  ;;  %vm2582_vm9 = vcmp.lt.s32.totalorder %v5036_v14, 1024 }
 0x255   : > { %3964 = vrcp.f32 %v2262_v50  ;;  %v2075_v35 = vsub.f32 0.0, %v5354_v6  ;;  %v1941_v16 = vmul.f32 %v4917_v32, %v5310_v4  ;;  %v1946_v59 = vmul.f32 %v3376_v15, %v4917_v32  ;;  %v3953_v0 = vpop.eup %3952 }
 0x256   : > { %v2833_v38 = vadd.f32 %v2832_v43, %v2769_v63  ;;  %3966 = vrcp.f32 %v2260_v31  ;;  %v2265_v54 = vadd.f32 1.0, %v3951_v22  ;;  %v5364_v44 = vadd.f32 %v4936_v23, %v1943_v58  ;;  %v3380_v61 = vpop.f32.mrb[36].mxu1 }
 0x257   : > { %v2263_v5 = vadd.f32 1.0, %v3953_v0  ;;  %3968 = vpow2.f32 %v2165_v10  ;;  %v2171_v53 = vmul.f32 1.442695, %v2075_v35  ;;  %v5367_v30 = vadd.f32 %v4936_v23, %v1941_v16  ;;  %v3955_v40 = vpop.eup %3954  ;;  %v5378_v25 = vpop.f32.mrb[37].mxu1  ;;  %v5416_v0 = vld [vmem:[%s5882_s6] ss:$0 sm:$0xff] }
 0x258   : > { %v2834_v26 = vadd.f32 %v2833_v38, %v2770_v18  ;;  %vm2583_vm10 = vcmp.lt.s32.totalorder %v5059_v20, 1024  ;;  %3970 = vrcp.f32 %v2265_v54  ;;  %v2078_v4 = vsub.f32 0.0, %v5364_v44  ;;  %v3957_v8 = vpop.eup %3956  ;;  %v5383_v29 = vpop.f32.mrb[38].mxu1  ;;  %v5929_v18 = vld [vmem:[#allocation13_spill] sm:$0xff] }
 0x259   : > { %v5372_v63 = vadd.f32 %v4936_v23, %v1946_v59  ;;  %v2386_v45 = vmul.f32 %v3955_v40, %v5234_v33  ;;  %vm2584_vm11 = vcmp.lt.s32.totalorder %v5927_v21, 1024  ;;  %3972 = vrcp.f32 %v2263_v5  ;;  %v5931_v21 = vld [vmem:[#allocation15_spill] sm:$0xff] }
 0x25a   : > { %v2076_v15 = vsub.f32 0.0, %v5367_v30  ;;  %v1944_v19 = vmul.f32 %v4917_v32, %v1790_v62  ;;  %v2384_v37 = vmul.f32 %v3957_v8, %v5249_v39  ;;  %vm2585_vm12 = vcmp.lt.s32.totalorder %v5928_v57, 1024  ;;  %v3959_v33 = vpop.eup %3958  ;;  %v5392_v39 = vpop.f32.mrb[39].mxu1 }
 0x25b   : > { %3974 = vpow2.f32 %v2175_v56  ;;  %v2177_v12 = vmul.f32 1.442695, %v2078_v4  ;;  %v2081_v34 = vsub.f32 0.0, %v5372_v63  ;;  %v2772_v1 = vsel %vm2580_vm6, %v5335_v49, 0.0 }
 0x25c   : > { %vm2586_vm13 = vcmp.lt.s32.totalorder %v5929_v18, 1024  ;;  %3976 = vpow2.f32 %v2171_v53  ;;  %v2173_v32 = vmul.f32 1.442695, %v2076_v15  ;;  %v5390_v62 = vadd.f32 %v4936_v23, %v1944_v19  ;;  %v3961_v11 = vpop.eup %3960 }
 0x25d   : > { %v2773_v55 = vsel %vm2581_vm7, %v2386_v45, 0.0  ;;  %v2771_v50 = vsel %vm2579_vm8, %v2384_v37, 0.0  ;;  %3978 = vpow2.f32 %v2177_v12  ;;  %v2183_v10 = vmul.f32 1.442695, %v2081_v34  ;;  %v3963_v41 = vpop.eup %3962 }
 0x25e   : > { %v2835_v49 = vadd.f32 %v2834_v26, %v2771_v50  ;;  %v2266_v43 = vadd.f32 1.0, %v3961_v11  ;;  %3980 = vpow2.f32 %v2173_v32  ;;  %v2079_v31 = vsub.f32 0.0, %v5390_v62  ;;  %v5422_v54 = vpop.f32.mrb[40].mxu1 }
 0x25f   : > { %v2389_v23 = vmul.f32 %v3959_v33, %v5256_v60  ;;  %v2387_v56 = vmul.f32 %v3963_v41, %v5260_v42  ;;  %3982 = vpow2.f32 %v2183_v10  ;;  %v1947_v27 = vmul.f32 %v5404_v9, %v5346_v24  ;;  %v3965_v58 = vpop.eup %3964 }
 0x260   : > { %v2836_v22 = vadd.f32 %v2835_v49, %v2772_v1  ;;  %3984 = vrcp.f32 %v2266_v43  ;;  %v2179_v35 = vmul.f32 1.442695, %v2079_v31  ;;  %v1945_v16 = vmul.f32 %v5404_v9, %v5351_v13  ;;  %v3967_v59 = vpop.eup %3966  ;;  %v5930_v49 = vld [vmem:[#allocation12_spill] sm:$0xff] }
 0x261   : > { %v2774_v60 = vsel %vm2582_vm9, %v2387_v56, 0.0  ;;  %v2390_v42 = vmul.f32 %v3965_v58, %v5277_v48  ;;  %v5419_v24 = vadd.f32 %v5416_v0, %v1947_v27  ;;  %v1950_v38 = vmul.f32 %v5404_v9, %v3380_v61  ;;  %v3969_v5 = vpop.eup %3968  ;;  %v5428_v48 = vpop.f32.mrb[41].mxu1 }
 0x262   : > { %v2837_v13 = vadd.f32 %v2836_v22, %v2773_v55  ;;  %v2388_v53 = vmul.f32 %v3967_v59, %v5280_v36  ;;  %3986 = vpow2.f32 %v2179_v35  ;;  %v5426_v14 = vadd.f32 %v5416_v0, %v1945_v16  ;;  %v3971_v40 = vpop.eup %3970  ;;  %v5438_v45 = vpop.f32.mrb[42].mxu1 }
 0x263   : > { %v2264_v26 = vadd.f32 1.0, %v3969_v5  ;;  %v2082_v4 = vsub.f32 0.0, %v5419_v24  ;;  %v5432_v8 = vadd.f32 %v5416_v0, %v1950_v38  ;;  %v5436_v61 = vadd.s32 %v4898_v28, %v5207_v7  ;;  %v3973_v36 = vpop.eup %3972  ;;  %v5446_v34 = vpop.f32.mrb[43].mxu1 }
 0x264   : > { %v2838_v15 = vadd.f32 %v2837_v13, %v2774_v60  ;;  %v2775_v19 = vsel %vm2583_vm10, %v2388_v53, 0.0  ;;  %v2080_v37 = vsub.f32 0.0, %v5426_v14  ;;  %v5444_v12 = vadd.s32 368, %v4894_v46  ;;  %v5933_v53 = vld [vmem:[#allocation17_spill] sm:$0xff] }
 0x265   : > { %v3975_v33 = vpop.eup %3974  ;;  %v2776_v1 = vsel %vm2584_vm11, %v2389_v23, 0.0  ;;  %v2391_v7 = vmul.f32 %v3973_v36, %v5293_v3  ;;  %3988 = vrcp.f32 %v2264_v26  ;;  %v2185_v32 = vmul.f32 1.442695, %v2082_v4 }
 0x266   : > { %v3977_v11 = vpop.eup %3976  ;;  %v2777_v20 = vsel %vm2585_vm12, %v2390_v42, 0.0  ;;  %v2839_v55 = vadd.f32 %v2838_v15, %v2775_v19  ;;  %v2269_v50 = vadd.f32 1.0, %v3975_v33  ;;  %v2085_v10 = vsub.f32 0.0, %v5432_v8  ;;  %v5464_v16 = vpop.f32.mrb[44].mxu1  ;;  %v5932_v42 = vld [vmem:[#allocation14_spill] sm:$0xff]  ;;  %v5934_v33 = vld [vmem:[#allocation19_spill] sm:$0xff] }
 0x267   : > { %v3979_v41 = vpop.eup %3978  ;;  %vm2588_vm14 = vcmp.lt.s32.totalorder %v5930_v49, 1024  ;;  %v2778_v43 = vsel %vm2586_vm13, %v2391_v7, 0.0  ;;  %vm2587_vm15 = vcmp.lt.s32.totalorder %v5931_v21, 1024  ;;  %v2267_v31 = vadd.f32 1.0, %v3977_v11 }
 0x268   : > { %3990 = vpow2.f32 %v2185_v32  ;;  %v2181_v3 = vmul.f32 1.442695, %v2080_v37  ;;  %v3981_v23 = vpop.eup %3980  ;;  %v2840_v56 = vadd.f32 %v2839_v55, %v2776_v1  ;;  %v2270_v57 = vadd.f32 1.0, %v3979_v41  ;;  %v5935_v32 = vld [vmem:[#allocation16_spill] sm:$0xff] }
 0x269   : > { %3992 = vrcp.f32 %v2269_v50  ;;  %v1948_v27 = vmul.f32 %v5404_v9, %v5378_v25  ;;  %v3983_v58 = vpop.eup %3982  ;;  %v2268_v22 = vadd.f32 1.0, %v3981_v23  ;;  %v1951_v35 = vmul.f32 %v5404_v9, %v5383_v29  ;;  %v5470_v25 = vpop.f32.mrb[45].mxu1  ;;  %v5936_v23 = vld [vmem:[#allocation18_spill] sm:$0xff] }
 0x26a   : > { %3994 = vrcp.f32 %v2267_v31  ;;  %v1949_v18 = vmul.f32 %v5404_v9, %v5392_v39  ;;  %v3985_v59 = vpop.eup %3984  ;;  %v2841_v60 = vadd.f32 %v2840_v56, %v2777_v20  ;;  %vm2589_vm0 = vcmp.lt.s32.totalorder %v5932_v42, 1024  ;;  %v5480_v26 = vpop.f32.mrb[46].mxu1 }
 0x26b   : > { %3996 = vrcp.f32 %v2270_v57  ;;  %v2191_v38 = vmul.f32 1.442695, %v2085_v10  ;;  %v5468_v5 = vadd.f32 %v5416_v0, %v1948_v27  ;;  %v2393_v13 = vmul.f32 %v3971_v40, %v5290_v2  ;;  %v5485_v2 = vpop.f32.mrb[47].mxu1 }
 0x26c   : > { %vm2590_vm1 = vcmp.lt.s32.totalorder %v5933_v53, 1024  ;;  %3998 = vrcp.f32 %v2268_v22  ;;  %v5475_v29 = vadd.f32 %v5416_v0, %v1951_v35  ;;  %v5478_v39 = vadd.f32 %v5416_v0, %v1949_v18  ;;  %v3987_v4 = vpop.eup %3986 }
 0x26d   : > { %v2842_v36 = vadd.f32 %v2841_v60, %v2778_v43  ;;  %v2273_v15 = vadd.f32 1.0, %v3983_v58  ;;  %v2083_v19 = vsub.f32 0.0, %v5468_v5  ;;  %v1954_v37 = vmul.f32 %v5404_v9, %v5422_v54  ;;  %v5937_v60 = vld [vmem:[#allocation21_spill] sm:$0xff] }
 0x26e   : > { %v2394_v40 = vmul.f32 %v3985_v59, %v5319_v47  ;;  %vm2591_vm2 = vcmp.lt.s32.totalorder %v5934_v33, 1024  ;;  %v2271_v1 = vadd.f32 1.0, %v3987_v4  ;;  %4000 = vpow2.f32 %v2181_v3 }
 0x26f   : > { %v2086_v7 = vsub.f32 0.0, %v5475_v29  ;;  %vm2592_vm3 = vcmp.lt.s32.totalorder %v5935_v32, 1024  ;;  %4002 = vpow2.f32 %v2191_v38  ;;  %v2187_v11 = vmul.f32 1.442695, %v2083_v19  ;;  %v3989_v54 = vpop.eup %3988 }
 0x270   : > { %v2084_v20 = vsub.f32 0.0, %v5478_v39  ;;  %v5493_v55 = vadd.f32 %v5416_v0, %v1954_v37  ;;  %4004 = vrcp.f32 %v2271_v1  ;;  %v1952_v47 = vmul.f32 %v5404_v9, %v5428_v48 }
 0x271   : > { %v2193_v50 = vmul.f32 1.442695, %v2086_v7  ;;  %v1955_v10 = vmul.f32 %v5404_v9, %v5438_v45  ;;  %v2392_v41 = vmul.f32 %v3989_v54, %v5332_v17  ;;  %4006 = vpow2.f32 %v2187_v11  ;;  %v5510_v45 = vpop.f32.mrb[48].mxu1 }
 0x272   : > { %v2189_v43 = vmul.f32 1.442695, %v2084_v20  ;;  %v2089_v31 = vsub.f32 0.0, %v5493_v55  ;;  %v3991_v3 = vpop.eup %3990  ;;  %vm2593_vm4 = vcmp.lt.s32.totalorder %v5936_v23, 1024  ;;  %v5503_v56 = vadd.f32 %v5416_v0, %v1952_v47  ;;  %v5516_v35 = vpop.f32.mrb[49].mxu1 }
 0x273   : > { %4008 = vpow2.f32 %v2193_v50  ;;  %v5506_v57 = vadd.f32 %v5416_v0, %v1955_v10  ;;  %v1953_v48 = vmul.f32 %v5404_v9, %v5446_v34  ;;  %v3993_v17 = vpop.eup %3992  ;;  %v2780_v27 = vsel %vm2588_vm14, %v2393_v13, 0.0  ;;  %v5521_v19 = vpop.f32.mrb[50].mxu1 }
 0x274   : > { %v2779_v58 = vsel %vm2587_vm15, %v2392_v41, 0.0  ;;  %4010 = vpow2.f32 %v2189_v43  ;;  %v2199_v22 = vmul.f32 1.442695, %v2089_v31  ;;  %v3995_v18 = vpop.eup %3994  ;;  %vm2594_vm5 = vcmp.lt.s32.totalorder %v5937_v60, 1024 }
 0x275   : > { %v2843_v59 = vadd.f32 %v2842_v36, %v2779_v58  ;;  %v2274_v38 = vadd.f32 1.0, %v3991_v3  ;;  %v2087_v34 = vsub.f32 0.0, %v5503_v56  ;;  %v2090_v4 = vsub.f32 0.0, %v5506_v57  ;;  %v3997_v49 = vpop.eup %3996  ;;  %v5529_v36 = vpop.f32.mrb[51].mxu1 }
 0x276   : > { %v2395_v13 = vmul.f32 %v3995_v18, %v5354_v6  ;;  %4012 = vrcp.f32 %v2273_v15  ;;  %v5525_v21 = vadd.f32 %v5416_v0, %v1953_v48  ;;  %v1958_v37 = vmul.f32 %v5404_v9, %v5464_v16  ;;  %v3999_v1 = vpop.eup %3998 }
 0x277   : > { %v2781_v7 = vsel %vm2589_vm0, %v2394_v40, 0.0  ;;  %v2844_v11 = vadd.f32 %v2843_v59, %v2780_v27  ;;  %v2397_v20 = vmul.f32 %v3993_v17, %v5340_v51  ;;  %4014 = vpow2.f32 %v2199_v22 }
 0x278   : > { %v2782_v6 = vsel %vm2590_vm1, %v2395_v13, 0.0  ;;  %v2396_v15 = vmul.f32 %v3999_v1, %v5367_v30  ;;  %v2195_v54 = vmul.f32 1.442695, %v2087_v34  ;;  %v2201_v50 = vmul.f32 1.442695, %v2090_v4  ;;  %v4001_v47 = vpop.eup %4000 }
 0x279   : > { %v2845_v10 = vadd.f32 %v2844_v11, %v2781_v7  ;;  %v2398_v16 = vmul.f32 %v3997_v49, %v5364_v44  ;;  %4016 = vrcp.f32 %v2274_v38  ;;  %v2088_v41 = vsub.f32 0.0, %v5525_v21  ;;  %v4003_v42 = vpop.eup %4002  ;;  %v5546_v44 = vpop.f32.mrb[52].mxu1 }
 0x27a   : > { %v2783_v40 = vsel %vm2591_vm2, %v2396_v15, 0.0  ;;  %v2272_v51 = vadd.f32 1.0, %v4001_v47  ;;  %4018 = vpow2.f32 %v2195_v54  ;;  %v5542_v53 = vadd.f32 %v5416_v0, %v1958_v37  ;;  %v4005_v43 = vpop.eup %4004  ;;  %v5550_v58 = vpop.f32.mrb[53].mxu1 }
 0x27b   : > { %v2784_v30 = vsel %vm2592_vm3, %v2397_v20, 0.0  ;;  %v2846_v31 = vadd.f32 %v2845_v10, %v2782_v6  ;;  %v2277_v3 = vadd.f32 1.0, %v4003_v42  ;;  %4020 = vpow2.f32 %v2201_v50  ;;  %v4007_v48 = vpop.eup %4006  ;;  %v5554_v38 = vpop.f32.mrb[54].mxu1  ;;  %v5939_v20 = vld [vmem:[#allocation20_spill] sm:$0xff] }
 0x27c   : > { %v2399_v17 = vmul.f32 %v4005_v43, %v5390_v62  ;;  %4022 = vrcp.f32 %v2272_v51  ;;  %v2197_v33 = vmul.f32 1.442695, %v2088_v41  ;;  %v2093_v27 = vsub.f32 0.0, %v5542_v53  ;;  %v5938_v62 = vld [vmem:[#allocation23_spill] sm:$0xff]  ;;  %v5559_v37 = vpop.f32.mrb[55].mxu1 }
 0x27d   : > { %v4009_v22 = vpop.eup %4008  ;;  %v2847_v18 = vadd.f32 %v2846_v31, %v2783_v40  ;;  %4024 = vrcp.f32 %v2277_v3  ;;  %v2275_v59 = vadd.f32 1.0, %v4007_v48  ;;  %v1956_v32 = vmul.f32 %v5404_v9, %v5470_v25  ;;  %v5941_v40 = vld [vmem:[#allocation25_spill] sm:$0xff] }
 0x27e   : > { %v4011_v34 = vpop.eup %4010  ;;  %v2785_v4 = vsel %vm2593_vm4, %v2398_v16, 0.0  ;;  %vm2595_vm6 = vcmp.lt.s32.totalorder %v5938_v62, 1024  ;;  %v2278_v49 = vadd.f32 1.0, %v4009_v22  ;;  %4026 = vpow2.f32 %v2197_v33  ;;  %v5940_v16 = vld [vmem:[#allocation22_spill] sm:$0xff]  ;;  %v5587_v43 = vpop.f32.mrb[56].mxu1 }
 0x27f   : > { %v2207_v13 = vmul.f32 1.442695, %v2093_v27  ;;  %v2848_v1 = vadd.f32 %v2847_v18, %v2784_v30  ;;  %4028 = vrcp.f32 %v2275_v59  ;;  %v2276_v7 = vadd.f32 1.0, %v4011_v34  ;;  %v5596_v33 = vpop.f32.mrb[57].mxu1 }
 0x280   : > { %v5562_v11 = vadd.f32 %v5416_v0, %v1956_v32  ;;  %v4013_v25 = vpop.eup %4012  ;;  %vm2596_vm7 = vcmp.lt.s32.totalorder %v5939_v20, 1024  ;;  %v2786_v23 = vsel %vm2594_vm5, %v2399_v17, 0.0  ;;  %4030 = vrcp.f32 %v2278_v49  ;;  %v5603_v59 = vpop.f32.mrb[58].mxu1 }
 0x281   : > { %v1959_v6 = vmul.f32 %v5404_v9, %v5480_v26  ;;  %v1957_v15 = vmul.f32 %v5404_v9, %v5485_v2  ;;  %v4015_v54 = vpop.eup %4014  ;;  %v2849_v50 = vadd.f32 %v2848_v1, %v2785_v4  ;;  %v5573_v47 = vadd.s32 %v4898_v28, %v5194_v52 }
 0x282   : > { %4032 = vrcp.f32 %v2276_v7  ;;  %v2091_v10 = vsub.f32 0.0, %v5562_v11  ;;  %vm2597_vm8 = vcmp.lt.s32.totalorder %v5940_v16, 1024  ;;  %v2472_v60 = vadd.s32 352, %v4894_v46 }
 0x283   : > { %4034 = vpow2.f32 %v2207_v13  ;;  %v5579_v41 = vadd.f32 %v5416_v0, %v1959_v6  ;;  %v5582_v26 = vadd.f32 %v5416_v0, %v1957_v15  ;;  %v4017_v2 = vpop.eup %4016  ;;  %v2850_v42 = vadd.f32 %v2849_v50, %v2786_v23 }
 0x284   : > { %vm2598_vm9 = vcmp.lt.s32.totalorder %v5941_v40, 1024  ;;  %v2203_v52 = vmul.f32 1.442695, %v2091_v10  ;;  %v1962_v51 = vmul.f32 %v5404_v9, %v5510_v45  ;;  %v4019_v30 = vpop.eup %4018  ;;  %vm2599_vm10 = vcmp.lt.s32.totalorder %v5436_v61, 1024 }
 0x285   : > { %v2281_v31 = vadd.f32 1.0, %v4015_v54  ;;  %v5592_v3 = vadd.s32 %v4898_v28, %v5444_v12  ;;  %v2094_v48 = vsub.f32 0.0, %v5579_v41  ;;  %v2092_v17 = vsub.f32 0.0, %v5582_v26  ;;  %v4021_v27 = vpop.eup %4020  ;;  %v5942_v54 = vld [vmem:[#allocation24_spill] sm:$0xff] }
 0x286   : > { %v2279_v22 = vadd.f32 1.0, %v4019_v30  ;;  %4036 = vpow2.f32 %v2203_v52  ;;  %v5599_v45 = vadd.f32 %v5416_v0, %v1962_v51  ;;  %v1960_v18 = vmul.f32 %v5404_v9, %v5516_v35  ;;  %v4023_v32 = vpop.eup %4022  ;;  %v5614_v35 = vpop.f32.mrb[59].mxu1 }
 0x287   : > { %v5606_v12 = vadd.s32 %v4898_v28, %v2472_v60  ;;  %v2475_v34 = vadd.s32 376, %v4894_v46  ;;  %v2209_v4 = vmul.f32 1.442695, %v2094_v48  ;;  %v2205_v49 = vmul.f32 1.442695, %v2092_v17  ;;  %v4025_v13 = vpop.eup %4024 }
 0x288   : > { %v2401_v1 = vmul.f32 %v4013_v25, %v5372_v63  ;;  %v2400_v7 = vmul.f32 %v4023_v32, %v5426_v14  ;;  %4038 = vrcp.f32 %v2279_v22  ;;  %v5612_v23 = vadd.f32 %v5416_v0, %v1960_v18  ;;  %v4027_v6 = vpop.eup %4026 }
 0x289   : > { %v2402_v15 = vmul.f32 %v4017_v2, %v5419_v24  ;;  %vm2600_vm11 = vcmp.lt.s32.totalorder %v5942_v54, 1024  ;;  %4040 = vrcp.f32 %v2281_v31  ;;  %v2282_v50 = vadd.f32 1.0, %v4021_v27  ;;  %v4029_v60 = vpop.eup %4028 }
 0x28a   : > { %v2473_v10 = vadd.s32 360, %v4894_v46  ;;  %v2787_v63 = vsel %vm2595_vm6, %v2400_v7, 0.0  ;;  %vm2601_vm12 = vcmp.lt.s32.totalorder %v5573_v47, 1024  ;;  %v2280_v14 = vadd.f32 1.0, %v4027_v6  ;;  %v4031_v52 = vpop.eup %4030 }
 0x28b   : > { %4042 = vpow2.f32 %v2209_v4  ;;  %v2097_v25 = vsub.f32 0.0, %v5599_v45  ;;  %v2851_v51 = vadd.f32 %v2850_v42, %v2787_v63  ;;  %v2403_v24 = vmul.f32 %v4029_v60, %v5468_v5 }
 0x28c   : > { %4044 = vpow2.f32 %v2205_v49  ;;  %v1963_v2 = vmul.f32 %v5404_v9, %v5521_v19  ;;  %v4033_v30 = vpop.eup %4032  ;;  %v2788_v31 = vsel %vm2596_vm7, %v2401_v1, 0.0  ;;  %vm2602_vm13 = vcmp.lt.s32.totalorder %v5606_v12, 1024 }
 0x28d   : > { %4046 = vrcp.f32 %v2280_v14  ;;  %v2095_v62 = vsub.f32 0.0, %v5612_v23  ;;  %v4035_v48 = vpop.eup %4034  ;;  %v2852_v17 = vadd.f32 %v2851_v51, %v2788_v31  ;;  %v2404_v27 = vmul.f32 %v4033_v30, %v5478_v39 }
 0x28e   : > { %4048 = vrcp.f32 %v2282_v50  ;;  %v2539_v5 = vadd.s32 %v4898_v28, %v2473_v10  ;;  %v2789_v42 = vsel %vm2597_vm8, %v2402_v15, 0.0  ;;  %v2790_v19 = vsel %vm2598_vm9, %v2403_v24, 0.0 }
 0x28f   : > { %v2215_v20 = vmul.f32 1.442695, %v2097_v25  ;;  %v2211_v22 = vmul.f32 1.442695, %v2095_v62  ;;  %v2405_v18 = vmul.f32 %v4025_v13, %v5432_v8  ;;  %v2853_v32 = vadd.f32 %v2852_v17, %v2789_v42 }
 0x290   : > { %v5638_v4 = vadd.s32 %v4898_v28, %v2475_v34  ;;  %v5641_v49 = vadd.f32 %v5416_v0, %v1963_v2  ;;  %v4037_v39 = vpop.eup %4036  ;;  %v2406_v1 = vmul.f32 %v4031_v52, %v5475_v29  ;;  %v2791_v16 = vsel %vm2599_vm10, %v2404_v27, 0.0 }
 0x291   : > { %v2285_v7 = vadd.f32 1.0, %v4035_v48  ;;  %v1961_v40 = vmul.f32 %v5404_v9, %v5529_v36  ;;  %v2854_v6 = vadd.f32 %v2853_v32, %v2790_v19  ;;  %vm2604_vm14 = vcmp.lt.s32.totalorder %v5592_v3, 1024 }
 0x292   : > { %v2283_v8 = vadd.f32 1.0, %v4037_v39  ;;  %4050 = vpow2.f32 %v2211_v22  ;;  %v2098_v34 = vsub.f32 0.0, %v5641_v49  ;;  %v4039_v13 = vpop.eup %4038  ;;  %vm2603_vm15 = vcmp.lt.s32.totalorder %v2539_v5, 1024 }
 0x293   : > { %v2476_v15 = vadd.s32 384, %v4894_v46  ;;  %4052 = vpow2.f32 %v2215_v20  ;;  %v5652_v29 = vadd.f32 %v5416_v0, %v1961_v40  ;;  %v4041_v61 = vpop.eup %4040  ;;  %v2855_v50 = vadd.f32 %v2854_v6, %v2791_v16 }
 0x294   : > { %v2407_v10 = vmul.f32 %v4039_v13, %v5503_v56  ;;  %4054 = vrcp.f32 %v2283_v8  ;;  %v2217_v36 = vmul.f32 1.442695, %v2098_v34  ;;  %v2792_v63 = vsel %vm2600_vm11, %v2405_v18, 0.0 }
 0x295   : > { %v4043_v60 = vpop.eup %4042  ;;  %4056 = vrcp.f32 %v2285_v7  ;;  %v2478_v14 = vadd.s32 400, %v4894_v46  ;;  %v2096_v25 = vsub.f32 0.0, %v5652_v29  ;;  %v2793_v51 = vsel %vm2601_vm12, %v2406_v1, 0.0 }
 0x296   : > { %v4045_v52 = vpop.eup %4044  ;;  %v2856_v24 = vadd.f32 %v2855_v50, %v2792_v63  ;;  %v2286_v2 = vadd.f32 1.0, %v4043_v60  ;;  %4058 = vpow2.f32 %v2217_v36  ;;  %v2794_v56 = vsel %vm2602_vm13, %v2407_v10, 0.0 }
 0x297   : > { %v4047_v30 = vpop.eup %4046  ;;  %v2284_v31 = vadd.f32 1.0, %v4045_v52  ;;  %v2213_v62 = vmul.f32 1.442695, %v2096_v25  ;;  %v1966_v54 = vmul.f32 %v5404_v9, %v5546_v44  ;;  %v2542_v42 = vadd.s32 %v4898_v28, %v2476_v15 }
 0x298   : > { %v4049_v48 = vpop.eup %4048  ;;  %v2857_v17 = vadd.f32 %v2856_v24, %v2793_v51  ;;  %v2408_v27 = vmul.f32 %v4047_v30, %v5525_v21  ;;  %4060 = vrcp.f32 %v2286_v2  ;;  %v2409_v47 = vmul.f32 %v4041_v61, %v5493_v55 }
 0x299   : > { %4062 = vrcp.f32 %v2284_v31  ;;  %v5669_v19 = vadd.f32 %v5416_v0, %v1966_v54  ;;  %v1964_v12 = vmul.f32 %v5404_v9, %v5550_v58  ;;  %v2477_v44 = vadd.s32 392, %v4894_v46 }
 0x29a   : > { %v2858_v20 = vadd.f32 %v2857_v17, %v2794_v56  ;;  %v2795_v22 = vsel %vm2603_vm15, %v2408_v27, 0.0  ;;  %4064 = vpow2.f32 %v2213_v62  ;;  %v2410_v21 = vmul.f32 %v4049_v48, %v5506_v57 }
 0x29b   : > { %vm2605_vm0 = vcmp.lt.s32.totalorder %v5638_v4, 1024  ;;  %v2101_v18 = vsub.f32 0.0, %v5669_v19  ;;  %v5679_v55 = vadd.f32 %v5416_v0, %v1964_v12  ;;  %v2544_v1 = vadd.s32 %v4898_v28, %v2478_v14 }
 0x29c   : > { %v4051_v32 = vpop.eup %4050  ;;  %v2859_v39 = vadd.f32 %v2858_v20, %v2795_v22  ;;  %v2479_v58 = vadd.s32 408, %v4894_v46  ;;  %v1967_v5 = vmul.f32 %v5404_v9, %v5554_v38  ;;  %v2796_v57 = vsel %vm2604_vm14, %v2409_v47, 0.0 }
 0x29d   : > { %v4053_v16 = vpop.eup %4052  ;;  %vm2606_vm1 = vcmp.lt.s32.totalorder %v2542_v42, 1024  ;;  %v2287_v7 = vadd.f32 1.0, %v4051_v32  ;;  %v2099_v40 = vsub.f32 0.0, %v5679_v55  ;;  %v2543_v34 = vadd.s32 %v4898_v28, %v2477_v44 }
 0x29e   : > { %v4055_v6 = vpop.eup %4054  ;;  %v2860_v8 = vadd.f32 %v2859_v39, %v2796_v57  ;;  %v2223_v13 = vmul.f32 1.442695, %v2101_v18  ;;  %v5690_v15 = vadd.f32 %v5416_v0, %v1967_v5  ;;  %v2797_v38 = vsel %vm2605_vm0, %v2410_v21, 0.0 }
 0x29f   : > { %v4057_v61 = vpop.eup %4056  ;;  %v2411_v50 = vmul.f32 %v4055_v6, %v5562_v11  ;;  %4066 = vrcp.f32 %v2287_v7  ;;  %v2219_v3 = vmul.f32 1.442695, %v2099_v40  ;;  %vm2608_vm2 = vcmp.lt.s32.totalorder %v2544_v1, 1024 }
 0x2a0   : > { %v4059_v10 = vpop.eup %4058  ;;  %v2861_v36 = vadd.f32 %v2860_v8, %v2797_v38  ;;  %v2480_v60 = vadd.s32 416, %v4894_v46  ;;  %v2102_v63 = vsub.f32 0.0, %v5690_v15  ;;  %v2289_v25 = vadd.f32 1.0, %v4053_v16 }
 0x2a1   : > { %v2798_v14 = vsel %vm2606_vm1, %v2411_v50, 0.0  ;;  %4068 = vpow2.f32 %v2219_v3  ;;  %v1965_v52 = vmul.f32 %v5404_v9, %v5559_v37  ;;  %v2290_v24 = vadd.f32 1.0, %v4059_v10 }
 0x2a2   : > { %v4061_v4 = vpop.eup %4060  ;;  %v2862_v51 = vadd.f32 %v2861_v36, %v2798_v14  ;;  %4070 = vpow2.f32 %v2223_v13  ;;  %v2225_v11 = vmul.f32 1.442695, %v2102_v63  ;;  %v2545_v30 = vadd.s32 %v4898_v28, %v2479_v58 }
 0x2a3   : > { %v4063_v2 = vpop.eup %4062  ;;  %vm2607_vm3 = vcmp.lt.s32.totalorder %v2543_v34, 1024  ;;  %v5702_v56 = vadd.f32 %v5416_v0, %v1965_v52  ;;  %v1970_v31 = vmul.f32 %v5404_v9, %v5587_v43  ;;  %v2413_v54 = vmul.f32 %v4057_v61, %v5542_v53 }
 0x2a4   : > { %v4065_v62 = vpop.eup %4064  ;;  %v2412_v37 = vmul.f32 %v4063_v2, %v5582_v26  ;;  %v2546_v48 = vadd.s32 %v4898_v28, %v2480_v60  ;;  %4072 = vpow2.f32 %v2225_v11  ;;  %v2414_v47 = vmul.f32 %v4061_v4, %v5579_v41 }
 0x2a5   : > { %4074 = vrcp.f32 %v2289_v25  ;;  %v2288_v17 = vadd.f32 1.0, %v4065_v62  ;;  %v2100_v27 = vsub.f32 0.0, %v5702_v56  ;;  %v5711_v42 = vadd.f32 %v5416_v0, %v1970_v31 }
 0x2a6   : > { %v2799_v12 = vsel %vm2607_vm3, %v2412_v37, 0.0  ;;  %4076 = vrcp.f32 %v2290_v24  ;;  %vm2609_vm4 = vcmp.lt.s32.totalorder %v2545_v30, 1024  ;;  %v2800_v26 = vsel %vm2608_vm2, %v2413_v54, 0.0 }
 0x2a7   : > { %v2863_v43 = vadd.f32 %v2862_v51, %v2799_v12  ;;  %4078 = vrcp.f32 %v2288_v17  ;;  %v2221_v53 = vmul.f32 1.442695, %v2100_v27  ;;  %vm2610_vm5 = vcmp.lt.s32.totalorder %v2546_v48, 1024 }
 0x2a8   : > { %v2481_v20 = vadd.s32 424, %v4894_v46  ;;  %v1968_v22 = vmul.f32 %v5404_v9, %v5596_v33  ;;  %v2105_v18 = vsub.f32 0.0, %v5711_v42  ;;  %v1971_v41 = vmul.f32 %v5404_v9, %v5603_v59 }
 0x2a9   : > { %v4067_v44 = vpop.eup %4066  ;;  %v2864_v21 = vadd.f32 %v2863_v43, %v2800_v26  ;;  %4080 = vpow2.f32 %v2221_v53  ;;  %v2801_v32 = vsel %vm2609_vm4, %v2414_v47, 0.0  ;;  %v2482_v5 = vadd.s32 432, %v4894_v46 }
 0x2aa   : > { %v2415_v39 = vmul.f32 %v4067_v44, %v5612_v23  ;;  %v5723_v1 = vadd.f32 %v5416_v0, %v1968_v22  ;;  %v5727_v33 = vadd.f32 %v5416_v0, %v1971_v41  ;;  %v2483_v40 = vadd.s32 440, %v4894_v46 }
 0x2ab   : > { %v4069_v58 = vpop.eup %4068  ;;  %v2865_v16 = vadd.f32 %v2864_v21, %v2801_v32  ;;  %v2547_v23 = vadd.s32 %v4898_v28, %v2481_v20  ;;  %v2231_v34 = vmul.f32 1.442695, %v2105_v18  ;;  %v1969_v50 = vmul.f32 %v5404_v9, %v5614_v35 }
 0x2ac   : > { %v4071_v57 = vpop.eup %4070  ;;  %v2802_v7 = vsel %vm2610_vm5, %v2415_v39, 0.0  ;;  %v2291_v6 = vadd.f32 1.0, %v4069_v58  ;;  %v2103_v59 = vsub.f32 0.0, %v5723_v1  ;;  %v2106_v13 = vsub.f32 0.0, %v5727_v33 }
 0x2ad   : > { %v2866_v8 = vadd.f32 %v2865_v16, %v2802_v7  ;;  %v2548_v10 = vadd.s32 %v4898_v28, %v2482_v5  ;;  %v2293_v36 = vadd.f32 1.0, %v4071_v57  ;;  %v2484_v60 = vadd.s32 448, %v4894_v46 }
 0x2ae   : > { %v4073_v61 = vpop.eup %4072  ;;  %4082 = vrcp.f32 %v2291_v6  ;;  %v2227_v38 = vmul.f32 1.442695, %v2103_v59  ;;  %v2233_v63 = vmul.f32 1.442695, %v2106_v13  ;;  %v5739_v25 = vadd.f32 %v5416_v0, %v1969_v50 }
 0x2af   : > { %v4075_v3 = vpop.eup %4074  ;;  %v2549_v4 = vadd.s32 %v4898_v28, %v2483_v40  ;;  %vm2611_vm6 = vcmp.lt.s32.totalorder %v2547_v23, 1024  ;;  %v2294_v51 = vadd.f32 1.0, %v4073_v61  ;;  %vm2612_vm7 = vcmp.lt.s32.totalorder %v2548_v10, 1024 }
 0x2b0   : > { %v4077_v14 = vpop.eup %4076  ;;  %4084 = vpow2.f32 %v2227_v38  ;;  %v2417_v9 = vmul.f32 %v4075_v3, %v5599_v45  ;;  %v2104_v24 = vsub.f32 0.0, %v5739_v25  ;;  %v2550_v2 = vadd.s32 %v4898_v28, %v2484_v60 }
 0x2b1   : > { %v4079_v52 = vpop.eup %4078  ;;  %4086 = vpow2.f32 %v2231_v34  ;;  %v2418_v0 = vmul.f32 %v4077_v14, %v5641_v49  ;;  %vm2613_vm8 = vcmp.lt.s32.totalorder %v2549_v4, 1024  ;;  %v2485_v17 = vadd.s32 456, %v4894_v46 }
 0x2b2   : > { %v2416_v35 = vmul.f32 %v4079_v52, %v5652_v29  ;;  %4088 = vpow2.f32 %v2233_v63  ;;  %v2229_v62 = vmul.f32 1.442695, %v2104_v24  ;;  %v2804_v37 = vsel %vm2612_vm7, %v2417_v9, 0.0 }
 0x2b3   : > { %v4081_v11 = vpop.eup %4080  ;;  %4090 = vrcp.f32 %v2293_v36  ;;  %v2805_v48 = vsel %vm2613_vm8, %v2418_v0, 0.0  ;;  %vm2614_vm9 = vcmp.lt.s32.totalorder %v2550_v2, 1024  ;;  %v2486_v49 = vadd.s32 464, %v4894_v46 }
 0x2b4   : > { %v2803_v30 = vsel %vm2611_vm6, %v2416_v35, 0.0  ;;  %v2292_v31 = vadd.f32 1.0, %v4081_v11  ;;  %4092 = vrcp.f32 %v2294_v51  ;;  %v2487_v44 = vadd.s32 472, %v4894_v46 }
 0x2b5   : > { %v2867_v54 = vadd.f32 %v2866_v8, %v2803_v30  ;;  %v2551_v21 = vadd.s32 %v4898_v28, %v2485_v17  ;;  %v2552_v41 = vadd.s32 %v4898_v28, %v2486_v49  ;;  %v2489_v38 = vadd.s32 488, %v4894_v46  ;;  %v2894_v17 = vld [vmem:[%s5883_s7 + $0x10] sm:$0xff] (!%p3159_p1) }
 0x2b6   : > { %4094 = vrcp.f32 %v2292_v31  ;;  %v2553_v16 = vadd.s32 %v4898_v28, %v2487_v44  ;;  %v2491_v36 = vadd.s32 504, %v4894_v46  ;;  %vm4212_vm1 = vmmov (!%p3159_p1), 0   ;;  %v2899_v44 = vld [vmem:[%s5883_s7 + $0x38] sm:$0xff] (!%p3159_p1) }
 0x2b7   : > { %v2868_v45 = vadd.f32 %v2867_v54, %v2804_v37  ;;  %4096 = vpow2.f32 %v2229_v62  ;;  %vm2615_vm10 = vcmp.lt.s32.totalorder %v2551_v21, 1024  ;;  %vm2616_vm11 = vcmp.lt.s32.totalorder %v2552_v41, 1024  ;;  %v2901_v41 = vld [vmem:[%s5883_s7 + $0x48] sm:$0xff] (!%p3159_p1) }
 0x2b8   : > { %v4083_v29 = vpop.eup %4082  ;;  %vm2617_vm12 = vcmp.lt.s32.totalorder %v2553_v16, 1024  ;;  %v2555_v60 = vadd.s32 %v4898_v28, %v2489_v38  ;;  %v2557_v9 = vadd.s32 %v4898_v28, %v2491_v36  ;;  %v4213_v49 = vmov (!%p3159_p1), 0.0   ;;  %v2905_v16 = vld [vmem:[%s5883_s7 + $0x68] sm:$0xff] (!%p3159_p1) }
 0x2b9   : > { %v2419_v27 = vmul.f32 %v4083_v29, %v5679_v55  ;;  %v2869_v47 = vadd.f32 %v2868_v45, %v2805_v48  ;;  %v2488_v55 = vadd.s32 480, %v4894_v46  ;;  %v2814_v29 = vld [vmem:[#allocation2] sm:$0x1]  ;;  %3434 = vmatprep.mubr.msk.f32.mxu0 (!%p3159_p1), %vm4212_vm1, %v4213_v49 }
 0x2ba   : > { %v4085_v12 = vpop.eup %4084  ;;  %vm2619_vm14 = vcmp.lt.s32.totalorder %v2555_v60, 1024  ;;  %vm2621_vm0 = vcmp.lt.s32.totalorder %v2557_v9, 1024 }
 0x2bb   : > { %v4087_v43 = vpop.eup %4086  ;;  %v2806_v53 = vsel %vm2614_vm9, %v2419_v27, 0.0  ;;  %v2295_v26 = vadd.f32 1.0, %v4085_v12  ;;  %v2554_v23 = vadd.s32 %v4898_v28, %v2488_v55  ;;  %v4211_v27 = vmov (!%p3159_p1), 0.0|0.0   ;;  %v2895_v12 = vld [vmem:[%s5883_s7 + $0x18] sm:$0xff] (!%p3159_p1) }
 0x2bc   : > { %v4089_v20 = vpop.eup %4088  ;;  %v2870_v22 = vadd.f32 %v2869_v47, %v2806_v53  ;;  %v2297_v32 = vadd.f32 1.0, %v4087_v43  ;;  %3437 = vmatprep.subr.bf16.mxu0 (!%p3159_p1), %v4211_v27  ;;  %v3441_v43 = vpack.c.bf16 (!%p3159_p1), %v2895_v12, %v2894_v17  ;;  %v2896_v53 = vld [vmem:[%s5883_s7 + $0x20] sm:$0xff] (!%p3159_p1)  ;;  %v2903_v55 = vld [vmem:[%s5883_s7 + $0x58] sm:$0xff] (!%p3159_p1) }
 0x2bd   : > { %v4091_v18 = vpop.eup %4090  ;;  %4098 = vrcp.f32 %v2295_v26  ;;  %v2298_v58 = vadd.f32 1.0, %v4089_v20  ;;  %vm2618_vm13 = vcmp.lt.s32.totalorder %v2554_v23, 1024  ;;  %v2897_v26 = vld [vmem:[%s5883_s7 + $0x28] sm:$0xff] (!%p3159_p1)  ;;  %v2908_v23 = vld [vmem:[%s5884_s8] sm:$0x1] (!%p3159_p1) }
 0x2be   : > { %v4093_v39 = vpop.eup %4092  ;;  %v2421_v7 = vmul.f32 %v4091_v18, %v5669_v19  ;;  %4100 = vrcp.f32 %v2297_v32  ;;  %v3444_v20 = vpack.c.bf16 (!%p3159_p1), %v2897_v26, %v2896_v53  ;;  %v2900_v18 = vld [vmem:[%s5883_s7 + $0x40] sm:$0xff] (!%p3159_p1) }
 0x2bf   : > { %v2422_v59 = vmul.f32 %v4093_v39, %v5690_v15  ;;  %4102 = vrcp.f32 %v2298_v58  ;;  %v3450_v32 = vpack.c.bf16 (!%p3159_p1), %v2901_v41, %v2900_v18  ;;  %v2902_v39 = vld [vmem:[%s5883_s7 + $0x50] sm:$0xff] (!%p3159_p1) }
 0x2c0   : > { %v4095_v5 = vpop.eup %4094  ;;  %v2808_v13 = vsel %vm2616_vm11, %v2421_v7, 0.0  ;;  %v3453_v58 = vpack.c.bf16 (!%p3159_p1), %v2903_v55, %v2902_v39  ;;  %v2906_v7 = vld [vmem:[%s5883_s7 + $0x70] sm:$0xff] (!%p3159_p1) }
 0x2c1   : > { %v4097_v57 = vpop.eup %4096  ;;  %v2420_v40 = vmul.f32 %v4095_v5, %v5702_v56  ;;  %v2809_v19 = vsel %vm2617_vm12, %v2422_v59, 0.0  ;;  %v2490_v56 = vadd.s32 496, %v4894_v46  ;;  %v2904_v5 = vld [vmem:[%s5883_s7 + $0x60] sm:$0xff] (!%p3159_p1) }
 0x2c2   : > { %v2296_v6 = vadd.f32 1.0, %v4097_v57  ;;  %v3456_v57 = vpack.c.bf16 (!%p3159_p1), %v2905_v16, %v2904_v5 }
 0x2c3   : > { %v2807_v8 = vsel %vm2615_vm10, %v2420_v40, 0.0  ;;  %v2556_v52 = vadd.s32 %v4898_v28, %v2490_v56  ;;  %v2907_v40 = vld [vmem:[%s5883_s7 + $0x78] sm:$0xff] (!%p3159_p1) }
 0x2c4   : > { %v2871_v34 = vadd.f32 %v2870_v22, %v2807_v8  ;;  %4104 = vrcp.f32 %v2296_v6  ;;  %v2898_v22 = vld [vmem:[%s5883_s7 + $0x30] sm:$0xff] (!%p3159_p1)  ;;  %v3459_v6 = vpack.c.bf16 (!%p3159_p1), %v2907_v40, %v2906_v7 }
 0x2c5   : > { %vm2620_vm15 = vcmp.lt.s32.totalorder %v2556_v52, 1024  ;;  %v3447_v21 = vpack.c.bf16 (!%p3159_p1), %v2899_v44, %v2898_v22 }
 0x2c6   : > { %v2872_v61 = vadd.f32 %v2871_v34, %v2808_v13 }
 0x2c7   : > { %v4099_v50 = vpop.eup %4098 }
 0x2c8   : > { %v2423_v3 = vmul.f32 %v4099_v50, %v5723_v1  ;;  %v2873_v10 = vadd.f32 %v2872_v61, %v2809_v19  ;;  %v4101_v14 = vpop.eup %4100 }
 0x2c9   : > { %v4103_v4 = vpop.eup %4102  ;;  %v2425_v35 = vmul.f32 %v4101_v14, %v5711_v42 }
 0x2ca   : > { %v2810_v15 = vsel %vm2618_vm13, %v2423_v3, 0.0  ;;  %v2426_v1 = vmul.f32 %v4103_v4, %v5727_v33  ;;  %v2892_v33 = vld [vmem:[%s5883_s7] sm:$0xff] (!%p3159_p1) }
 0x2cb   : > { %v2874_v63 = vadd.f32 %v2873_v10, %v2810_v15  ;;  %v2812_v2 = vsel %vm2620_vm15, %v2425_v35, 0.0 }
 0x2cc   : > { %v2813_v30 = vsel %vm2621_vm0, %v2426_v1, 0.0 }
 0x2ce   : > { %v4105_v51 = vpop.eup %4104 }
 0x2cf   : > { %v2424_v24 = vmul.f32 %v4105_v51, %v5739_v25  ;;  %v2893_v25 = vld [vmem:[%s5883_s7 + $0x8] sm:$0xff] (!%p3159_p1) }
 0x2d0   : > { %v3438_v47 = vpack.c.bf16 (!%p3159_p1), %v2893_v25, %v2892_v33 }
 0x2d1   : > { %v2811_v11 = vsel %vm2619_vm14, %v2424_v24, 0.0 }
 0x2d2   : > { %v2875_v46 = vadd.f32 %v2874_v63, %v2811_v11  ;;  %3439 = vmatpush3.bf16.msra.mxu0 (!%p3159_p1), %v3438_v47 }
 0x2d3   : > { %3440 = vmatprep.subr.bf16.mxu0 (!%p3159_p1), %v4211_v27 }
 0x2d4   : > { %v2876_v0 = vadd.f32 %v2875_v46, %v2812_v2 }
 0x2d6   : > { %v2877_v31 = vadd.f32 %v2876_v0, %v2813_v30  ;;  %3442 = vmatpush3.bf16.msra.mxu0 (!%p3159_p1), %v3441_v43 }
 0x2d7   : > { %3443 = vmatprep.subr.bf16.mxu0 (!%p3159_p1), %v4211_v27 }
 0x2d8   : > { %v2878_v62 = vrot.slane %v2877_v31, 4 }
 0x2da   : > { %v2879_v54 = vadd.f32 %v2878_v62, %v2877_v31  ;;  %3445 = vmatpush3.bf16.msra.mxu0 (!%p3159_p1), %v3444_v20 }
 0x2db   : > { %3446 = vmatprep.subr.bf16.mxu0 (!%p3159_p1), %v4211_v27 }
 0x2dc   : > { %v2880_v37 = vrot.slane %v2879_v54, 2 }
 0x2de   : > { %v2881_v45 = vadd.f32 %v2880_v37, %v2879_v54  ;;  %3448 = vmatpush3.bf16.msra.mxu0 (!%p3159_p1), %v3447_v21 }
 0x2df   : > { %3449 = vmatprep.subr.bf16.mxu0 (!%p3159_p1), %v4211_v27 }
 0x2e0   : > { %v2882_v28 = vrot.slane %v2881_v45, 1  ;;  %2889 = sbr.rel (%p3159_p1) target bundleno = 996 (0x3e4), region = 64 }
 0x2e2   : > { %v2883_v48 = vadd.f32 %v2882_v28, %v2881_v45  ;;  %3451 = vmatpush3.bf16.msra.mxu0 (!%p3159_p1), %v3450_v32 }
 0x2e3   : > { %3452 = vmatprep.subr.bf16.mxu0 (!%p3159_p1), %v4211_v27 }
 0x2e4   : > { %v2884_v42 = vadd.f32 %v2883_v48, %v2814_v29 }
 0x2e6   : > { %2885 = vst [vmem:[#allocation2] sm:$0x1] %v2884_v42  ;;  %3454 = vmatpush3.bf16.msra.mxu0 (!%p3159_p1), %v3453_v58 }
 0x2e7   : > { %3455 = vmatprep.subr.bf16.mxu0 %v4211_v27 }
 0x2ea   : > { %3457 = vmatpush3.bf16.msra.mxu0 %v3456_v57 }
 0x2eb   : > { %3458 = vmatprep.subr.bf16.mxu0 %v4211_v27 }
 0x2ed   : > { %v2890_v59 = vld [vmem:[#allocation2] sm:$0x1] }
 0x2ee   : > { %v2891_v8 = vmul.f32 0.0009765625, %v2890_v59  ;;  %3460 = vmatpush3.bf16.msra.mxu0 %v3459_v6 }
 0x2f1   : > { %3435 = vmatmul.mubr.f32.vlgmr.msra.gmra.mrb[0].mxu0 %v2891_v8 }
 0x3c4   : > { %v2975_v34 = vpop.f32.mrb[0].mxu0 }
 0x3c5   : > { %v2976_v13 = vadd.f32 %v2975_v34, %v2908_v23  ;;  %v3436_v61 = vpop.f32.mrb[1].mxu0 }
 0x3c7   : > { %v2979_v38 = vsub.f32 0.0, %v2976_v13 }
 0x3c9   : > { %v2980_v50 = vmul.f32 1.442695, %v2979_v38 }
 0x3cb   : > { %4110 = vpow2.f32 %v2980_v50 }
 0x3d5   : > { %v4111_v19 = vpop.eup %4110 }
 0x3d6   : > { %v2982_v56 = vadd.f32 1.0, %v4111_v19 }
 0x3d8   : > { %4112 = vrcp.f32 %v2982_v56 }
 0x3e2   : > { %v4113_v3 = vpop.eup %4112 }
 0x3e3   : > { %2985 = vst [vmem:[%s4345_s24] sm:$0x1] %v4113_v3 }
 0x3e4 PF: > { %s3160_s17 = sshll.u32 %s4196_s13, 4  ;;  %s2999_s23 = sshll.u32 %s4345_s24, 4  ;;  %s3000_s23 = int_to_ptr.vmem [resolvable:$true] %s2999_s23 }
 0x3e5   : > { %s5826_s20 = scalar_lea.hbm %s5885_s9, %s3160_s17  ;;  %s2987_s14 = scalar_lea.sflag [#allocation4], %s346_s26 }
 0x3e6   : > { %s4114_s15 = scalar_lea.vmem %s3000_s23, 16  ;;  %s4214_s12 = smov [#allocation3]  }
 0x3e7   : > { %p4115_p2 = scmp.ne.s32.totalorder %s3000_s23, %s4114_s15  ;;  %s4118_s27 = sshll.u32 %s4214_s12, 4  ;;  %s4119_s27 = int_to_ptr.vmem [resolvable:$false] %s4118_s27 }
 0x3e8   : > { %s4120_s28 = scalar_lea.vmem %s4119_s27, 32  ;;  %p4121_p6 = scmp.lt.s32.totalorder %s3000_s23, %s4119_s27 }
 0x3e9   : > { %p4116_p4 = pnand %p4115_p2, %p4314_p3  ;;  %p4122_p7 = scmp.lt.s32.totalorder %s4120_s28, %s4114_s15 }
 0x3eb   : > { %p4117_p5 = pneg %p4116_p4  ;;  %p4123_p8 = por %p4122_p7, %p4121_p6 }
 0x3ed   : > { %p4124_p10 = pnand %p4123_p8, %p4117_p5 }
 0x3ef   : > { %4127 = shalt.err (!%p4124_p10)
}
 0x3f0   : > { %s4128_s13 = scalar_lea.hbm %s5826_s20, 16  ;;  %s4132_s29 = scalar_lea.hbm %s5885_s9, 32 }
 0x3f1   : > { %p4129_p11 = scmp.ne.s32.totalorder %s5826_s20, %s4128_s13  ;;  %p4133_p0 = scmp.lt.u32.totalorder %s5826_s20, %s5885_s9 }
 0x3f2   : > { %p4134_p1 = scmp.lt.u32.totalorder %s4132_s29, %s4128_s13  ;;  %p4136_p4 = scmp.lt.u32.totalorder %s4128_s13, %s5826_s20 }
 0x3f3   : > { %p4130_p12 = pnand %p4129_p11, %p4314_p3 }
 0x3f4   : > { %p4135_p2 = por %p4134_p1, %p4133_p0 }
 0x3f5   : > { %p4131_p13 = pneg %p4130_p12 }
 0x3f6   : > { %p4137_p5 = por %p4136_p4, %p4135_p2 }
 0x3f8   : > { %p4138_p6 = pnand %p4137_p5, %p4131_p13 }
 0x3fa   : > { %4141 = shalt.err (!%p4138_p6)
}
 0x3fb   : > { %3477 = dma.vmem_to_hbm [thread:$0]  (%p4314_p3), %s3000_s23, 16, %s5826_s20, %s2987_s14  }
 0x3fc PF: > { %p3483_p7 = scmp.ge.s32.totalorder %s4208_s16, 2  ;;  %s3011_s19 = sand.u32 1, %s4180_s30  }
 0x3fd   : > { %s3012_s15 = scalar_lea.sflag [#allocation4], %s3011_s19 }
 0x3fe   : > { %p3480_p8 = pnand %p3483_p7, %p4324_p9 }
 0x400   : > { %4175 = dma.done.wait (!%p3480_p8), %s3012_s15, 16  }
 0x401   : > { %4177 = vsyncadd (!%p3480_p8), %s3012_s15, 4294967280  ;;  %s22_s16 = sadd.s32 1, %s4208_s16   ;;  %s5943_s12 = sld [smem:[#allocation6_spill]] }
 0x402   : > { %p19_p10 = scmp.ge.s32.totalorder %s22_s16, 6   ;;  %s5944_s13 = sld [smem:[#allocation7_spill]] }
 0x403   : > { %s5945_s14 = sld [smem:[#allocation8_spill]]  ;;  %s5946_s15 = sld [smem:[#allocation9_spill]] }
 0x404   : > { %s5947_s30 = smov %s4184_s10  ;;  %s5948_s10 = smov %s4188_s11 }
 0x405   : > { %s5949_s11 = smov %s4332_s25  ;;  %21 = sbr.rel (!%p19_p10) target bundleno = 5 (0x5), region = 99 }
 0x40c   :  { %3016 = vsyncpa [#allocation4], 1 }
 0x40d   :  { %3018 = vsyncpa [#allocation4 + $0x1], 1 }

</bundles_post_ra>
